<compile_context>
chip_gen: v5e
topology: v5e:2x2
jax: 0.10.0
libtpu: 0.0.40
codegen_flags: <defaults>
</compile_context>

<pallas_src>
import jax
import jax.numpy as jnp
from jax.experimental import pallas as pl
from jax.experimental.pallas import tpu as pltpu

_LANE = 128
_TARGET_BLOCK_BYTES = 4 * 1024 * 1024     # per-buffer tile target
_VMEM_LIMIT_BYTES = 32 * 1024 * 1024      # explicit: v5e default scoped is 16 MiB
_PALLAS_MIN_BYTES = 1 << 20               # below this, plain fused XLA is faster


def _cdiv(a: int, b: int) -> int:
    return -(-a // b)


def _round_down(v: int, m: int) -> int:
    return max(m, (v // m) * m)


def _sublane_multiple(dtype) -> int:
    # Sublane tile height of the packed HBM/VMEM layout: f32 -> 8, bf16 -> 16,
    # int8/fp8 -> 32.
    itemsize = jnp.dtype(dtype).itemsize
    return 8 * max(1, 4 // itemsize)


def _min_grid_blocks() -> int:
    # Only parts that expose 2 TensorCores to a single Pallas grid (v4/v5p
    # megacore, v7x) benefit from forcing several grid blocks; on single-TC
    # v5e/v6e the grid is a serial loop and extra blocks are pure per-step
    # overhead (~0.35 us each).
    try:
        kind = jax.devices()[0].device_kind.lower()
    except Exception:  # pragma: no cover - defensive
        return 1
    if "v7" in kind or "v4" in kind or "v5p" in kind:
        return 4  # >= 2 blocks per core keeps per-core double-buffering alive
    return 1


def _cap_min_blocks(br: int, rows: int, min_blocks: int, mult: int) -> int:
    """Cap block rows so the grid has >= min_blocks steps (multi-TC only)."""
    if min_blocks <= 1 or rows < min_blocks * mult:
        return br
    cap = _cdiv(_cdiv(rows, min_blocks), mult) * mult
    return min(br, cap)


def _spatial_attention_kernel(x_ref, o_ref):
    # 1 - 2*clip(sigmoid(x) - 0.5, 0, 0.5)  ==  1 - max(tanh(x/2), 0)
    # (single EUP transcendental per vreg; f32 compute, cast back to I/O dtype)
    x = x_ref[...].astype(jnp.float32)
    o_ref[...] = (1.0 - jnp.maximum(jnp.tanh(0.5 * x), 0.0)).astype(o_ref.dtype)


def _pallas_elementwise(x: jax.Array, block_shape, grid) -> jax.Array:
    nd, ng = len(block_shape), len(grid)

    def index_map(*gidx):
        # Grid axes tile the leading block axes; trailing axes are whole.
        return tuple(gidx) + (0,) * (nd - ng)

    n = x.size
    itemsize = jnp.dtype(x.dtype).itemsize
    return pl.pallas_call(
        _spatial_attention_kernel,
        out_shape=jax.ShapeDtypeStruct(x.shape, x.dtype),
        grid_spec=pltpu.PrefetchScalarGridSpec(
            num_scalar_prefetch=0,
            grid=grid,
            in_specs=[pl.BlockSpec(block_shape, index_map)],
            out_specs=pl.BlockSpec(block_shape, index_map),
        ),
        compiler_params=pltpu.CompilerParams(
            dimension_semantics=("parallel",) * ng,
            vmem_limit_bytes=_VMEM_LIMIT_BYTES,
        ),
        cost_estimate=pl.CostEstimate(
            flops=3 * n,
            transcendentals=n,
            bytes_accessed=2 * n * itemsize,
        ),
    )(x)


def spatial_attention(x: jax.Array) -> jax.Array:
    """SpatialAttention forward: 1 - 2*clip(sigmoid(x) - 0.5, 0, 0.5)."""
    itemsize = jnp.dtype(x.dtype).itemsize
    nbytes = x.size * itemsize

    if x.ndim < 2 or nbytes < _PALLAS_MIN_BYTES:
        # Tiny tensors: pallas_call dispatch + pipeline prologue dominate, so
        # let XLA fuse the elementwise math instead of launching a kernel.
        xf = x.astype(jnp.float32)
        return (1.0 - jnp.maximum(jnp.tanh(0.5 * xf), 0.0)).astype(x.dtype)

    h, w = x.shape[-2], x.shape[-1]
    smult = _sublane_multiple(x.dtype)
    min_blocks = _min_grid_blocks()

    if w % _LANE == 0 and h % smult == 0:
        # Lane-dense 2-D path. Collapsing every dim above the minor (lane) dim
        # is a free bitcast under the TPU tiled HBM layout: the layout tiles
        # only span the last two dims and H is a multiple of the sublane tile,
        # so the reshape introduces no relayout copy.
        rows = x.size // w
        x2 = x.reshape(rows, w)
        row_bytes = w * itemsize
        br = _round_down(_TARGET_BLOCK_BYTES // max(1, row_bytes), smult)
        br = _cap_min_blocks(br, rows, min_blocks, smult)
        br = min(br, rows)
        # Ragged last block is benign: Pallas masks out-of-bounds stores and
        # this kernel is purely elementwise (no reductions over the block).
        grid = (_cdiv(rows, br),)
        out = _pallas_elementwise(x2, (br, w), grid)
        return out.reshape(x.shape)

    # Narrow / ragged minor dims (e.g. NCHW with small W): keep the last two
    # dims whole in the block (always layout-legal, no relayout copy) and tile
    # over the collapsed leading dims. Merging dims strictly above the tiled
    # last-two dims is always a free bitcast.
    rows = x.size // (h * w)
    x3 = x.reshape(rows, h, w)
    slab_bytes = h * w * itemsize

    if slab_bytes <= _TARGET_BLOCK_BYTES:
        br = max(1, _TARGET_BLOCK_BYTES // slab_bytes)
        br = _cap_min_blocks(br, rows, min_blocks, 1)
        br = min(br, rows)
        grid = (_cdiv(rows, br),)
        out = _pallas_elementwise(x3, (br, h, w), grid)
    else:
        # Single (1, H, W) slab too large for the target tile: tile H as well
        # (block H stays a multiple of the sublane tile, W stays whole).
        bh = min(h, _round_down(_TARGET_BLOCK_BYTES // max(1, w * itemsize), smult))
        grid = (rows, _cdiv(h, bh))
        out = _pallas_elementwise(x3, (1, bh, w), grid)
    return out.reshape(x.shape)


def _reference(x):
    # Literal translation of the PyTorch forward (f32 math).
    x_sig = jax.nn.sigmoid(x.astype(jnp.float32))
    score = jnp.clip(x_sig - 0.5, 0.0, 0.5)
    return (1.0 - score / 0.5).astype(x.dtype)


if __name__ == "__main__":
    key = jax.random.PRNGKey(0)
    k1, k2, k3 = jax.random.split(key, 3)

    # Small NCHW feature map (module-typical): fused XLA fast path.
    x_small = jax.random.normal(k1, (2, 4, 16, 16), dtype=jnp.float32)
    # Lane-dense case (W % 128 == 0, H % 8 == 0): 2-D Pallas path.
    x_wide = jax.random.normal(k2, (4, 8, 64, 256), dtype=jnp.float32)
    # Narrow-W case: 3-D Pallas path (full last-two-dims blocks, no relayout).
    x_narrow = jax.random.normal(k3, (4, 32, 48, 80), dtype=jnp.float32)

    for name, x in (("small", x_small), ("wide", x_wide), ("narrow", x_narrow)):
        out = spatial_attention(x)
        jax.block_until_ready(out)
        ref = _reference(x)
        assert out.shape == x.shape, f"{name}: shape {out.shape} != {x.shape}"
        assert out.dtype == x.dtype, f"{name}: dtype {out.dtype} != {x.dtype}"
        err = float(
            jnp.max(jnp.abs(out.astype(jnp.float32) - ref.astype(jnp.float32)))
        )
        assert err < 1e-5, f"{name}: max abs err {err}"

    print("KERNEL_OK")
</pallas_src>

<mosaic_0001>
module attributes {stable_mosaic.version = 11 : i64} {
  func.func @_spatial_attention_kernel(%arg0: i32, %arg1: memref<2048x256xf32, #tpu.memory_space<vmem>>, %arg2: memref<2048x256xf32, #tpu.memory_space<vmem>>) attributes {dimension_semantics = [#tpu.dimension_semantics<parallel>], iteration_bounds = array<i64: 1>, scalar_prefetch = 0 : i64, scratch_operands = 0 : i64, tpu.core_type = #tpu.core_type<tc>, window_params = [{transform_indices = @transform_0, window_bounds = array<i64: 2048, 256>}, {transform_indices = @transform_1, window_bounds = array<i64: 2048, 256>}]} {
    %c0 = arith.constant 0 : index
    %c0_0 = arith.constant 0 : index
    %0 = vector.load %arg1[%c0, %c0_0] : memref<2048x256xf32, #tpu.memory_space<vmem>>, vector<2048x256xf32>
    %cst = arith.constant 5.000000e-01 : f32
    %1 = vector.broadcast %cst : f32 to vector<2048x256xf32>
    %2 = arith.mulf %1, %0 : vector<2048x256xf32>
    %3 = math.tanh %2 : vector<2048x256xf32>
    %cst_1 = arith.constant 0.000000e+00 : f32
    %4 = vector.broadcast %cst_1 : f32 to vector<2048x256xf32>
    %5 = arith.maximumf %3, %4 : vector<2048x256xf32>
    %cst_2 = arith.constant 1.000000e+00 : f32
    %6 = vector.broadcast %cst_2 : f32 to vector<2048x256xf32>
    %7 = arith.subf %6, %5 : vector<2048x256xf32>
    %c0_3 = arith.constant 0 : index
    %c0_4 = arith.constant 0 : index
    %8 = vector.load %arg2[%c0_3, %c0_4] : memref<2048x256xf32, #tpu.memory_space<vmem>>, vector<2048x256xf32>
    tpu.vector_store %arg2[%c0_3, %c0_4], %7 {strides = array<i32>} : memref<2048x256xf32, #tpu.memory_space<vmem>>, vector<2048x256xf32>,
    return
  }
  func.func @transform_0(%arg0: i32) -> (i32, i32) {
    %c0_i32 = arith.constant 0 : i32
    %c0_i32_0 = arith.constant 0 : i32
    return %arg0, %c0_i32 : i32, i32
  }
  func.func @transform_1(%arg0: i32) -> (i32, i32) {
    %c0_i32 = arith.constant 0 : i32
    %c0_i32_0 = arith.constant 0 : i32
    return %arg0, %c0_i32 : i32, i32
  }
}

</mosaic_0001>

<bundles_post_ra>
// kernel: tpu_custom_call.1
= control target key start
LH: loop header
LB: loop body
LE: loop exit
PB: predicated region body
PF: predicated region fallthrough
CT: control target
= control target key end

     0   :  { %6 = vsyncpa [#allocation3], 0  ;;  %s4222_s0 = inlined_call_operand.hbm [shape: f32[2048,256], index: 0, kind: input, shape index: {}]   ;;  %s4223_s1 = inlined_call_operand.hbm [shape: f32[2048,256], index: 1, kind: output, shape index: {}]  }
   0x1   :  { %7 = vsyncpa [#allocation4], 0  ;;  %s12_s8 = sshll.u32 %s4222_s0, 4  ;;  %s4196_s9 = smov [#allocation2]   ;;  %s13_s8 = int_to_ptr.hbm [resolvable:$true] %s12_s8 }
   0x2   :  { %s14_s10 = sshll.u32 %s4196_s9, 4  ;;  %s4197_s11 = smov 256   ;;  %s15_s10 = int_to_ptr.vmem [resolvable:$true] %s14_s10 }
   0x3   :  { %s4198_s12 = smov 16  }
   0x4   :  { %20 = dma.hbm_to_vmem [thread:$0]  %s13_s8, 65536, %s15_s10, [#allocation3], %s4197_s11, %s4197_s11, %s4198_s12  }
   0x5   :  { %4192 = dma.done.wait [#allocation3], 65536  }
   0x6   :  { %4193 = vsyncadd [#allocation3], 4294901760  ;;  %v25_v0 = vld [vmem:[#allocation2] sm:$0xff]  ;;  %v26_v1 = vld [vmem:[#allocation2 + $0x8] sm:$0xff]  ;;  %s4199_s0 = smov [#allocation5]   ;;  %s3103_s16 = sshll.u32 %s4223_s1, 4  ;;  %s3104_s16 = int_to_ptr.hbm [resolvable:$true] %s3103_s16 }
   0x7   :  { %v27_v2 = vld [vmem:[#allocation2 + $0x10] sm:$0xff]  ;;  %v537_v3 = vmul.f32 0.5, %v25_v0  ;;  %v538_v4 = vmul.f32 0.5, %v26_v1  ;;  %v28_v6 = vld [vmem:[#allocation2 + $0x18] sm:$0xff]  ;;  %v29_v7 = vld [vmem:[#allocation2 + $0x20] sm:$0xff]  ;;  %s3101_s13 = sshll.u32 %s4199_s0, 4  ;;  %s3102_s13 = int_to_ptr.vmem [resolvable:$true] %s3101_s13 }
   0x8   :  { %v539_v5 = vmul.f32 0.5, %v27_v2  ;;  %v30_v8 = vld [vmem:[#allocation2 + $0x28] sm:$0xff]  ;;  %v540_v9 = vmul.f32 0.5, %v28_v6  ;;  %v31_v10 = vld [vmem:[#allocation2 + $0x30] sm:$0xff]  ;;  %v541_v11 = vmul.f32 0.5, %v29_v7  ;;  %v32_v12 = vld [vmem:[#allocation2 + $0x38] sm:$0xff] }
   0x9   :  { %3120 = vtanh.f32 %v537_v3  ;;  %v542_v13 = vmul.f32 0.5, %v30_v8  ;;  %v33_v14 = vld [vmem:[#allocation2 + $0x40] sm:$0xff]  ;;  %v543_v15 = vmul.f32 0.5, %v31_v10  ;;  %v34_v16 = vld [vmem:[#allocation2 + $0x48] sm:$0xff]  ;;  %v544_v17 = vmul.f32 0.5, %v32_v12  ;;  %v35_v18 = vld [vmem:[#allocation2 + $0x50] sm:$0xff] }
   0xa   :  { %3122 = vtanh.f32 %v538_v4  ;;  %v545_v19 = vmul.f32 0.5, %v33_v14  ;;  %v36_v20 = vld [vmem:[#allocation2 + $0x58] sm:$0xff]  ;;  %v546_v21 = vmul.f32 0.5, %v34_v16  ;;  %v37_v22 = vld [vmem:[#allocation2 + $0x60] sm:$0xff]  ;;  %v547_v24 = vmul.f32 0.5, %v35_v18  ;;  %v38_v25 = vld [vmem:[#allocation2 + $0x68] sm:$0xff] }
   0xb   :  { %3124 = vtanh.f32 %v539_v5  ;;  %v548_v28 = vmul.f32 0.5, %v36_v20  ;;  %v39_v29 = vld [vmem:[#allocation2 + $0x70] sm:$0xff]  ;;  %v549_v32 = vmul.f32 0.5, %v37_v22  ;;  %v40_v33 = vld [vmem:[#allocation2 + $0x78] sm:$0xff]  ;;  %v550_v37 = vmul.f32 0.5, %v38_v25  ;;  %v41_v38 = vld [vmem:[#allocation2 + $0x80] sm:$0xff] }
   0xc   :  { %3126 = vtanh.f32 %v540_v9  ;;  %v551_v42 = vmul.f32 0.5, %v39_v29  ;;  %v42_v43 = vld [vmem:[#allocation2 + $0x88] sm:$0xff]  ;;  %v552_v47 = vmul.f32 0.5, %v40_v33  ;;  %v43_v48 = vld [vmem:[#allocation2 + $0x90] sm:$0xff]  ;;  %v553_v52 = vmul.f32 0.5, %v41_v38  ;;  %v44_v53 = vld [vmem:[#allocation2 + $0x98] sm:$0xff] }
   0xd   :  { %3128 = vtanh.f32 %v541_v11  ;;  %v554_v57 = vmul.f32 0.5, %v42_v43  ;;  %v45_v58 = vld [vmem:[#allocation2 + $0xa0] sm:$0xff]  ;;  %v555_v62 = vmul.f32 0.5, %v43_v48  ;;  %v46_v63 = vld [vmem:[#allocation2 + $0xa8] sm:$0xff]  ;;  %v556_v3 = vmul.f32 0.5, %v44_v53  ;;  %v47_v4 = vld [vmem:[#allocation2 + $0xb0] sm:$0xff] }
   0xe   :  { %3130 = vtanh.f32 %v542_v13  ;;  %v557_v8 = vmul.f32 0.5, %v45_v58  ;;  %v48_v9 = vld [vmem:[#allocation2 + $0xb8] sm:$0xff]  ;;  %v558_v13 = vmul.f32 0.5, %v46_v63  ;;  %v49_v14 = vld [vmem:[#allocation2 + $0xc0] sm:$0xff]  ;;  %v559_v18 = vmul.f32 0.5, %v47_v4 }
   0xf   :  { %v3121_v23 = vpop.eup %3120  ;;  %3132 = vtanh.f32 %v543_v15  ;;  %v52_v29 = vld [vmem:[#allocation2 + $0xd8] sm:$0xff] }
  0x10   :  { %v3123_v26 = vpop.eup %3122  ;;  %v1561_v27 = vmax.f32 %v3121_v23, 0.0  ;;  %3134 = vtanh.f32 %v544_v17  ;;  %v560_v23 = vmul.f32 0.5, %v48_v9  ;;  %v564_v43 = vmul.f32 0.5, %v52_v29 }
  0x11   :  { %v3125_v30 = vpop.eup %3124  ;;  %v1562_v31 = vmax.f32 %v3123_v26, 0.0  ;;  %3136 = vtanh.f32 %v545_v19  ;;  %v50_v19 = vld [vmem:[#allocation2 + $0xc8] sm:$0xff] }
  0x12   :  { %v3127_v34 = vpop.eup %3126  ;;  %v2073_v35 = vsub.f32 1.0, %v1561_v27  ;;  %v1563_v36 = vmax.f32 %v3125_v30, 0.0  ;;  %3138 = vtanh.f32 %v546_v21  ;;  %v562_v33 = vmul.f32 0.5, %v50_v19 }
  0x13   :  { %v3129_v39 = vpop.eup %3128  ;;  %v2074_v40 = vsub.f32 1.0, %v1562_v31  ;;  %v1564_v41 = vmax.f32 %v3127_v34, 0.0  ;;  %3140 = vtanh.f32 %v547_v24  ;;  %v51_v24 = vld [vmem:[#allocation2 + $0xd0] sm:$0xff]  ;;  %v53_v34 = vld [vmem:[#allocation2 + $0xe0] sm:$0xff] }
  0x14   :  { %v3131_v44 = vpop.eup %3130  ;;  %2585 = vst [vmem:[#allocation5] sm:$0xff] %v2073_v35  ;;  %v2075_v45 = vsub.f32 1.0, %v1563_v36  ;;  %v1565_v46 = vmax.f32 %v3129_v39, 0.0  ;;  %3142 = vtanh.f32 %v548_v28  ;;  %v561_v28 = vmul.f32 0.5, %v49_v14  ;;  %v54_v39 = vld [vmem:[#allocation2 + $0xe8] sm:$0xff] }
  0x15   :  { %v3133_v49 = vpop.eup %3132  ;;  %2586 = vst [vmem:[#allocation5 + $0x8] sm:$0xff] %v2074_v40  ;;  %v2076_v50 = vsub.f32 1.0, %v1564_v41  ;;  %v1566_v51 = vmax.f32 %v3131_v44, 0.0  ;;  %3144 = vtanh.f32 %v549_v32  ;;  %v563_v38 = vmul.f32 0.5, %v51_v24  ;;  %v55_v44 = vld [vmem:[#allocation2 + $0xf0] sm:$0xff] }
  0x16   :  { %v3135_v54 = vpop.eup %3134  ;;  %2587 = vst [vmem:[#allocation5 + $0x10] sm:$0xff] %v2075_v45  ;;  %v2077_v55 = vsub.f32 1.0, %v1565_v46  ;;  %v1567_v56 = vmax.f32 %v3133_v49, 0.0  ;;  %3146 = vtanh.f32 %v550_v37  ;;  %v565_v48 = vmul.f32 0.5, %v53_v34  ;;  %v56_v49 = vld [vmem:[#allocation2 + $0xf8] sm:$0xff] }
  0x17   :  { %v3137_v59 = vpop.eup %3136  ;;  %2588 = vst [vmem:[#allocation5 + $0x18] sm:$0xff] %v2076_v50  ;;  %v2078_v60 = vsub.f32 1.0, %v1566_v51  ;;  %v1568_v61 = vmax.f32 %v3135_v54, 0.0  ;;  %3148 = vtanh.f32 %v551_v42  ;;  %v566_v53 = vmul.f32 0.5, %v54_v39  ;;  %v57_v54 = vld [vmem:[#allocation2 + $0x100] sm:$0xff] }
  0x18   :  { %v3139_v0 = vpop.eup %3138  ;;  %2589 = vst [vmem:[#allocation5 + $0x20] sm:$0xff] %v2077_v55  ;;  %v2079_v1 = vsub.f32 1.0, %v1567_v56  ;;  %v1569_v2 = vmax.f32 %v3137_v59, 0.0  ;;  %3150 = vtanh.f32 %v552_v47  ;;  %v567_v58 = vmul.f32 0.5, %v55_v44  ;;  %v58_v59 = vld [vmem:[#allocation2 + $0x108] sm:$0xff] }
  0x19   :  { %v3141_v5 = vpop.eup %3140  ;;  %2590 = vst [vmem:[#allocation5 + $0x28] sm:$0xff] %v2078_v60  ;;  %v2080_v6 = vsub.f32 1.0, %v1568_v61  ;;  %v1570_v7 = vmax.f32 %v3139_v0, 0.0  ;;  %3152 = vtanh.f32 %v553_v52  ;;  %v568_v63 = vmul.f32 0.5, %v56_v49  ;;  %v59_v0 = vld [vmem:[#allocation2 + $0x110] sm:$0xff] }
  0x1a   :  { %v3143_v10 = vpop.eup %3142  ;;  %2591 = vst [vmem:[#allocation5 + $0x30] sm:$0xff] %v2079_v1  ;;  %v2081_v11 = vsub.f32 1.0, %v1569_v2  ;;  %v1571_v12 = vmax.f32 %v3141_v5, 0.0  ;;  %3154 = vtanh.f32 %v554_v57  ;;  %v569_v4 = vmul.f32 0.5, %v57_v54  ;;  %v60_v5 = vld [vmem:[#allocation2 + $0x118] sm:$0xff] }
  0x1b   :  { %v3145_v15 = vpop.eup %3144  ;;  %2592 = vst [vmem:[#allocation5 + $0x38] sm:$0xff] %v2080_v6  ;;  %v2082_v16 = vsub.f32 1.0, %v1570_v7  ;;  %v1572_v17 = vmax.f32 %v3143_v10, 0.0  ;;  %3156 = vtanh.f32 %v555_v62  ;;  %v570_v9 = vmul.f32 0.5, %v58_v59  ;;  %v61_v10 = vld [vmem:[#allocation2 + $0x120] sm:$0xff] }
  0x1c   :  { %v3147_v20 = vpop.eup %3146  ;;  %2593 = vst [vmem:[#allocation5 + $0x40] sm:$0xff] %v2081_v11  ;;  %v2083_v21 = vsub.f32 1.0, %v1571_v12  ;;  %v1573_v22 = vmax.f32 %v3145_v15, 0.0  ;;  %3158 = vtanh.f32 %v556_v3  ;;  %v571_v14 = vmul.f32 0.5, %v59_v0  ;;  %v62_v15 = vld [vmem:[#allocation2 + $0x128] sm:$0xff] }
  0x1d   :  { %v3149_v25 = vpop.eup %3148  ;;  %2594 = vst [vmem:[#allocation5 + $0x48] sm:$0xff] %v2082_v16  ;;  %v2084_v26 = vsub.f32 1.0, %v1572_v17  ;;  %v1574_v27 = vmax.f32 %v3147_v20, 0.0  ;;  %3160 = vtanh.f32 %v557_v8  ;;  %v572_v19 = vmul.f32 0.5, %v60_v5  ;;  %v63_v20 = vld [vmem:[#allocation2 + $0x130] sm:$0xff] }
  0x1e   :  { %v3151_v30 = vpop.eup %3150  ;;  %2595 = vst [vmem:[#allocation5 + $0x50] sm:$0xff] %v2083_v21  ;;  %v2085_v31 = vsub.f32 1.0, %v1573_v22  ;;  %v1575_v32 = vmax.f32 %v3149_v25, 0.0  ;;  %3162 = vtanh.f32 %v558_v13  ;;  %v573_v24 = vmul.f32 0.5, %v61_v10  ;;  %v64_v25 = vld [vmem:[#allocation2 + $0x138] sm:$0xff] }
  0x1f   :  { %v3153_v35 = vpop.eup %3152  ;;  %2596 = vst [vmem:[#allocation5 + $0x58] sm:$0xff] %v2084_v26  ;;  %v2086_v36 = vsub.f32 1.0, %v1574_v27  ;;  %v1576_v37 = vmax.f32 %v3151_v30, 0.0  ;;  %3164 = vtanh.f32 %v559_v18  ;;  %v574_v29 = vmul.f32 0.5, %v62_v15  ;;  %v65_v30 = vld [vmem:[#allocation2 + $0x140] sm:$0xff] }
  0x20   :  { %v3155_v40 = vpop.eup %3154  ;;  %2597 = vst [vmem:[#allocation5 + $0x60] sm:$0xff] %v2085_v31  ;;  %v2087_v41 = vsub.f32 1.0, %v1575_v32  ;;  %v1577_v42 = vmax.f32 %v3153_v35, 0.0  ;;  %3166 = vtanh.f32 %v560_v23  ;;  %v575_v34 = vmul.f32 0.5, %v63_v20  ;;  %v66_v35 = vld [vmem:[#allocation2 + $0x148] sm:$0xff] }
  0x21   :  { %v3157_v45 = vpop.eup %3156  ;;  %2598 = vst [vmem:[#allocation5 + $0x68] sm:$0xff] %v2086_v36  ;;  %v2088_v46 = vsub.f32 1.0, %v1576_v37  ;;  %v1578_v47 = vmax.f32 %v3155_v40, 0.0  ;;  %3168 = vtanh.f32 %v561_v28  ;;  %v576_v39 = vmul.f32 0.5, %v64_v25  ;;  %v67_v40 = vld [vmem:[#allocation2 + $0x150] sm:$0xff] }
  0x22   :  { %v3159_v50 = vpop.eup %3158  ;;  %2599 = vst [vmem:[#allocation5 + $0x70] sm:$0xff] %v2087_v41  ;;  %v2089_v51 = vsub.f32 1.0, %v1577_v42  ;;  %v1579_v52 = vmax.f32 %v3157_v45, 0.0  ;;  %3170 = vtanh.f32 %v562_v33  ;;  %v577_v44 = vmul.f32 0.5, %v65_v30  ;;  %v68_v45 = vld [vmem:[#allocation2 + $0x158] sm:$0xff] }
  0x23   :  { %v3161_v55 = vpop.eup %3160  ;;  %2600 = vst [vmem:[#allocation5 + $0x78] sm:$0xff] %v2088_v46  ;;  %v2090_v56 = vsub.f32 1.0, %v1578_v47  ;;  %v1580_v57 = vmax.f32 %v3159_v50, 0.0  ;;  %3172 = vtanh.f32 %v563_v38  ;;  %v578_v49 = vmul.f32 0.5, %v66_v35  ;;  %v69_v50 = vld [vmem:[#allocation2 + $0x160] sm:$0xff] }
  0x24   :  { %v3163_v60 = vpop.eup %3162  ;;  %2601 = vst [vmem:[#allocation5 + $0x80] sm:$0xff] %v2089_v51  ;;  %v2091_v61 = vsub.f32 1.0, %v1579_v52  ;;  %v1581_v62 = vmax.f32 %v3161_v55, 0.0  ;;  %3174 = vtanh.f32 %v564_v43  ;;  %v579_v54 = vmul.f32 0.5, %v67_v40  ;;  %v70_v55 = vld [vmem:[#allocation2 + $0x168] sm:$0xff] }
  0x25   :  { %v3165_v1 = vpop.eup %3164  ;;  %2602 = vst [vmem:[#allocation5 + $0x88] sm:$0xff] %v2090_v56  ;;  %v2092_v2 = vsub.f32 1.0, %v1580_v57  ;;  %v1582_v3 = vmax.f32 %v3163_v60, 0.0  ;;  %3176 = vtanh.f32 %v565_v48  ;;  %v580_v59 = vmul.f32 0.5, %v68_v45  ;;  %v71_v60 = vld [vmem:[#allocation2 + $0x170] sm:$0xff] }
  0x26   :  { %v3167_v6 = vpop.eup %3166  ;;  %2603 = vst [vmem:[#allocation5 + $0x90] sm:$0xff] %v2091_v61  ;;  %v2093_v7 = vsub.f32 1.0, %v1581_v62  ;;  %v1583_v8 = vmax.f32 %v3165_v1, 0.0  ;;  %3178 = vtanh.f32 %v566_v53  ;;  %v581_v0 = vmul.f32 0.5, %v69_v50  ;;  %v72_v1 = vld [vmem:[#allocation2 + $0x178] sm:$0xff] }
  0x27   :  { %v3169_v11 = vpop.eup %3168  ;;  %2604 = vst [vmem:[#allocation5 + $0x98] sm:$0xff] %v2092_v2  ;;  %v2094_v12 = vsub.f32 1.0, %v1582_v3  ;;  %v1584_v13 = vmax.f32 %v3167_v6, 0.0  ;;  %3180 = vtanh.f32 %v567_v58  ;;  %v582_v5 = vmul.f32 0.5, %v70_v55  ;;  %v73_v6 = vld [vmem:[#allocation2 + $0x180] sm:$0xff] }
  0x28   :  { %v3171_v16 = vpop.eup %3170  ;;  %2605 = vst [vmem:[#allocation5 + $0xa0] sm:$0xff] %v2093_v7  ;;  %v2095_v17 = vsub.f32 1.0, %v1583_v8  ;;  %v1585_v18 = vmax.f32 %v3169_v11, 0.0  ;;  %3182 = vtanh.f32 %v568_v63  ;;  %v583_v10 = vmul.f32 0.5, %v71_v60  ;;  %v74_v11 = vld [vmem:[#allocation2 + $0x188] sm:$0xff] }
  0x29   :  { %v3173_v21 = vpop.eup %3172  ;;  %2606 = vst [vmem:[#allocation5 + $0xa8] sm:$0xff] %v2094_v12  ;;  %v2096_v22 = vsub.f32 1.0, %v1584_v13  ;;  %v1586_v23 = vmax.f32 %v3171_v16, 0.0  ;;  %3184 = vtanh.f32 %v569_v4  ;;  %v584_v15 = vmul.f32 0.5, %v72_v1  ;;  %v75_v16 = vld [vmem:[#allocation2 + $0x190] sm:$0xff] }
  0x2a   :  { %v3175_v26 = vpop.eup %3174  ;;  %2607 = vst [vmem:[#allocation5 + $0xb0] sm:$0xff] %v2095_v17  ;;  %v2097_v27 = vsub.f32 1.0, %v1585_v18  ;;  %v1587_v28 = vmax.f32 %v3173_v21, 0.0  ;;  %3186 = vtanh.f32 %v570_v9  ;;  %v585_v20 = vmul.f32 0.5, %v73_v6  ;;  %v76_v21 = vld [vmem:[#allocation2 + $0x198] sm:$0xff] }
  0x2b   :  { %v3177_v31 = vpop.eup %3176  ;;  %2608 = vst [vmem:[#allocation5 + $0xb8] sm:$0xff] %v2096_v22  ;;  %v2098_v32 = vsub.f32 1.0, %v1586_v23  ;;  %v1588_v33 = vmax.f32 %v3175_v26, 0.0  ;;  %3188 = vtanh.f32 %v571_v14  ;;  %v586_v25 = vmul.f32 0.5, %v74_v11  ;;  %v77_v26 = vld [vmem:[#allocation2 + $0x1a0] sm:$0xff] }
  0x2c   :  { %v3179_v36 = vpop.eup %3178  ;;  %2609 = vst [vmem:[#allocation5 + $0xc0] sm:$0xff] %v2097_v27  ;;  %v2099_v37 = vsub.f32 1.0, %v1587_v28  ;;  %v1589_v38 = vmax.f32 %v3177_v31, 0.0  ;;  %3190 = vtanh.f32 %v572_v19  ;;  %v587_v30 = vmul.f32 0.5, %v75_v16  ;;  %v78_v31 = vld [vmem:[#allocation2 + $0x1a8] sm:$0xff] }
  0x2d   :  { %v3181_v41 = vpop.eup %3180  ;;  %2610 = vst [vmem:[#allocation5 + $0xc8] sm:$0xff] %v2098_v32  ;;  %v2100_v42 = vsub.f32 1.0, %v1588_v33  ;;  %v1590_v43 = vmax.f32 %v3179_v36, 0.0  ;;  %3192 = vtanh.f32 %v573_v24  ;;  %v588_v35 = vmul.f32 0.5, %v76_v21  ;;  %v79_v36 = vld [vmem:[#allocation2 + $0x1b0] sm:$0xff] }
  0x2e   :  { %v3183_v46 = vpop.eup %3182  ;;  %2611 = vst [vmem:[#allocation5 + $0xd0] sm:$0xff] %v2099_v37  ;;  %v2101_v47 = vsub.f32 1.0, %v1589_v38  ;;  %v1591_v48 = vmax.f32 %v3181_v41, 0.0  ;;  %3194 = vtanh.f32 %v574_v29  ;;  %v589_v40 = vmul.f32 0.5, %v77_v26  ;;  %v80_v41 = vld [vmem:[#allocation2 + $0x1b8] sm:$0xff] }
  0x2f   :  { %v3185_v51 = vpop.eup %3184  ;;  %2612 = vst [vmem:[#allocation5 + $0xd8] sm:$0xff] %v2100_v42  ;;  %v2102_v52 = vsub.f32 1.0, %v1590_v43  ;;  %v1592_v53 = vmax.f32 %v3183_v46, 0.0  ;;  %3196 = vtanh.f32 %v575_v34  ;;  %v590_v45 = vmul.f32 0.5, %v78_v31  ;;  %v81_v46 = vld [vmem:[#allocation2 + $0x1c0] sm:$0xff] }
  0x30   :  { %v3187_v56 = vpop.eup %3186  ;;  %2613 = vst [vmem:[#allocation5 + $0xe0] sm:$0xff] %v2101_v47  ;;  %v2103_v57 = vsub.f32 1.0, %v1591_v48  ;;  %v1593_v58 = vmax.f32 %v3185_v51, 0.0  ;;  %3198 = vtanh.f32 %v576_v39  ;;  %v591_v50 = vmul.f32 0.5, %v79_v36  ;;  %v82_v51 = vld [vmem:[#allocation2 + $0x1c8] sm:$0xff] }
  0x31   :  { %v3189_v61 = vpop.eup %3188  ;;  %2614 = vst [vmem:[#allocation5 + $0xe8] sm:$0xff] %v2102_v52  ;;  %v2104_v62 = vsub.f32 1.0, %v1592_v53  ;;  %v1594_v63 = vmax.f32 %v3187_v56, 0.0  ;;  %3200 = vtanh.f32 %v577_v44  ;;  %v592_v55 = vmul.f32 0.5, %v80_v41  ;;  %v83_v56 = vld [vmem:[#allocation2 + $0x1d0] sm:$0xff] }
  0x32   :  { %v3191_v2 = vpop.eup %3190  ;;  %2615 = vst [vmem:[#allocation5 + $0xf0] sm:$0xff] %v2103_v57  ;;  %v2105_v3 = vsub.f32 1.0, %v1593_v58  ;;  %v1595_v4 = vmax.f32 %v3189_v61, 0.0  ;;  %3202 = vtanh.f32 %v578_v49  ;;  %v593_v60 = vmul.f32 0.5, %v81_v46  ;;  %v84_v61 = vld [vmem:[#allocation2 + $0x1d8] sm:$0xff] }
  0x33   :  { %v3193_v7 = vpop.eup %3192  ;;  %2616 = vst [vmem:[#allocation5 + $0xf8] sm:$0xff] %v2104_v62  ;;  %v2106_v8 = vsub.f32 1.0, %v1594_v63  ;;  %v1596_v9 = vmax.f32 %v3191_v2, 0.0  ;;  %3204 = vtanh.f32 %v579_v54  ;;  %v594_v1 = vmul.f32 0.5, %v82_v51  ;;  %v85_v2 = vld [vmem:[#allocation2 + $0x1e0] sm:$0xff] }
  0x34   :  { %v3195_v12 = vpop.eup %3194  ;;  %2617 = vst [vmem:[#allocation5 + $0x100] sm:$0xff] %v2105_v3  ;;  %v2107_v13 = vsub.f32 1.0, %v1595_v4  ;;  %v1597_v14 = vmax.f32 %v3193_v7, 0.0  ;;  %3206 = vtanh.f32 %v580_v59  ;;  %v595_v6 = vmul.f32 0.5, %v83_v56  ;;  %v86_v7 = vld [vmem:[#allocation2 + $0x1e8] sm:$0xff] }
  0x35   :  { %v3197_v17 = vpop.eup %3196  ;;  %2618 = vst [vmem:[#allocation5 + $0x108] sm:$0xff] %v2106_v8  ;;  %v2108_v18 = vsub.f32 1.0, %v1596_v9  ;;  %v1598_v19 = vmax.f32 %v3195_v12, 0.0  ;;  %3208 = vtanh.f32 %v581_v0  ;;  %v596_v11 = vmul.f32 0.5, %v84_v61  ;;  %v87_v12 = vld [vmem:[#allocation2 + $0x1f0] sm:$0xff] }
  0x36   :  { %v3199_v22 = vpop.eup %3198  ;;  %2619 = vst [vmem:[#allocation5 + $0x110] sm:$0xff] %v2107_v13  ;;  %v2109_v23 = vsub.f32 1.0, %v1597_v14  ;;  %v1599_v24 = vmax.f32 %v3197_v17, 0.0  ;;  %3210 = vtanh.f32 %v582_v5  ;;  %v597_v16 = vmul.f32 0.5, %v85_v2  ;;  %v88_v17 = vld [vmem:[#allocation2 + $0x1f8] sm:$0xff] }
  0x37   :  { %v3201_v27 = vpop.eup %3200  ;;  %2620 = vst [vmem:[#allocation5 + $0x118] sm:$0xff] %v2108_v18  ;;  %v2110_v28 = vsub.f32 1.0, %v1598_v19  ;;  %v1600_v29 = vmax.f32 %v3199_v22, 0.0  ;;  %3212 = vtanh.f32 %v583_v10  ;;  %v598_v21 = vmul.f32 0.5, %v86_v7  ;;  %v89_v22 = vld [vmem:[#allocation2 + $0x200] sm:$0xff] }
  0x38   :  { %v3203_v32 = vpop.eup %3202  ;;  %2621 = vst [vmem:[#allocation5 + $0x120] sm:$0xff] %v2109_v23  ;;  %v2111_v33 = vsub.f32 1.0, %v1599_v24  ;;  %v1601_v34 = vmax.f32 %v3201_v27, 0.0  ;;  %3214 = vtanh.f32 %v584_v15  ;;  %v599_v26 = vmul.f32 0.5, %v87_v12  ;;  %v90_v27 = vld [vmem:[#allocation2 + $0x208] sm:$0xff] }
  0x39   :  { %v3205_v37 = vpop.eup %3204  ;;  %2622 = vst [vmem:[#allocation5 + $0x128] sm:$0xff] %v2110_v28  ;;  %v2112_v38 = vsub.f32 1.0, %v1600_v29  ;;  %v1602_v39 = vmax.f32 %v3203_v32, 0.0  ;;  %3216 = vtanh.f32 %v585_v20  ;;  %v600_v31 = vmul.f32 0.5, %v88_v17  ;;  %v91_v32 = vld [vmem:[#allocation2 + $0x210] sm:$0xff] }
  0x3a   :  { %v3207_v42 = vpop.eup %3206  ;;  %2623 = vst [vmem:[#allocation5 + $0x130] sm:$0xff] %v2111_v33  ;;  %v2113_v43 = vsub.f32 1.0, %v1601_v34  ;;  %v1603_v44 = vmax.f32 %v3205_v37, 0.0  ;;  %3218 = vtanh.f32 %v586_v25  ;;  %v601_v36 = vmul.f32 0.5, %v89_v22  ;;  %v92_v37 = vld [vmem:[#allocation2 + $0x218] sm:$0xff] }
  0x3b   :  { %v3209_v47 = vpop.eup %3208  ;;  %2624 = vst [vmem:[#allocation5 + $0x138] sm:$0xff] %v2112_v38  ;;  %v2114_v48 = vsub.f32 1.0, %v1602_v39  ;;  %v1604_v49 = vmax.f32 %v3207_v42, 0.0  ;;  %3220 = vtanh.f32 %v587_v30  ;;  %v602_v41 = vmul.f32 0.5, %v90_v27  ;;  %v93_v42 = vld [vmem:[#allocation2 + $0x220] sm:$0xff] }
  0x3c   :  { %v3211_v52 = vpop.eup %3210  ;;  %2625 = vst [vmem:[#allocation5 + $0x140] sm:$0xff] %v2113_v43  ;;  %v2115_v53 = vsub.f32 1.0, %v1603_v44  ;;  %v1605_v54 = vmax.f32 %v3209_v47, 0.0  ;;  %3222 = vtanh.f32 %v588_v35  ;;  %v603_v46 = vmul.f32 0.5, %v91_v32  ;;  %v94_v47 = vld [vmem:[#allocation2 + $0x228] sm:$0xff] }
  0x3d   :  { %v3213_v57 = vpop.eup %3212  ;;  %2626 = vst [vmem:[#allocation5 + $0x148] sm:$0xff] %v2114_v48  ;;  %v2116_v58 = vsub.f32 1.0, %v1604_v49  ;;  %v1606_v59 = vmax.f32 %v3211_v52, 0.0  ;;  %3224 = vtanh.f32 %v589_v40  ;;  %v604_v51 = vmul.f32 0.5, %v92_v37  ;;  %v95_v52 = vld [vmem:[#allocation2 + $0x230] sm:$0xff] }
  0x3e   :  { %v3215_v62 = vpop.eup %3214  ;;  %2627 = vst [vmem:[#allocation5 + $0x150] sm:$0xff] %v2115_v53  ;;  %v2117_v63 = vsub.f32 1.0, %v1605_v54  ;;  %v1607_v0 = vmax.f32 %v3213_v57, 0.0  ;;  %3226 = vtanh.f32 %v590_v45  ;;  %v605_v56 = vmul.f32 0.5, %v93_v42  ;;  %v96_v57 = vld [vmem:[#allocation2 + $0x238] sm:$0xff] }
  0x3f   :  { %v3217_v3 = vpop.eup %3216  ;;  %2628 = vst [vmem:[#allocation5 + $0x158] sm:$0xff] %v2116_v58  ;;  %v2118_v4 = vsub.f32 1.0, %v1606_v59  ;;  %v1608_v5 = vmax.f32 %v3215_v62, 0.0  ;;  %3228 = vtanh.f32 %v591_v50  ;;  %v606_v61 = vmul.f32 0.5, %v94_v47  ;;  %v97_v62 = vld [vmem:[#allocation2 + $0x240] sm:$0xff] }
  0x40   :  { %v3219_v8 = vpop.eup %3218  ;;  %2629 = vst [vmem:[#allocation5 + $0x160] sm:$0xff] %v2117_v63  ;;  %v2119_v9 = vsub.f32 1.0, %v1607_v0  ;;  %v1609_v10 = vmax.f32 %v3217_v3, 0.0  ;;  %3230 = vtanh.f32 %v592_v55  ;;  %v607_v2 = vmul.f32 0.5, %v95_v52  ;;  %v98_v3 = vld [vmem:[#allocation2 + $0x248] sm:$0xff] }
  0x41   :  { %v3221_v13 = vpop.eup %3220  ;;  %2630 = vst [vmem:[#allocation5 + $0x168] sm:$0xff] %v2118_v4  ;;  %v2120_v14 = vsub.f32 1.0, %v1608_v5  ;;  %v1610_v15 = vmax.f32 %v3219_v8, 0.0  ;;  %3232 = vtanh.f32 %v593_v60  ;;  %v608_v7 = vmul.f32 0.5, %v96_v57  ;;  %v99_v8 = vld [vmem:[#allocation2 + $0x250] sm:$0xff] }
  0x42   :  { %v3223_v18 = vpop.eup %3222  ;;  %2631 = vst [vmem:[#allocation5 + $0x170] sm:$0xff] %v2119_v9  ;;  %v2121_v19 = vsub.f32 1.0, %v1609_v10  ;;  %v1611_v20 = vmax.f32 %v3221_v13, 0.0  ;;  %3234 = vtanh.f32 %v594_v1  ;;  %v609_v12 = vmul.f32 0.5, %v97_v62  ;;  %v100_v13 = vld [vmem:[#allocation2 + $0x258] sm:$0xff] }
  0x43   :  { %v3225_v23 = vpop.eup %3224  ;;  %2632 = vst [vmem:[#allocation5 + $0x178] sm:$0xff] %v2120_v14  ;;  %v2122_v24 = vsub.f32 1.0, %v1610_v15  ;;  %v1612_v25 = vmax.f32 %v3223_v18, 0.0  ;;  %3236 = vtanh.f32 %v595_v6  ;;  %v610_v17 = vmul.f32 0.5, %v98_v3  ;;  %v101_v18 = vld [vmem:[#allocation2 + $0x260] sm:$0xff] }
  0x44   :  { %v3227_v28 = vpop.eup %3226  ;;  %2633 = vst [vmem:[#allocation5 + $0x180] sm:$0xff] %v2121_v19  ;;  %v2123_v29 = vsub.f32 1.0, %v1611_v20  ;;  %v1613_v30 = vmax.f32 %v3225_v23, 0.0  ;;  %3238 = vtanh.f32 %v596_v11  ;;  %v611_v22 = vmul.f32 0.5, %v99_v8  ;;  %v102_v23 = vld [vmem:[#allocation2 + $0x268] sm:$0xff] }
  0x45   :  { %v3229_v33 = vpop.eup %3228  ;;  %2634 = vst [vmem:[#allocation5 + $0x188] sm:$0xff] %v2122_v24  ;;  %v2124_v34 = vsub.f32 1.0, %v1612_v25  ;;  %v1614_v35 = vmax.f32 %v3227_v28, 0.0  ;;  %3240 = vtanh.f32 %v597_v16  ;;  %v612_v27 = vmul.f32 0.5, %v100_v13  ;;  %v103_v28 = vld [vmem:[#allocation2 + $0x270] sm:$0xff] }
  0x46   :  { %v3231_v38 = vpop.eup %3230  ;;  %2635 = vst [vmem:[#allocation5 + $0x190] sm:$0xff] %v2123_v29  ;;  %v2125_v39 = vsub.f32 1.0, %v1613_v30  ;;  %v1615_v40 = vmax.f32 %v3229_v33, 0.0  ;;  %3242 = vtanh.f32 %v598_v21  ;;  %v613_v32 = vmul.f32 0.5, %v101_v18  ;;  %v104_v33 = vld [vmem:[#allocation2 + $0x278] sm:$0xff] }
  0x47   :  { %v3233_v43 = vpop.eup %3232  ;;  %2636 = vst [vmem:[#allocation5 + $0x198] sm:$0xff] %v2124_v34  ;;  %v2126_v44 = vsub.f32 1.0, %v1614_v35  ;;  %v1616_v45 = vmax.f32 %v3231_v38, 0.0  ;;  %3244 = vtanh.f32 %v599_v26  ;;  %v614_v37 = vmul.f32 0.5, %v102_v23  ;;  %v105_v38 = vld [vmem:[#allocation2 + $0x280] sm:$0xff] }
  0x48   :  { %v3235_v48 = vpop.eup %3234  ;;  %2637 = vst [vmem:[#allocation5 + $0x1a0] sm:$0xff] %v2125_v39  ;;  %v2127_v49 = vsub.f32 1.0, %v1615_v40  ;;  %v1617_v50 = vmax.f32 %v3233_v43, 0.0  ;;  %3246 = vtanh.f32 %v600_v31  ;;  %v615_v42 = vmul.f32 0.5, %v103_v28  ;;  %v106_v43 = vld [vmem:[#allocation2 + $0x288] sm:$0xff] }
  0x49   :  { %v3237_v53 = vpop.eup %3236  ;;  %2638 = vst [vmem:[#allocation5 + $0x1a8] sm:$0xff] %v2126_v44  ;;  %v2128_v54 = vsub.f32 1.0, %v1616_v45  ;;  %v1618_v55 = vmax.f32 %v3235_v48, 0.0  ;;  %3248 = vtanh.f32 %v601_v36  ;;  %v616_v47 = vmul.f32 0.5, %v104_v33  ;;  %v107_v48 = vld [vmem:[#allocation2 + $0x290] sm:$0xff] }
  0x4a   :  { %v3239_v58 = vpop.eup %3238  ;;  %2639 = vst [vmem:[#allocation5 + $0x1b0] sm:$0xff] %v2127_v49  ;;  %v2129_v59 = vsub.f32 1.0, %v1617_v50  ;;  %v1619_v60 = vmax.f32 %v3237_v53, 0.0  ;;  %3250 = vtanh.f32 %v602_v41  ;;  %v617_v52 = vmul.f32 0.5, %v105_v38  ;;  %v108_v53 = vld [vmem:[#allocation2 + $0x298] sm:$0xff] }
  0x4b   :  { %v3241_v63 = vpop.eup %3240  ;;  %2640 = vst [vmem:[#allocation5 + $0x1b8] sm:$0xff] %v2128_v54  ;;  %v2130_v0 = vsub.f32 1.0, %v1618_v55  ;;  %v1620_v1 = vmax.f32 %v3239_v58, 0.0  ;;  %3252 = vtanh.f32 %v603_v46  ;;  %v618_v57 = vmul.f32 0.5, %v106_v43  ;;  %v109_v58 = vld [vmem:[#allocation2 + $0x2a0] sm:$0xff] }
  0x4c   :  { %v3243_v4 = vpop.eup %3242  ;;  %2641 = vst [vmem:[#allocation5 + $0x1c0] sm:$0xff] %v2129_v59  ;;  %v2131_v5 = vsub.f32 1.0, %v1619_v60  ;;  %v1621_v6 = vmax.f32 %v3241_v63, 0.0  ;;  %3254 = vtanh.f32 %v604_v51  ;;  %v619_v62 = vmul.f32 0.5, %v107_v48  ;;  %v110_v63 = vld [vmem:[#allocation2 + $0x2a8] sm:$0xff] }
  0x4d   :  { %v3245_v9 = vpop.eup %3244  ;;  %2642 = vst [vmem:[#allocation5 + $0x1c8] sm:$0xff] %v2130_v0  ;;  %v2132_v10 = vsub.f32 1.0, %v1620_v1  ;;  %v1622_v11 = vmax.f32 %v3243_v4, 0.0  ;;  %3256 = vtanh.f32 %v605_v56  ;;  %v620_v3 = vmul.f32 0.5, %v108_v53  ;;  %v111_v4 = vld [vmem:[#allocation2 + $0x2b0] sm:$0xff] }
  0x4e   :  { %v3247_v14 = vpop.eup %3246  ;;  %2643 = vst [vmem:[#allocation5 + $0x1d0] sm:$0xff] %v2131_v5  ;;  %v2133_v15 = vsub.f32 1.0, %v1621_v6  ;;  %v1623_v16 = vmax.f32 %v3245_v9, 0.0  ;;  %3258 = vtanh.f32 %v606_v61  ;;  %v621_v8 = vmul.f32 0.5, %v109_v58  ;;  %v112_v9 = vld [vmem:[#allocation2 + $0x2b8] sm:$0xff] }
  0x4f   :  { %v3249_v19 = vpop.eup %3248  ;;  %2644 = vst [vmem:[#allocation5 + $0x1d8] sm:$0xff] %v2132_v10  ;;  %v2134_v20 = vsub.f32 1.0, %v1622_v11  ;;  %v1624_v21 = vmax.f32 %v3247_v14, 0.0  ;;  %3260 = vtanh.f32 %v607_v2  ;;  %v622_v13 = vmul.f32 0.5, %v110_v63  ;;  %v113_v14 = vld [vmem:[#allocation2 + $0x2c0] sm:$0xff] }
  0x50   :  { %v3251_v24 = vpop.eup %3250  ;;  %2645 = vst [vmem:[#allocation5 + $0x1e0] sm:$0xff] %v2133_v15  ;;  %v2135_v25 = vsub.f32 1.0, %v1623_v16  ;;  %v1625_v26 = vmax.f32 %v3249_v19, 0.0  ;;  %3262 = vtanh.f32 %v608_v7  ;;  %v623_v18 = vmul.f32 0.5, %v111_v4  ;;  %v114_v19 = vld [vmem:[#allocation2 + $0x2c8] sm:$0xff] }
  0x51   :  { %v3253_v29 = vpop.eup %3252  ;;  %2646 = vst [vmem:[#allocation5 + $0x1e8] sm:$0xff] %v2134_v20  ;;  %v2136_v30 = vsub.f32 1.0, %v1624_v21  ;;  %v1626_v31 = vmax.f32 %v3251_v24, 0.0  ;;  %3264 = vtanh.f32 %v609_v12  ;;  %v624_v23 = vmul.f32 0.5, %v112_v9  ;;  %v115_v24 = vld [vmem:[#allocation2 + $0x2d0] sm:$0xff] }
  0x52   :  { %v3255_v34 = vpop.eup %3254  ;;  %2647 = vst [vmem:[#allocation5 + $0x1f0] sm:$0xff] %v2135_v25  ;;  %v2137_v35 = vsub.f32 1.0, %v1625_v26  ;;  %v1627_v36 = vmax.f32 %v3253_v29, 0.0  ;;  %3266 = vtanh.f32 %v610_v17  ;;  %v625_v28 = vmul.f32 0.5, %v113_v14  ;;  %v116_v29 = vld [vmem:[#allocation2 + $0x2d8] sm:$0xff] }
  0x53   :  { %v3257_v39 = vpop.eup %3256  ;;  %2648 = vst [vmem:[#allocation5 + $0x1f8] sm:$0xff] %v2136_v30  ;;  %v2138_v40 = vsub.f32 1.0, %v1626_v31  ;;  %v1628_v41 = vmax.f32 %v3255_v34, 0.0  ;;  %3268 = vtanh.f32 %v611_v22  ;;  %v626_v33 = vmul.f32 0.5, %v114_v19  ;;  %v117_v34 = vld [vmem:[#allocation2 + $0x2e0] sm:$0xff] }
  0x54   :  { %v3259_v44 = vpop.eup %3258  ;;  %2649 = vst [vmem:[#allocation5 + $0x200] sm:$0xff] %v2137_v35  ;;  %v2139_v45 = vsub.f32 1.0, %v1627_v36  ;;  %v1629_v46 = vmax.f32 %v3257_v39, 0.0  ;;  %3270 = vtanh.f32 %v612_v27  ;;  %v627_v38 = vmul.f32 0.5, %v115_v24  ;;  %v118_v39 = vld [vmem:[#allocation2 + $0x2e8] sm:$0xff] }
  0x55   :  { %v3261_v49 = vpop.eup %3260  ;;  %2650 = vst [vmem:[#allocation5 + $0x208] sm:$0xff] %v2138_v40  ;;  %v2140_v50 = vsub.f32 1.0, %v1628_v41  ;;  %v1630_v51 = vmax.f32 %v3259_v44, 0.0  ;;  %3272 = vtanh.f32 %v613_v32  ;;  %v628_v43 = vmul.f32 0.5, %v116_v29  ;;  %v119_v44 = vld [vmem:[#allocation2 + $0x2f0] sm:$0xff] }
  0x56   :  { %v3263_v54 = vpop.eup %3262  ;;  %2651 = vst [vmem:[#allocation5 + $0x210] sm:$0xff] %v2139_v45  ;;  %v2141_v55 = vsub.f32 1.0, %v1629_v46  ;;  %v1631_v56 = vmax.f32 %v3261_v49, 0.0  ;;  %3274 = vtanh.f32 %v614_v37  ;;  %v629_v48 = vmul.f32 0.5, %v117_v34  ;;  %v120_v49 = vld [vmem:[#allocation2 + $0x2f8] sm:$0xff] }
  0x57   :  { %v3265_v59 = vpop.eup %3264  ;;  %2652 = vst [vmem:[#allocation5 + $0x218] sm:$0xff] %v2140_v50  ;;  %v2142_v60 = vsub.f32 1.0, %v1630_v51  ;;  %v1632_v61 = vmax.f32 %v3263_v54, 0.0  ;;  %3276 = vtanh.f32 %v615_v42  ;;  %v630_v53 = vmul.f32 0.5, %v118_v39  ;;  %v121_v54 = vld [vmem:[#allocation2 + $0x300] sm:$0xff] }
  0x58   :  { %v3267_v0 = vpop.eup %3266  ;;  %2653 = vst [vmem:[#allocation5 + $0x220] sm:$0xff] %v2141_v55  ;;  %v2143_v1 = vsub.f32 1.0, %v1631_v56  ;;  %v1633_v2 = vmax.f32 %v3265_v59, 0.0  ;;  %3278 = vtanh.f32 %v616_v47  ;;  %v631_v58 = vmul.f32 0.5, %v119_v44  ;;  %v122_v59 = vld [vmem:[#allocation2 + $0x308] sm:$0xff] }
  0x59   :  { %v3269_v5 = vpop.eup %3268  ;;  %2654 = vst [vmem:[#allocation5 + $0x228] sm:$0xff] %v2142_v60  ;;  %v2144_v6 = vsub.f32 1.0, %v1632_v61  ;;  %v1634_v7 = vmax.f32 %v3267_v0, 0.0  ;;  %3280 = vtanh.f32 %v617_v52  ;;  %v632_v63 = vmul.f32 0.5, %v120_v49  ;;  %v123_v0 = vld [vmem:[#allocation2 + $0x310] sm:$0xff] }
  0x5a   :  { %v3271_v10 = vpop.eup %3270  ;;  %2655 = vst [vmem:[#allocation5 + $0x230] sm:$0xff] %v2143_v1  ;;  %v2145_v11 = vsub.f32 1.0, %v1633_v2  ;;  %v1635_v12 = vmax.f32 %v3269_v5, 0.0  ;;  %3282 = vtanh.f32 %v618_v57  ;;  %v633_v4 = vmul.f32 0.5, %v121_v54  ;;  %v124_v5 = vld [vmem:[#allocation2 + $0x318] sm:$0xff] }
  0x5b   :  { %v3273_v15 = vpop.eup %3272  ;;  %2656 = vst [vmem:[#allocation5 + $0x238] sm:$0xff] %v2144_v6  ;;  %v2146_v16 = vsub.f32 1.0, %v1634_v7  ;;  %v1636_v17 = vmax.f32 %v3271_v10, 0.0  ;;  %3284 = vtanh.f32 %v619_v62  ;;  %v634_v9 = vmul.f32 0.5, %v122_v59  ;;  %v125_v10 = vld [vmem:[#allocation2 + $0x320] sm:$0xff] }
  0x5c   :  { %v3275_v20 = vpop.eup %3274  ;;  %2657 = vst [vmem:[#allocation5 + $0x240] sm:$0xff] %v2145_v11  ;;  %v2147_v21 = vsub.f32 1.0, %v1635_v12  ;;  %v1637_v22 = vmax.f32 %v3273_v15, 0.0  ;;  %3286 = vtanh.f32 %v620_v3  ;;  %v635_v14 = vmul.f32 0.5, %v123_v0  ;;  %v126_v15 = vld [vmem:[#allocation2 + $0x328] sm:$0xff] }
  0x5d   :  { %v3277_v25 = vpop.eup %3276  ;;  %2658 = vst [vmem:[#allocation5 + $0x248] sm:$0xff] %v2146_v16  ;;  %v2148_v26 = vsub.f32 1.0, %v1636_v17  ;;  %v1638_v27 = vmax.f32 %v3275_v20, 0.0  ;;  %3288 = vtanh.f32 %v621_v8  ;;  %v636_v19 = vmul.f32 0.5, %v124_v5  ;;  %v127_v20 = vld [vmem:[#allocation2 + $0x330] sm:$0xff] }
  0x5e   :  { %v3279_v30 = vpop.eup %3278  ;;  %2659 = vst [vmem:[#allocation5 + $0x250] sm:$0xff] %v2147_v21  ;;  %v2149_v31 = vsub.f32 1.0, %v1637_v22  ;;  %v1639_v32 = vmax.f32 %v3277_v25, 0.0  ;;  %3290 = vtanh.f32 %v622_v13  ;;  %v637_v24 = vmul.f32 0.5, %v125_v10  ;;  %v128_v25 = vld [vmem:[#allocation2 + $0x338] sm:$0xff] }
  0x5f   :  { %v3281_v35 = vpop.eup %3280  ;;  %2660 = vst [vmem:[#allocation5 + $0x258] sm:$0xff] %v2148_v26  ;;  %v2150_v36 = vsub.f32 1.0, %v1638_v27  ;;  %v1640_v37 = vmax.f32 %v3279_v30, 0.0  ;;  %3292 = vtanh.f32 %v623_v18  ;;  %v638_v29 = vmul.f32 0.5, %v126_v15  ;;  %v129_v30 = vld [vmem:[#allocation2 + $0x340] sm:$0xff] }
  0x60   :  { %v3283_v40 = vpop.eup %3282  ;;  %2661 = vst [vmem:[#allocation5 + $0x260] sm:$0xff] %v2149_v31  ;;  %v2151_v41 = vsub.f32 1.0, %v1639_v32  ;;  %v1641_v42 = vmax.f32 %v3281_v35, 0.0  ;;  %3294 = vtanh.f32 %v624_v23  ;;  %v639_v34 = vmul.f32 0.5, %v127_v20  ;;  %v130_v35 = vld [vmem:[#allocation2 + $0x348] sm:$0xff] }
  0x61   :  { %v3285_v45 = vpop.eup %3284  ;;  %2662 = vst [vmem:[#allocation5 + $0x268] sm:$0xff] %v2150_v36  ;;  %v2152_v46 = vsub.f32 1.0, %v1640_v37  ;;  %v1642_v47 = vmax.f32 %v3283_v40, 0.0  ;;  %3296 = vtanh.f32 %v625_v28  ;;  %v640_v39 = vmul.f32 0.5, %v128_v25  ;;  %v131_v40 = vld [vmem:[#allocation2 + $0x350] sm:$0xff] }
  0x62   :  { %v3287_v50 = vpop.eup %3286  ;;  %2663 = vst [vmem:[#allocation5 + $0x270] sm:$0xff] %v2151_v41  ;;  %v2153_v51 = vsub.f32 1.0, %v1641_v42  ;;  %v1643_v52 = vmax.f32 %v3285_v45, 0.0  ;;  %3298 = vtanh.f32 %v626_v33  ;;  %v641_v44 = vmul.f32 0.5, %v129_v30  ;;  %v132_v45 = vld [vmem:[#allocation2 + $0x358] sm:$0xff] }
  0x63   :  { %v3289_v55 = vpop.eup %3288  ;;  %2664 = vst [vmem:[#allocation5 + $0x278] sm:$0xff] %v2152_v46  ;;  %v2154_v56 = vsub.f32 1.0, %v1642_v47  ;;  %v1644_v57 = vmax.f32 %v3287_v50, 0.0  ;;  %3300 = vtanh.f32 %v627_v38  ;;  %v642_v49 = vmul.f32 0.5, %v130_v35  ;;  %v133_v50 = vld [vmem:[#allocation2 + $0x360] sm:$0xff] }
  0x64   :  { %v3291_v60 = vpop.eup %3290  ;;  %2665 = vst [vmem:[#allocation5 + $0x280] sm:$0xff] %v2153_v51  ;;  %v2155_v61 = vsub.f32 1.0, %v1643_v52  ;;  %v1645_v62 = vmax.f32 %v3289_v55, 0.0  ;;  %3302 = vtanh.f32 %v628_v43  ;;  %v643_v54 = vmul.f32 0.5, %v131_v40  ;;  %v134_v55 = vld [vmem:[#allocation2 + $0x368] sm:$0xff] }
  0x65   :  { %v3293_v1 = vpop.eup %3292  ;;  %2666 = vst [vmem:[#allocation5 + $0x288] sm:$0xff] %v2154_v56  ;;  %v2156_v2 = vsub.f32 1.0, %v1644_v57  ;;  %v1646_v3 = vmax.f32 %v3291_v60, 0.0  ;;  %3304 = vtanh.f32 %v629_v48  ;;  %v644_v59 = vmul.f32 0.5, %v132_v45  ;;  %v135_v60 = vld [vmem:[#allocation2 + $0x370] sm:$0xff] }
  0x66   :  { %v3295_v6 = vpop.eup %3294  ;;  %2667 = vst [vmem:[#allocation5 + $0x290] sm:$0xff] %v2155_v61  ;;  %v2157_v7 = vsub.f32 1.0, %v1645_v62  ;;  %v1647_v8 = vmax.f32 %v3293_v1, 0.0  ;;  %3306 = vtanh.f32 %v630_v53  ;;  %v645_v0 = vmul.f32 0.5, %v133_v50  ;;  %v136_v1 = vld [vmem:[#allocation2 + $0x378] sm:$0xff] }
  0x67   :  { %v3297_v11 = vpop.eup %3296  ;;  %2668 = vst [vmem:[#allocation5 + $0x298] sm:$0xff] %v2156_v2  ;;  %v2158_v12 = vsub.f32 1.0, %v1646_v3  ;;  %v1648_v13 = vmax.f32 %v3295_v6, 0.0  ;;  %3308 = vtanh.f32 %v631_v58  ;;  %v646_v5 = vmul.f32 0.5, %v134_v55  ;;  %v137_v6 = vld [vmem:[#allocation2 + $0x380] sm:$0xff] }
  0x68   :  { %v3299_v16 = vpop.eup %3298  ;;  %2669 = vst [vmem:[#allocation5 + $0x2a0] sm:$0xff] %v2157_v7  ;;  %v2159_v17 = vsub.f32 1.0, %v1647_v8  ;;  %v1649_v18 = vmax.f32 %v3297_v11, 0.0  ;;  %3310 = vtanh.f32 %v632_v63  ;;  %v647_v10 = vmul.f32 0.5, %v135_v60  ;;  %v138_v11 = vld [vmem:[#allocation2 + $0x388] sm:$0xff] }
  0x69   :  { %v3301_v21 = vpop.eup %3300  ;;  %2670 = vst [vmem:[#allocation5 + $0x2a8] sm:$0xff] %v2158_v12  ;;  %v2160_v22 = vsub.f32 1.0, %v1648_v13  ;;  %v1650_v23 = vmax.f32 %v3299_v16, 0.0  ;;  %3312 = vtanh.f32 %v633_v4  ;;  %v648_v15 = vmul.f32 0.5, %v136_v1  ;;  %v139_v16 = vld [vmem:[#allocation2 + $0x390] sm:$0xff] }
  0x6a   :  { %v3303_v26 = vpop.eup %3302  ;;  %2671 = vst [vmem:[#allocation5 + $0x2b0] sm:$0xff] %v2159_v17  ;;  %v2161_v27 = vsub.f32 1.0, %v1649_v18  ;;  %v1651_v28 = vmax.f32 %v3301_v21, 0.0  ;;  %3314 = vtanh.f32 %v634_v9  ;;  %v649_v20 = vmul.f32 0.5, %v137_v6  ;;  %v140_v21 = vld [vmem:[#allocation2 + $0x398] sm:$0xff] }
  0x6b   :  { %v3305_v31 = vpop.eup %3304  ;;  %2672 = vst [vmem:[#allocation5 + $0x2b8] sm:$0xff] %v2160_v22  ;;  %v2162_v32 = vsub.f32 1.0, %v1650_v23  ;;  %v1652_v33 = vmax.f32 %v3303_v26, 0.0  ;;  %3316 = vtanh.f32 %v635_v14  ;;  %v650_v25 = vmul.f32 0.5, %v138_v11  ;;  %v141_v26 = vld [vmem:[#allocation2 + $0x3a0] sm:$0xff] }
  0x6c   :  { %v3307_v36 = vpop.eup %3306  ;;  %2673 = vst [vmem:[#allocation5 + $0x2c0] sm:$0xff] %v2161_v27  ;;  %v2163_v37 = vsub.f32 1.0, %v1651_v28  ;;  %v1653_v38 = vmax.f32 %v3305_v31, 0.0  ;;  %3318 = vtanh.f32 %v636_v19  ;;  %v651_v30 = vmul.f32 0.5, %v139_v16  ;;  %v142_v31 = vld [vmem:[#allocation2 + $0x3a8] sm:$0xff] }
  0x6d   :  { %v3309_v41 = vpop.eup %3308  ;;  %2674 = vst [vmem:[#allocation5 + $0x2c8] sm:$0xff] %v2162_v32  ;;  %v2164_v42 = vsub.f32 1.0, %v1652_v33  ;;  %v1654_v43 = vmax.f32 %v3307_v36, 0.0  ;;  %3320 = vtanh.f32 %v637_v24  ;;  %v652_v35 = vmul.f32 0.5, %v140_v21  ;;  %v143_v36 = vld [vmem:[#allocation2 + $0x3b0] sm:$0xff] }
  0x6e   :  { %v3311_v46 = vpop.eup %3310  ;;  %2675 = vst [vmem:[#allocation5 + $0x2d0] sm:$0xff] %v2163_v37  ;;  %v2165_v47 = vsub.f32 1.0, %v1653_v38  ;;  %v1655_v48 = vmax.f32 %v3309_v41, 0.0  ;;  %3322 = vtanh.f32 %v638_v29  ;;  %v653_v40 = vmul.f32 0.5, %v141_v26  ;;  %v144_v41 = vld [vmem:[#allocation2 + $0x3b8] sm:$0xff] }
  0x6f   :  { %v3313_v51 = vpop.eup %3312  ;;  %2676 = vst [vmem:[#allocation5 + $0x2d8] sm:$0xff] %v2164_v42  ;;  %v2166_v52 = vsub.f32 1.0, %v1654_v43  ;;  %v1656_v53 = vmax.f32 %v3311_v46, 0.0  ;;  %3324 = vtanh.f32 %v639_v34  ;;  %v654_v45 = vmul.f32 0.5, %v142_v31  ;;  %v145_v46 = vld [vmem:[#allocation2 + $0x3c0] sm:$0xff] }
  0x70   :  { %v3315_v56 = vpop.eup %3314  ;;  %2677 = vst [vmem:[#allocation5 + $0x2e0] sm:$0xff] %v2165_v47  ;;  %v2167_v57 = vsub.f32 1.0, %v1655_v48  ;;  %v1657_v58 = vmax.f32 %v3313_v51, 0.0  ;;  %3326 = vtanh.f32 %v640_v39  ;;  %v655_v50 = vmul.f32 0.5, %v143_v36  ;;  %v146_v51 = vld [vmem:[#allocation2 + $0x3c8] sm:$0xff] }
  0x71   :  { %v3317_v61 = vpop.eup %3316  ;;  %2678 = vst [vmem:[#allocation5 + $0x2e8] sm:$0xff] %v2166_v52  ;;  %v2168_v62 = vsub.f32 1.0, %v1656_v53  ;;  %v1658_v63 = vmax.f32 %v3315_v56, 0.0  ;;  %3328 = vtanh.f32 %v641_v44  ;;  %v656_v55 = vmul.f32 0.5, %v144_v41  ;;  %v147_v56 = vld [vmem:[#allocation2 + $0x3d0] sm:$0xff] }
  0x72   :  { %v3319_v2 = vpop.eup %3318  ;;  %2679 = vst [vmem:[#allocation5 + $0x2f0] sm:$0xff] %v2167_v57  ;;  %v2169_v3 = vsub.f32 1.0, %v1657_v58  ;;  %v1659_v4 = vmax.f32 %v3317_v61, 0.0  ;;  %3330 = vtanh.f32 %v642_v49  ;;  %v657_v60 = vmul.f32 0.5, %v145_v46  ;;  %v148_v61 = vld [vmem:[#allocation2 + $0x3d8] sm:$0xff] }
  0x73   :  { %v3321_v7 = vpop.eup %3320  ;;  %2680 = vst [vmem:[#allocation5 + $0x2f8] sm:$0xff] %v2168_v62  ;;  %v2170_v8 = vsub.f32 1.0, %v1658_v63  ;;  %v1660_v9 = vmax.f32 %v3319_v2, 0.0  ;;  %3332 = vtanh.f32 %v643_v54  ;;  %v658_v1 = vmul.f32 0.5, %v146_v51  ;;  %v149_v2 = vld [vmem:[#allocation2 + $0x3e0] sm:$0xff] }
  0x74   :  { %v3323_v12 = vpop.eup %3322  ;;  %2681 = vst [vmem:[#allocation5 + $0x300] sm:$0xff] %v2169_v3  ;;  %v2171_v13 = vsub.f32 1.0, %v1659_v4  ;;  %v1661_v14 = vmax.f32 %v3321_v7, 0.0  ;;  %3334 = vtanh.f32 %v644_v59  ;;  %v659_v6 = vmul.f32 0.5, %v147_v56  ;;  %v150_v7 = vld [vmem:[#allocation2 + $0x3e8] sm:$0xff] }
  0x75   :  { %v3325_v17 = vpop.eup %3324  ;;  %2682 = vst [vmem:[#allocation5 + $0x308] sm:$0xff] %v2170_v8  ;;  %v2172_v18 = vsub.f32 1.0, %v1660_v9  ;;  %v1662_v19 = vmax.f32 %v3323_v12, 0.0  ;;  %3336 = vtanh.f32 %v645_v0  ;;  %v660_v11 = vmul.f32 0.5, %v148_v61  ;;  %v151_v12 = vld [vmem:[#allocation2 + $0x3f0] sm:$0xff] }
  0x76   :  { %v3327_v22 = vpop.eup %3326  ;;  %2683 = vst [vmem:[#allocation5 + $0x310] sm:$0xff] %v2171_v13  ;;  %v2173_v23 = vsub.f32 1.0, %v1661_v14  ;;  %v1663_v24 = vmax.f32 %v3325_v17, 0.0  ;;  %3338 = vtanh.f32 %v646_v5  ;;  %v661_v16 = vmul.f32 0.5, %v149_v2  ;;  %v152_v17 = vld [vmem:[#allocation2 + $0x3f8] sm:$0xff] }
  0x77   :  { %v3329_v27 = vpop.eup %3328  ;;  %2684 = vst [vmem:[#allocation5 + $0x318] sm:$0xff] %v2172_v18  ;;  %v2174_v28 = vsub.f32 1.0, %v1662_v19  ;;  %v1664_v29 = vmax.f32 %v3327_v22, 0.0  ;;  %3340 = vtanh.f32 %v647_v10  ;;  %v662_v21 = vmul.f32 0.5, %v150_v7  ;;  %v153_v22 = vld [vmem:[#allocation2 + $0x400] sm:$0xff] }
  0x78   :  { %v3331_v32 = vpop.eup %3330  ;;  %2685 = vst [vmem:[#allocation5 + $0x320] sm:$0xff] %v2173_v23  ;;  %v2175_v33 = vsub.f32 1.0, %v1663_v24  ;;  %v1665_v34 = vmax.f32 %v3329_v27, 0.0  ;;  %3342 = vtanh.f32 %v648_v15  ;;  %v663_v26 = vmul.f32 0.5, %v151_v12  ;;  %v154_v27 = vld [vmem:[#allocation2 + $0x408] sm:$0xff] }
  0x79   :  { %v3333_v37 = vpop.eup %3332  ;;  %2686 = vst [vmem:[#allocation5 + $0x328] sm:$0xff] %v2174_v28  ;;  %v2176_v38 = vsub.f32 1.0, %v1664_v29  ;;  %v1666_v39 = vmax.f32 %v3331_v32, 0.0  ;;  %3344 = vtanh.f32 %v649_v20  ;;  %v664_v31 = vmul.f32 0.5, %v152_v17  ;;  %v155_v32 = vld [vmem:[#allocation2 + $0x410] sm:$0xff] }
  0x7a   :  { %v3335_v42 = vpop.eup %3334  ;;  %2687 = vst [vmem:[#allocation5 + $0x330] sm:$0xff] %v2175_v33  ;;  %v2177_v43 = vsub.f32 1.0, %v1665_v34  ;;  %v1667_v44 = vmax.f32 %v3333_v37, 0.0  ;;  %3346 = vtanh.f32 %v650_v25  ;;  %v665_v36 = vmul.f32 0.5, %v153_v22  ;;  %v156_v37 = vld [vmem:[#allocation2 + $0x418] sm:$0xff] }
  0x7b   :  { %v3337_v47 = vpop.eup %3336  ;;  %2688 = vst [vmem:[#allocation5 + $0x338] sm:$0xff] %v2176_v38  ;;  %v2178_v48 = vsub.f32 1.0, %v1666_v39  ;;  %v1668_v49 = vmax.f32 %v3335_v42, 0.0  ;;  %3348 = vtanh.f32 %v651_v30  ;;  %v666_v41 = vmul.f32 0.5, %v154_v27  ;;  %v157_v42 = vld [vmem:[#allocation2 + $0x420] sm:$0xff] }
  0x7c   :  { %v3339_v52 = vpop.eup %3338  ;;  %2689 = vst [vmem:[#allocation5 + $0x340] sm:$0xff] %v2177_v43  ;;  %v2179_v53 = vsub.f32 1.0, %v1667_v44  ;;  %v1669_v54 = vmax.f32 %v3337_v47, 0.0  ;;  %3350 = vtanh.f32 %v652_v35  ;;  %v667_v46 = vmul.f32 0.5, %v155_v32  ;;  %v158_v47 = vld [vmem:[#allocation2 + $0x428] sm:$0xff] }
  0x7d   :  { %v3341_v57 = vpop.eup %3340  ;;  %2690 = vst [vmem:[#allocation5 + $0x348] sm:$0xff] %v2178_v48  ;;  %v2180_v58 = vsub.f32 1.0, %v1668_v49  ;;  %v1670_v59 = vmax.f32 %v3339_v52, 0.0  ;;  %3352 = vtanh.f32 %v653_v40  ;;  %v668_v51 = vmul.f32 0.5, %v156_v37  ;;  %v159_v52 = vld [vmem:[#allocation2 + $0x430] sm:$0xff] }
  0x7e   :  { %v3343_v62 = vpop.eup %3342  ;;  %2691 = vst [vmem:[#allocation5 + $0x350] sm:$0xff] %v2179_v53  ;;  %v2181_v63 = vsub.f32 1.0, %v1669_v54  ;;  %v1671_v0 = vmax.f32 %v3341_v57, 0.0  ;;  %3354 = vtanh.f32 %v654_v45  ;;  %v669_v56 = vmul.f32 0.5, %v157_v42  ;;  %v160_v57 = vld [vmem:[#allocation2 + $0x438] sm:$0xff] }
  0x7f   :  { %v3345_v3 = vpop.eup %3344  ;;  %2692 = vst [vmem:[#allocation5 + $0x358] sm:$0xff] %v2180_v58  ;;  %v2182_v4 = vsub.f32 1.0, %v1670_v59  ;;  %v1672_v5 = vmax.f32 %v3343_v62, 0.0  ;;  %3356 = vtanh.f32 %v655_v50  ;;  %v670_v61 = vmul.f32 0.5, %v158_v47  ;;  %v161_v62 = vld [vmem:[#allocation2 + $0x440] sm:$0xff] }
  0x80   :  { %v3347_v8 = vpop.eup %3346  ;;  %2693 = vst [vmem:[#allocation5 + $0x360] sm:$0xff] %v2181_v63  ;;  %v2183_v9 = vsub.f32 1.0, %v1671_v0  ;;  %v1673_v10 = vmax.f32 %v3345_v3, 0.0  ;;  %3358 = vtanh.f32 %v656_v55  ;;  %v671_v2 = vmul.f32 0.5, %v159_v52  ;;  %v162_v3 = vld [vmem:[#allocation2 + $0x448] sm:$0xff] }
  0x81   :  { %v3349_v13 = vpop.eup %3348  ;;  %2694 = vst [vmem:[#allocation5 + $0x368] sm:$0xff] %v2182_v4  ;;  %v2184_v14 = vsub.f32 1.0, %v1672_v5  ;;  %v1674_v15 = vmax.f32 %v3347_v8, 0.0  ;;  %3360 = vtanh.f32 %v657_v60  ;;  %v672_v7 = vmul.f32 0.5, %v160_v57  ;;  %v163_v8 = vld [vmem:[#allocation2 + $0x450] sm:$0xff] }
  0x82   :  { %v3351_v18 = vpop.eup %3350  ;;  %2695 = vst [vmem:[#allocation5 + $0x370] sm:$0xff] %v2183_v9  ;;  %v2185_v19 = vsub.f32 1.0, %v1673_v10  ;;  %v1675_v20 = vmax.f32 %v3349_v13, 0.0  ;;  %3362 = vtanh.f32 %v658_v1  ;;  %v673_v12 = vmul.f32 0.5, %v161_v62  ;;  %v164_v13 = vld [vmem:[#allocation2 + $0x458] sm:$0xff] }
  0x83   :  { %v3353_v23 = vpop.eup %3352  ;;  %2696 = vst [vmem:[#allocation5 + $0x378] sm:$0xff] %v2184_v14  ;;  %v2186_v24 = vsub.f32 1.0, %v1674_v15  ;;  %v1676_v25 = vmax.f32 %v3351_v18, 0.0  ;;  %3364 = vtanh.f32 %v659_v6  ;;  %v674_v17 = vmul.f32 0.5, %v162_v3  ;;  %v165_v18 = vld [vmem:[#allocation2 + $0x460] sm:$0xff] }
  0x84   :  { %v3355_v28 = vpop.eup %3354  ;;  %2697 = vst [vmem:[#allocation5 + $0x380] sm:$0xff] %v2185_v19  ;;  %v2187_v29 = vsub.f32 1.0, %v1675_v20  ;;  %v1677_v30 = vmax.f32 %v3353_v23, 0.0  ;;  %3366 = vtanh.f32 %v660_v11  ;;  %v675_v22 = vmul.f32 0.5, %v163_v8  ;;  %v166_v23 = vld [vmem:[#allocation2 + $0x468] sm:$0xff] }
  0x85   :  { %v3357_v33 = vpop.eup %3356  ;;  %2698 = vst [vmem:[#allocation5 + $0x388] sm:$0xff] %v2186_v24  ;;  %v2188_v34 = vsub.f32 1.0, %v1676_v25  ;;  %v1678_v35 = vmax.f32 %v3355_v28, 0.0  ;;  %3368 = vtanh.f32 %v661_v16  ;;  %v676_v27 = vmul.f32 0.5, %v164_v13  ;;  %v167_v28 = vld [vmem:[#allocation2 + $0x470] sm:$0xff] }
  0x86   :  { %v3359_v38 = vpop.eup %3358  ;;  %2699 = vst [vmem:[#allocation5 + $0x390] sm:$0xff] %v2187_v29  ;;  %v2189_v39 = vsub.f32 1.0, %v1677_v30  ;;  %v1679_v40 = vmax.f32 %v3357_v33, 0.0  ;;  %3370 = vtanh.f32 %v662_v21  ;;  %v677_v32 = vmul.f32 0.5, %v165_v18  ;;  %v168_v33 = vld [vmem:[#allocation2 + $0x478] sm:$0xff] }
  0x87   :  { %v3361_v43 = vpop.eup %3360  ;;  %2700 = vst [vmem:[#allocation5 + $0x398] sm:$0xff] %v2188_v34  ;;  %v2190_v44 = vsub.f32 1.0, %v1678_v35  ;;  %v1680_v45 = vmax.f32 %v3359_v38, 0.0  ;;  %3372 = vtanh.f32 %v663_v26  ;;  %v678_v37 = vmul.f32 0.5, %v166_v23  ;;  %v169_v38 = vld [vmem:[#allocation2 + $0x480] sm:$0xff] }
  0x88   :  { %v3363_v48 = vpop.eup %3362  ;;  %2701 = vst [vmem:[#allocation5 + $0x3a0] sm:$0xff] %v2189_v39  ;;  %v2191_v49 = vsub.f32 1.0, %v1679_v40  ;;  %v1681_v50 = vmax.f32 %v3361_v43, 0.0  ;;  %3374 = vtanh.f32 %v664_v31  ;;  %v679_v42 = vmul.f32 0.5, %v167_v28  ;;  %v170_v43 = vld [vmem:[#allocation2 + $0x488] sm:$0xff] }
  0x89   :  { %v3365_v53 = vpop.eup %3364  ;;  %2702 = vst [vmem:[#allocation5 + $0x3a8] sm:$0xff] %v2190_v44  ;;  %v2192_v54 = vsub.f32 1.0, %v1680_v45  ;;  %v1682_v55 = vmax.f32 %v3363_v48, 0.0  ;;  %3376 = vtanh.f32 %v665_v36  ;;  %v680_v47 = vmul.f32 0.5, %v168_v33  ;;  %v171_v48 = vld [vmem:[#allocation2 + $0x490] sm:$0xff] }
  0x8a   :  { %v3367_v58 = vpop.eup %3366  ;;  %2703 = vst [vmem:[#allocation5 + $0x3b0] sm:$0xff] %v2191_v49  ;;  %v2193_v59 = vsub.f32 1.0, %v1681_v50  ;;  %v1683_v60 = vmax.f32 %v3365_v53, 0.0  ;;  %3378 = vtanh.f32 %v666_v41  ;;  %v681_v52 = vmul.f32 0.5, %v169_v38  ;;  %v172_v53 = vld [vmem:[#allocation2 + $0x498] sm:$0xff] }
  0x8b   :  { %v3369_v63 = vpop.eup %3368  ;;  %2704 = vst [vmem:[#allocation5 + $0x3b8] sm:$0xff] %v2192_v54  ;;  %v2194_v0 = vsub.f32 1.0, %v1682_v55  ;;  %v1684_v1 = vmax.f32 %v3367_v58, 0.0  ;;  %3380 = vtanh.f32 %v667_v46  ;;  %v682_v57 = vmul.f32 0.5, %v170_v43  ;;  %v173_v58 = vld [vmem:[#allocation2 + $0x4a0] sm:$0xff] }
  0x8c   :  { %v3371_v4 = vpop.eup %3370  ;;  %2705 = vst [vmem:[#allocation5 + $0x3c0] sm:$0xff] %v2193_v59  ;;  %v2195_v5 = vsub.f32 1.0, %v1683_v60  ;;  %v1685_v6 = vmax.f32 %v3369_v63, 0.0  ;;  %3382 = vtanh.f32 %v668_v51  ;;  %v683_v62 = vmul.f32 0.5, %v171_v48  ;;  %v174_v63 = vld [vmem:[#allocation2 + $0x4a8] sm:$0xff] }
  0x8d   :  { %v3373_v9 = vpop.eup %3372  ;;  %2706 = vst [vmem:[#allocation5 + $0x3c8] sm:$0xff] %v2194_v0  ;;  %v2196_v10 = vsub.f32 1.0, %v1684_v1  ;;  %v1686_v11 = vmax.f32 %v3371_v4, 0.0  ;;  %3384 = vtanh.f32 %v669_v56  ;;  %v684_v3 = vmul.f32 0.5, %v172_v53  ;;  %v175_v4 = vld [vmem:[#allocation2 + $0x4b0] sm:$0xff] }
  0x8e   :  { %v3375_v14 = vpop.eup %3374  ;;  %2707 = vst [vmem:[#allocation5 + $0x3d0] sm:$0xff] %v2195_v5  ;;  %v2197_v15 = vsub.f32 1.0, %v1685_v6  ;;  %v1687_v16 = vmax.f32 %v3373_v9, 0.0  ;;  %3386 = vtanh.f32 %v670_v61  ;;  %v685_v8 = vmul.f32 0.5, %v173_v58  ;;  %v176_v9 = vld [vmem:[#allocation2 + $0x4b8] sm:$0xff] }
  0x8f   :  { %v3377_v19 = vpop.eup %3376  ;;  %2708 = vst [vmem:[#allocation5 + $0x3d8] sm:$0xff] %v2196_v10  ;;  %v2198_v20 = vsub.f32 1.0, %v1686_v11  ;;  %v1688_v21 = vmax.f32 %v3375_v14, 0.0  ;;  %3388 = vtanh.f32 %v671_v2  ;;  %v686_v13 = vmul.f32 0.5, %v174_v63  ;;  %v177_v14 = vld [vmem:[#allocation2 + $0x4c0] sm:$0xff] }
  0x90   :  { %v3379_v24 = vpop.eup %3378  ;;  %2709 = vst [vmem:[#allocation5 + $0x3e0] sm:$0xff] %v2197_v15  ;;  %v2199_v25 = vsub.f32 1.0, %v1687_v16  ;;  %v1689_v26 = vmax.f32 %v3377_v19, 0.0  ;;  %3390 = vtanh.f32 %v672_v7  ;;  %v687_v18 = vmul.f32 0.5, %v175_v4  ;;  %v178_v19 = vld [vmem:[#allocation2 + $0x4c8] sm:$0xff] }
  0x91   :  { %v3381_v29 = vpop.eup %3380  ;;  %2710 = vst [vmem:[#allocation5 + $0x3e8] sm:$0xff] %v2198_v20  ;;  %v2200_v30 = vsub.f32 1.0, %v1688_v21  ;;  %v1690_v31 = vmax.f32 %v3379_v24, 0.0  ;;  %3392 = vtanh.f32 %v673_v12  ;;  %v688_v23 = vmul.f32 0.5, %v176_v9  ;;  %v179_v24 = vld [vmem:[#allocation2 + $0x4d0] sm:$0xff] }
  0x92   :  { %v3383_v34 = vpop.eup %3382  ;;  %2711 = vst [vmem:[#allocation5 + $0x3f0] sm:$0xff] %v2199_v25  ;;  %v2201_v35 = vsub.f32 1.0, %v1689_v26  ;;  %v1691_v36 = vmax.f32 %v3381_v29, 0.0  ;;  %3394 = vtanh.f32 %v674_v17  ;;  %v689_v28 = vmul.f32 0.5, %v177_v14  ;;  %v180_v29 = vld [vmem:[#allocation2 + $0x4d8] sm:$0xff] }
  0x93   :  { %v3385_v39 = vpop.eup %3384  ;;  %2712 = vst [vmem:[#allocation5 + $0x3f8] sm:$0xff] %v2200_v30  ;;  %v2202_v40 = vsub.f32 1.0, %v1690_v31  ;;  %v1692_v41 = vmax.f32 %v3383_v34, 0.0  ;;  %3396 = vtanh.f32 %v675_v22  ;;  %v690_v33 = vmul.f32 0.5, %v178_v19  ;;  %v181_v34 = vld [vmem:[#allocation2 + $0x4e0] sm:$0xff] }
  0x94   :  { %v3387_v44 = vpop.eup %3386  ;;  %2713 = vst [vmem:[#allocation5 + $0x400] sm:$0xff] %v2201_v35  ;;  %v2203_v45 = vsub.f32 1.0, %v1691_v36  ;;  %v1693_v46 = vmax.f32 %v3385_v39, 0.0  ;;  %3398 = vtanh.f32 %v676_v27  ;;  %v691_v38 = vmul.f32 0.5, %v179_v24  ;;  %v182_v39 = vld [vmem:[#allocation2 + $0x4e8] sm:$0xff] }
  0x95   :  { %v3389_v49 = vpop.eup %3388  ;;  %2714 = vst [vmem:[#allocation5 + $0x408] sm:$0xff] %v2202_v40  ;;  %v2204_v50 = vsub.f32 1.0, %v1692_v41  ;;  %v1694_v51 = vmax.f32 %v3387_v44, 0.0  ;;  %3400 = vtanh.f32 %v677_v32  ;;  %v692_v43 = vmul.f32 0.5, %v180_v29  ;;  %v183_v44 = vld [vmem:[#allocation2 + $0x4f0] sm:$0xff] }
  0x96   :  { %v3391_v54 = vpop.eup %3390  ;;  %2715 = vst [vmem:[#allocation5 + $0x410] sm:$0xff] %v2203_v45  ;;  %v2205_v55 = vsub.f32 1.0, %v1693_v46  ;;  %v1695_v56 = vmax.f32 %v3389_v49, 0.0  ;;  %3402 = vtanh.f32 %v678_v37  ;;  %v693_v48 = vmul.f32 0.5, %v181_v34  ;;  %v184_v49 = vld [vmem:[#allocation2 + $0x4f8] sm:$0xff] }
  0x97   :  { %v3393_v59 = vpop.eup %3392  ;;  %2716 = vst [vmem:[#allocation5 + $0x418] sm:$0xff] %v2204_v50  ;;  %v2206_v60 = vsub.f32 1.0, %v1694_v51  ;;  %v1696_v61 = vmax.f32 %v3391_v54, 0.0  ;;  %3404 = vtanh.f32 %v679_v42  ;;  %v694_v53 = vmul.f32 0.5, %v182_v39  ;;  %v185_v54 = vld [vmem:[#allocation2 + $0x500] sm:$0xff] }
  0x98   :  { %v3395_v0 = vpop.eup %3394  ;;  %2717 = vst [vmem:[#allocation5 + $0x420] sm:$0xff] %v2205_v55  ;;  %v2207_v1 = vsub.f32 1.0, %v1695_v56  ;;  %v1697_v2 = vmax.f32 %v3393_v59, 0.0  ;;  %3406 = vtanh.f32 %v680_v47  ;;  %v695_v58 = vmul.f32 0.5, %v183_v44  ;;  %v186_v59 = vld [vmem:[#allocation2 + $0x508] sm:$0xff] }
  0x99   :  { %v3397_v5 = vpop.eup %3396  ;;  %2718 = vst [vmem:[#allocation5 + $0x428] sm:$0xff] %v2206_v60  ;;  %v2208_v6 = vsub.f32 1.0, %v1696_v61  ;;  %v1698_v7 = vmax.f32 %v3395_v0, 0.0  ;;  %3408 = vtanh.f32 %v681_v52  ;;  %v696_v63 = vmul.f32 0.5, %v184_v49  ;;  %v187_v0 = vld [vmem:[#allocation2 + $0x510] sm:$0xff] }
  0x9a   :  { %v3399_v10 = vpop.eup %3398  ;;  %2719 = vst [vmem:[#allocation5 + $0x430] sm:$0xff] %v2207_v1  ;;  %v2209_v11 = vsub.f32 1.0, %v1697_v2  ;;  %v1699_v12 = vmax.f32 %v3397_v5, 0.0  ;;  %3410 = vtanh.f32 %v682_v57  ;;  %v697_v4 = vmul.f32 0.5, %v185_v54  ;;  %v188_v5 = vld [vmem:[#allocation2 + $0x518] sm:$0xff] }
  0x9b   :  { %v3401_v15 = vpop.eup %3400  ;;  %2720 = vst [vmem:[#allocation5 + $0x438] sm:$0xff] %v2208_v6  ;;  %v2210_v16 = vsub.f32 1.0, %v1698_v7  ;;  %v1700_v17 = vmax.f32 %v3399_v10, 0.0  ;;  %3412 = vtanh.f32 %v683_v62  ;;  %v698_v9 = vmul.f32 0.5, %v186_v59  ;;  %v189_v10 = vld [vmem:[#allocation2 + $0x520] sm:$0xff] }
  0x9c   :  { %v3403_v20 = vpop.eup %3402  ;;  %2721 = vst [vmem:[#allocation5 + $0x440] sm:$0xff] %v2209_v11  ;;  %v2211_v21 = vsub.f32 1.0, %v1699_v12  ;;  %v1701_v22 = vmax.f32 %v3401_v15, 0.0  ;;  %3414 = vtanh.f32 %v684_v3  ;;  %v699_v14 = vmul.f32 0.5, %v187_v0  ;;  %v190_v15 = vld [vmem:[#allocation2 + $0x528] sm:$0xff] }
  0x9d   :  { %v3405_v25 = vpop.eup %3404  ;;  %2722 = vst [vmem:[#allocation5 + $0x448] sm:$0xff] %v2210_v16  ;;  %v2212_v26 = vsub.f32 1.0, %v1700_v17  ;;  %v1702_v27 = vmax.f32 %v3403_v20, 0.0  ;;  %3416 = vtanh.f32 %v685_v8  ;;  %v700_v19 = vmul.f32 0.5, %v188_v5  ;;  %v191_v20 = vld [vmem:[#allocation2 + $0x530] sm:$0xff] }
  0x9e   :  { %v3407_v30 = vpop.eup %3406  ;;  %2723 = vst [vmem:[#allocation5 + $0x450] sm:$0xff] %v2211_v21  ;;  %v2213_v31 = vsub.f32 1.0, %v1701_v22  ;;  %v1703_v32 = vmax.f32 %v3405_v25, 0.0  ;;  %3418 = vtanh.f32 %v686_v13  ;;  %v701_v24 = vmul.f32 0.5, %v189_v10  ;;  %v192_v25 = vld [vmem:[#allocation2 + $0x538] sm:$0xff] }
  0x9f   :  { %v3409_v35 = vpop.eup %3408  ;;  %2724 = vst [vmem:[#allocation5 + $0x458] sm:$0xff] %v2212_v26  ;;  %v2214_v36 = vsub.f32 1.0, %v1702_v27  ;;  %v1704_v37 = vmax.f32 %v3407_v30, 0.0  ;;  %3420 = vtanh.f32 %v687_v18  ;;  %v702_v29 = vmul.f32 0.5, %v190_v15  ;;  %v193_v30 = vld [vmem:[#allocation2 + $0x540] sm:$0xff] }
  0xa0   :  { %v3411_v40 = vpop.eup %3410  ;;  %2725 = vst [vmem:[#allocation5 + $0x460] sm:$0xff] %v2213_v31  ;;  %v2215_v41 = vsub.f32 1.0, %v1703_v32  ;;  %v1705_v42 = vmax.f32 %v3409_v35, 0.0  ;;  %3422 = vtanh.f32 %v688_v23  ;;  %v703_v34 = vmul.f32 0.5, %v191_v20  ;;  %v194_v35 = vld [vmem:[#allocation2 + $0x548] sm:$0xff] }
  0xa1   :  { %v3413_v45 = vpop.eup %3412  ;;  %2726 = vst [vmem:[#allocation5 + $0x468] sm:$0xff] %v2214_v36  ;;  %v2216_v46 = vsub.f32 1.0, %v1704_v37  ;;  %v1706_v47 = vmax.f32 %v3411_v40, 0.0  ;;  %3424 = vtanh.f32 %v689_v28  ;;  %v704_v39 = vmul.f32 0.5, %v192_v25  ;;  %v195_v40 = vld [vmem:[#allocation2 + $0x550] sm:$0xff] }
  0xa2   :  { %v3415_v50 = vpop.eup %3414  ;;  %2727 = vst [vmem:[#allocation5 + $0x470] sm:$0xff] %v2215_v41  ;;  %v2217_v51 = vsub.f32 1.0, %v1705_v42  ;;  %v1707_v52 = vmax.f32 %v3413_v45, 0.0  ;;  %3426 = vtanh.f32 %v690_v33  ;;  %v705_v44 = vmul.f32 0.5, %v193_v30  ;;  %v196_v45 = vld [vmem:[#allocation2 + $0x558] sm:$0xff] }
  0xa3   :  { %v3417_v55 = vpop.eup %3416  ;;  %2728 = vst [vmem:[#allocation5 + $0x478] sm:$0xff] %v2216_v46  ;;  %v2218_v56 = vsub.f32 1.0, %v1706_v47  ;;  %v1708_v57 = vmax.f32 %v3415_v50, 0.0  ;;  %3428 = vtanh.f32 %v691_v38  ;;  %v706_v49 = vmul.f32 0.5, %v194_v35  ;;  %v197_v50 = vld [vmem:[#allocation2 + $0x560] sm:$0xff] }
  0xa4   :  { %v3419_v60 = vpop.eup %3418  ;;  %2729 = vst [vmem:[#allocation5 + $0x480] sm:$0xff] %v2217_v51  ;;  %v2219_v61 = vsub.f32 1.0, %v1707_v52  ;;  %v1709_v62 = vmax.f32 %v3417_v55, 0.0  ;;  %3430 = vtanh.f32 %v692_v43  ;;  %v707_v54 = vmul.f32 0.5, %v195_v40  ;;  %v198_v55 = vld [vmem:[#allocation2 + $0x568] sm:$0xff] }
  0xa5   :  { %v3421_v1 = vpop.eup %3420  ;;  %2730 = vst [vmem:[#allocation5 + $0x488] sm:$0xff] %v2218_v56  ;;  %v2220_v2 = vsub.f32 1.0, %v1708_v57  ;;  %v1710_v3 = vmax.f32 %v3419_v60, 0.0  ;;  %3432 = vtanh.f32 %v693_v48  ;;  %v708_v59 = vmul.f32 0.5, %v196_v45  ;;  %v199_v60 = vld [vmem:[#allocation2 + $0x570] sm:$0xff] }
  0xa6   :  { %v3423_v6 = vpop.eup %3422  ;;  %2731 = vst [vmem:[#allocation5 + $0x490] sm:$0xff] %v2219_v61  ;;  %v2221_v7 = vsub.f32 1.0, %v1709_v62  ;;  %v1711_v8 = vmax.f32 %v3421_v1, 0.0  ;;  %3434 = vtanh.f32 %v694_v53  ;;  %v709_v0 = vmul.f32 0.5, %v197_v50  ;;  %v200_v1 = vld [vmem:[#allocation2 + $0x578] sm:$0xff] }
  0xa7   :  { %v3425_v11 = vpop.eup %3424  ;;  %2732 = vst [vmem:[#allocation5 + $0x498] sm:$0xff] %v2220_v2  ;;  %v2222_v12 = vsub.f32 1.0, %v1710_v3  ;;  %v1712_v13 = vmax.f32 %v3423_v6, 0.0  ;;  %3436 = vtanh.f32 %v695_v58  ;;  %v710_v5 = vmul.f32 0.5, %v198_v55  ;;  %v201_v6 = vld [vmem:[#allocation2 + $0x580] sm:$0xff] }
  0xa8   :  { %v3427_v16 = vpop.eup %3426  ;;  %2733 = vst [vmem:[#allocation5 + $0x4a0] sm:$0xff] %v2221_v7  ;;  %v2223_v17 = vsub.f32 1.0, %v1711_v8  ;;  %v1713_v18 = vmax.f32 %v3425_v11, 0.0  ;;  %3438 = vtanh.f32 %v696_v63  ;;  %v711_v10 = vmul.f32 0.5, %v199_v60  ;;  %v202_v11 = vld [vmem:[#allocation2 + $0x588] sm:$0xff] }
  0xa9   :  { %v3429_v21 = vpop.eup %3428  ;;  %2734 = vst [vmem:[#allocation5 + $0x4a8] sm:$0xff] %v2222_v12  ;;  %v2224_v22 = vsub.f32 1.0, %v1712_v13  ;;  %v1714_v23 = vmax.f32 %v3427_v16, 0.0  ;;  %3440 = vtanh.f32 %v697_v4  ;;  %v712_v15 = vmul.f32 0.5, %v200_v1  ;;  %v203_v16 = vld [vmem:[#allocation2 + $0x590] sm:$0xff] }
  0xaa   :  { %v3431_v26 = vpop.eup %3430  ;;  %2735 = vst [vmem:[#allocation5 + $0x4b0] sm:$0xff] %v2223_v17  ;;  %v2225_v27 = vsub.f32 1.0, %v1713_v18  ;;  %v1715_v28 = vmax.f32 %v3429_v21, 0.0  ;;  %3442 = vtanh.f32 %v698_v9  ;;  %v713_v20 = vmul.f32 0.5, %v201_v6  ;;  %v204_v21 = vld [vmem:[#allocation2 + $0x598] sm:$0xff] }
  0xab   :  { %v3433_v31 = vpop.eup %3432  ;;  %2736 = vst [vmem:[#allocation5 + $0x4b8] sm:$0xff] %v2224_v22  ;;  %v2226_v32 = vsub.f32 1.0, %v1714_v23  ;;  %v1716_v33 = vmax.f32 %v3431_v26, 0.0  ;;  %3444 = vtanh.f32 %v699_v14  ;;  %v714_v25 = vmul.f32 0.5, %v202_v11  ;;  %v205_v26 = vld [vmem:[#allocation2 + $0x5a0] sm:$0xff] }
  0xac   :  { %v3435_v36 = vpop.eup %3434  ;;  %2737 = vst [vmem:[#allocation5 + $0x4c0] sm:$0xff] %v2225_v27  ;;  %v2227_v37 = vsub.f32 1.0, %v1715_v28  ;;  %v1717_v38 = vmax.f32 %v3433_v31, 0.0  ;;  %3446 = vtanh.f32 %v700_v19  ;;  %v715_v30 = vmul.f32 0.5, %v203_v16  ;;  %v206_v31 = vld [vmem:[#allocation2 + $0x5a8] sm:$0xff] }
  0xad   :  { %v3437_v41 = vpop.eup %3436  ;;  %2738 = vst [vmem:[#allocation5 + $0x4c8] sm:$0xff] %v2226_v32  ;;  %v2228_v42 = vsub.f32 1.0, %v1716_v33  ;;  %v1718_v43 = vmax.f32 %v3435_v36, 0.0  ;;  %3448 = vtanh.f32 %v701_v24  ;;  %v716_v35 = vmul.f32 0.5, %v204_v21  ;;  %v207_v36 = vld [vmem:[#allocation2 + $0x5b0] sm:$0xff] }
  0xae   :  { %v3439_v46 = vpop.eup %3438  ;;  %2739 = vst [vmem:[#allocation5 + $0x4d0] sm:$0xff] %v2227_v37  ;;  %v2229_v47 = vsub.f32 1.0, %v1717_v38  ;;  %v1719_v48 = vmax.f32 %v3437_v41, 0.0  ;;  %3450 = vtanh.f32 %v702_v29  ;;  %v717_v40 = vmul.f32 0.5, %v205_v26  ;;  %v208_v41 = vld [vmem:[#allocation2 + $0x5b8] sm:$0xff] }
  0xaf   :  { %v3441_v51 = vpop.eup %3440  ;;  %2740 = vst [vmem:[#allocation5 + $0x4d8] sm:$0xff] %v2228_v42  ;;  %v2230_v52 = vsub.f32 1.0, %v1718_v43  ;;  %v1720_v53 = vmax.f32 %v3439_v46, 0.0  ;;  %3452 = vtanh.f32 %v703_v34  ;;  %v718_v45 = vmul.f32 0.5, %v206_v31  ;;  %v209_v46 = vld [vmem:[#allocation2 + $0x5c0] sm:$0xff] }
  0xb0   :  { %v3443_v56 = vpop.eup %3442  ;;  %2741 = vst [vmem:[#allocation5 + $0x4e0] sm:$0xff] %v2229_v47  ;;  %v2231_v57 = vsub.f32 1.0, %v1719_v48  ;;  %v1721_v58 = vmax.f32 %v3441_v51, 0.0  ;;  %3454 = vtanh.f32 %v704_v39  ;;  %v719_v50 = vmul.f32 0.5, %v207_v36  ;;  %v210_v51 = vld [vmem:[#allocation2 + $0x5c8] sm:$0xff] }
  0xb1   :  { %v3445_v61 = vpop.eup %3444  ;;  %2742 = vst [vmem:[#allocation5 + $0x4e8] sm:$0xff] %v2230_v52  ;;  %v2232_v62 = vsub.f32 1.0, %v1720_v53  ;;  %v1722_v63 = vmax.f32 %v3443_v56, 0.0  ;;  %3456 = vtanh.f32 %v705_v44  ;;  %v720_v55 = vmul.f32 0.5, %v208_v41  ;;  %v211_v56 = vld [vmem:[#allocation2 + $0x5d0] sm:$0xff] }
  0xb2   :  { %v3447_v2 = vpop.eup %3446  ;;  %2743 = vst [vmem:[#allocation5 + $0x4f0] sm:$0xff] %v2231_v57  ;;  %v2233_v3 = vsub.f32 1.0, %v1721_v58  ;;  %v1723_v4 = vmax.f32 %v3445_v61, 0.0  ;;  %3458 = vtanh.f32 %v706_v49  ;;  %v721_v60 = vmul.f32 0.5, %v209_v46  ;;  %v212_v61 = vld [vmem:[#allocation2 + $0x5d8] sm:$0xff] }
  0xb3   :  { %v3449_v7 = vpop.eup %3448  ;;  %2744 = vst [vmem:[#allocation5 + $0x4f8] sm:$0xff] %v2232_v62  ;;  %v2234_v8 = vsub.f32 1.0, %v1722_v63  ;;  %v1724_v9 = vmax.f32 %v3447_v2, 0.0  ;;  %3460 = vtanh.f32 %v707_v54  ;;  %v722_v1 = vmul.f32 0.5, %v210_v51  ;;  %v213_v2 = vld [vmem:[#allocation2 + $0x5e0] sm:$0xff] }
  0xb4   :  { %v3451_v12 = vpop.eup %3450  ;;  %2745 = vst [vmem:[#allocation5 + $0x500] sm:$0xff] %v2233_v3  ;;  %v2235_v13 = vsub.f32 1.0, %v1723_v4  ;;  %v1725_v14 = vmax.f32 %v3449_v7, 0.0  ;;  %3462 = vtanh.f32 %v708_v59  ;;  %v723_v6 = vmul.f32 0.5, %v211_v56  ;;  %v214_v7 = vld [vmem:[#allocation2 + $0x5e8] sm:$0xff] }
  0xb5   :  { %v3453_v17 = vpop.eup %3452  ;;  %2746 = vst [vmem:[#allocation5 + $0x508] sm:$0xff] %v2234_v8  ;;  %v2236_v18 = vsub.f32 1.0, %v1724_v9  ;;  %v1726_v19 = vmax.f32 %v3451_v12, 0.0  ;;  %3464 = vtanh.f32 %v709_v0  ;;  %v724_v11 = vmul.f32 0.5, %v212_v61  ;;  %v215_v12 = vld [vmem:[#allocation2 + $0x5f0] sm:$0xff] }
  0xb6   :  { %v3455_v22 = vpop.eup %3454  ;;  %2747 = vst [vmem:[#allocation5 + $0x510] sm:$0xff] %v2235_v13  ;;  %v2237_v23 = vsub.f32 1.0, %v1725_v14  ;;  %v1727_v24 = vmax.f32 %v3453_v17, 0.0  ;;  %3466 = vtanh.f32 %v710_v5  ;;  %v725_v16 = vmul.f32 0.5, %v213_v2  ;;  %v216_v17 = vld [vmem:[#allocation2 + $0x5f8] sm:$0xff] }
  0xb7   :  { %v3457_v27 = vpop.eup %3456  ;;  %2748 = vst [vmem:[#allocation5 + $0x518] sm:$0xff] %v2236_v18  ;;  %v2238_v28 = vsub.f32 1.0, %v1726_v19  ;;  %v1728_v29 = vmax.f32 %v3455_v22, 0.0  ;;  %3468 = vtanh.f32 %v711_v10  ;;  %v726_v21 = vmul.f32 0.5, %v214_v7  ;;  %v217_v22 = vld [vmem:[#allocation2 + $0x600] sm:$0xff] }
  0xb8   :  { %v3459_v32 = vpop.eup %3458  ;;  %2749 = vst [vmem:[#allocation5 + $0x520] sm:$0xff] %v2237_v23  ;;  %v2239_v33 = vsub.f32 1.0, %v1727_v24  ;;  %v1729_v34 = vmax.f32 %v3457_v27, 0.0  ;;  %3470 = vtanh.f32 %v712_v15  ;;  %v727_v26 = vmul.f32 0.5, %v215_v12  ;;  %v218_v27 = vld [vmem:[#allocation2 + $0x608] sm:$0xff] }
  0xb9   :  { %v3461_v37 = vpop.eup %3460  ;;  %2750 = vst [vmem:[#allocation5 + $0x528] sm:$0xff] %v2238_v28  ;;  %v2240_v38 = vsub.f32 1.0, %v1728_v29  ;;  %v1730_v39 = vmax.f32 %v3459_v32, 0.0  ;;  %3472 = vtanh.f32 %v713_v20  ;;  %v728_v31 = vmul.f32 0.5, %v216_v17  ;;  %v219_v32 = vld [vmem:[#allocation2 + $0x610] sm:$0xff] }
  0xba   :  { %v3463_v42 = vpop.eup %3462  ;;  %2751 = vst [vmem:[#allocation5 + $0x530] sm:$0xff] %v2239_v33  ;;  %v2241_v43 = vsub.f32 1.0, %v1729_v34  ;;  %v1731_v44 = vmax.f32 %v3461_v37, 0.0  ;;  %3474 = vtanh.f32 %v714_v25  ;;  %v729_v36 = vmul.f32 0.5, %v217_v22  ;;  %v220_v37 = vld [vmem:[#allocation2 + $0x618] sm:$0xff] }
  0xbb   :  { %v3465_v47 = vpop.eup %3464  ;;  %2752 = vst [vmem:[#allocation5 + $0x538] sm:$0xff] %v2240_v38  ;;  %v2242_v48 = vsub.f32 1.0, %v1730_v39  ;;  %v1732_v49 = vmax.f32 %v3463_v42, 0.0  ;;  %3476 = vtanh.f32 %v715_v30  ;;  %v730_v41 = vmul.f32 0.5, %v218_v27  ;;  %v221_v42 = vld [vmem:[#allocation2 + $0x620] sm:$0xff] }
  0xbc   :  { %v3467_v52 = vpop.eup %3466  ;;  %2753 = vst [vmem:[#allocation5 + $0x540] sm:$0xff] %v2241_v43  ;;  %v2243_v53 = vsub.f32 1.0, %v1731_v44  ;;  %v1733_v54 = vmax.f32 %v3465_v47, 0.0  ;;  %3478 = vtanh.f32 %v716_v35  ;;  %v731_v46 = vmul.f32 0.5, %v219_v32  ;;  %v222_v47 = vld [vmem:[#allocation2 + $0x628] sm:$0xff] }
  0xbd   :  { %v3469_v57 = vpop.eup %3468  ;;  %2754 = vst [vmem:[#allocation5 + $0x548] sm:$0xff] %v2242_v48  ;;  %v2244_v58 = vsub.f32 1.0, %v1732_v49  ;;  %v1734_v59 = vmax.f32 %v3467_v52, 0.0  ;;  %3480 = vtanh.f32 %v717_v40  ;;  %v732_v51 = vmul.f32 0.5, %v220_v37  ;;  %v223_v52 = vld [vmem:[#allocation2 + $0x630] sm:$0xff] }
  0xbe   :  { %v3471_v62 = vpop.eup %3470  ;;  %2755 = vst [vmem:[#allocation5 + $0x550] sm:$0xff] %v2243_v53  ;;  %v2245_v63 = vsub.f32 1.0, %v1733_v54  ;;  %v1735_v0 = vmax.f32 %v3469_v57, 0.0  ;;  %3482 = vtanh.f32 %v718_v45  ;;  %v733_v56 = vmul.f32 0.5, %v221_v42  ;;  %v224_v57 = vld [vmem:[#allocation2 + $0x638] sm:$0xff] }
  0xbf   :  { %v3473_v3 = vpop.eup %3472  ;;  %2756 = vst [vmem:[#allocation5 + $0x558] sm:$0xff] %v2244_v58  ;;  %v2246_v4 = vsub.f32 1.0, %v1734_v59  ;;  %v1736_v5 = vmax.f32 %v3471_v62, 0.0  ;;  %3484 = vtanh.f32 %v719_v50  ;;  %v734_v61 = vmul.f32 0.5, %v222_v47  ;;  %v225_v62 = vld [vmem:[#allocation2 + $0x640] sm:$0xff] }
  0xc0   :  { %v3475_v8 = vpop.eup %3474  ;;  %2757 = vst [vmem:[#allocation5 + $0x560] sm:$0xff] %v2245_v63  ;;  %v2247_v9 = vsub.f32 1.0, %v1735_v0  ;;  %v1737_v10 = vmax.f32 %v3473_v3, 0.0  ;;  %3486 = vtanh.f32 %v720_v55  ;;  %v735_v2 = vmul.f32 0.5, %v223_v52  ;;  %v226_v3 = vld [vmem:[#allocation2 + $0x648] sm:$0xff] }
  0xc1   :  { %v3477_v13 = vpop.eup %3476  ;;  %2758 = vst [vmem:[#allocation5 + $0x568] sm:$0xff] %v2246_v4  ;;  %v2248_v14 = vsub.f32 1.0, %v1736_v5  ;;  %v1738_v15 = vmax.f32 %v3475_v8, 0.0  ;;  %3488 = vtanh.f32 %v721_v60  ;;  %v736_v7 = vmul.f32 0.5, %v224_v57  ;;  %v227_v8 = vld [vmem:[#allocation2 + $0x650] sm:$0xff] }
  0xc2   :  { %v3479_v18 = vpop.eup %3478  ;;  %2759 = vst [vmem:[#allocation5 + $0x570] sm:$0xff] %v2247_v9  ;;  %v2249_v19 = vsub.f32 1.0, %v1737_v10  ;;  %v1739_v20 = vmax.f32 %v3477_v13, 0.0  ;;  %3490 = vtanh.f32 %v722_v1  ;;  %v737_v12 = vmul.f32 0.5, %v225_v62  ;;  %v228_v13 = vld [vmem:[#allocation2 + $0x658] sm:$0xff] }
  0xc3   :  { %v3481_v23 = vpop.eup %3480  ;;  %2760 = vst [vmem:[#allocation5 + $0x578] sm:$0xff] %v2248_v14  ;;  %v2250_v24 = vsub.f32 1.0, %v1738_v15  ;;  %v1740_v25 = vmax.f32 %v3479_v18, 0.0  ;;  %3492 = vtanh.f32 %v723_v6  ;;  %v738_v17 = vmul.f32 0.5, %v226_v3  ;;  %v229_v18 = vld [vmem:[#allocation2 + $0x660] sm:$0xff] }
  0xc4   :  { %v3483_v28 = vpop.eup %3482  ;;  %2761 = vst [vmem:[#allocation5 + $0x580] sm:$0xff] %v2249_v19  ;;  %v2251_v29 = vsub.f32 1.0, %v1739_v20  ;;  %v1741_v30 = vmax.f32 %v3481_v23, 0.0  ;;  %3494 = vtanh.f32 %v724_v11  ;;  %v739_v22 = vmul.f32 0.5, %v227_v8  ;;  %v230_v23 = vld [vmem:[#allocation2 + $0x668] sm:$0xff] }
  0xc5   :  { %v3485_v33 = vpop.eup %3484  ;;  %2762 = vst [vmem:[#allocation5 + $0x588] sm:$0xff] %v2250_v24  ;;  %v2252_v34 = vsub.f32 1.0, %v1740_v25  ;;  %v1742_v35 = vmax.f32 %v3483_v28, 0.0  ;;  %3496 = vtanh.f32 %v725_v16  ;;  %v740_v27 = vmul.f32 0.5, %v228_v13  ;;  %v231_v28 = vld [vmem:[#allocation2 + $0x670] sm:$0xff] }
  0xc6   :  { %v3487_v38 = vpop.eup %3486  ;;  %2763 = vst [vmem:[#allocation5 + $0x590] sm:$0xff] %v2251_v29  ;;  %v2253_v39 = vsub.f32 1.0, %v1741_v30  ;;  %v1743_v40 = vmax.f32 %v3485_v33, 0.0  ;;  %3498 = vtanh.f32 %v726_v21  ;;  %v741_v32 = vmul.f32 0.5, %v229_v18  ;;  %v232_v33 = vld [vmem:[#allocation2 + $0x678] sm:$0xff] }
  0xc7   :  { %v3489_v43 = vpop.eup %3488  ;;  %2764 = vst [vmem:[#allocation5 + $0x598] sm:$0xff] %v2252_v34  ;;  %v2254_v44 = vsub.f32 1.0, %v1742_v35  ;;  %v1744_v45 = vmax.f32 %v3487_v38, 0.0  ;;  %3500 = vtanh.f32 %v727_v26  ;;  %v742_v37 = vmul.f32 0.5, %v230_v23  ;;  %v233_v38 = vld [vmem:[#allocation2 + $0x680] sm:$0xff] }
  0xc8   :  { %v3491_v48 = vpop.eup %3490  ;;  %2765 = vst [vmem:[#allocation5 + $0x5a0] sm:$0xff] %v2253_v39  ;;  %v2255_v49 = vsub.f32 1.0, %v1743_v40  ;;  %v1745_v50 = vmax.f32 %v3489_v43, 0.0  ;;  %3502 = vtanh.f32 %v728_v31  ;;  %v743_v42 = vmul.f32 0.5, %v231_v28  ;;  %v234_v43 = vld [vmem:[#allocation2 + $0x688] sm:$0xff] }
  0xc9   :  { %v3493_v53 = vpop.eup %3492  ;;  %2766 = vst [vmem:[#allocation5 + $0x5a8] sm:$0xff] %v2254_v44  ;;  %v2256_v54 = vsub.f32 1.0, %v1744_v45  ;;  %v1746_v55 = vmax.f32 %v3491_v48, 0.0  ;;  %3504 = vtanh.f32 %v729_v36  ;;  %v744_v47 = vmul.f32 0.5, %v232_v33  ;;  %v235_v48 = vld [vmem:[#allocation2 + $0x690] sm:$0xff] }
  0xca   :  { %v3495_v58 = vpop.eup %3494  ;;  %2767 = vst [vmem:[#allocation5 + $0x5b0] sm:$0xff] %v2255_v49  ;;  %v2257_v59 = vsub.f32 1.0, %v1745_v50  ;;  %v1747_v60 = vmax.f32 %v3493_v53, 0.0  ;;  %3506 = vtanh.f32 %v730_v41  ;;  %v745_v52 = vmul.f32 0.5, %v233_v38  ;;  %v236_v53 = vld [vmem:[#allocation2 + $0x698] sm:$0xff] }
  0xcb   :  { %v3497_v63 = vpop.eup %3496  ;;  %2768 = vst [vmem:[#allocation5 + $0x5b8] sm:$0xff] %v2256_v54  ;;  %v2258_v0 = vsub.f32 1.0, %v1746_v55  ;;  %v1748_v1 = vmax.f32 %v3495_v58, 0.0  ;;  %3508 = vtanh.f32 %v731_v46  ;;  %v746_v57 = vmul.f32 0.5, %v234_v43  ;;  %v237_v58 = vld [vmem:[#allocation2 + $0x6a0] sm:$0xff] }
  0xcc   :  { %v3499_v4 = vpop.eup %3498  ;;  %2769 = vst [vmem:[#allocation5 + $0x5c0] sm:$0xff] %v2257_v59  ;;  %v2259_v5 = vsub.f32 1.0, %v1747_v60  ;;  %v1749_v6 = vmax.f32 %v3497_v63, 0.0  ;;  %3510 = vtanh.f32 %v732_v51  ;;  %v747_v62 = vmul.f32 0.5, %v235_v48  ;;  %v238_v63 = vld [vmem:[#allocation2 + $0x6a8] sm:$0xff] }
  0xcd   :  { %v3501_v9 = vpop.eup %3500  ;;  %2770 = vst [vmem:[#allocation5 + $0x5c8] sm:$0xff] %v2258_v0  ;;  %v2260_v10 = vsub.f32 1.0, %v1748_v1  ;;  %v1750_v11 = vmax.f32 %v3499_v4, 0.0  ;;  %3512 = vtanh.f32 %v733_v56  ;;  %v748_v3 = vmul.f32 0.5, %v236_v53  ;;  %v239_v4 = vld [vmem:[#allocation2 + $0x6b0] sm:$0xff] }
  0xce   :  { %v3503_v14 = vpop.eup %3502  ;;  %2771 = vst [vmem:[#allocation5 + $0x5d0] sm:$0xff] %v2259_v5  ;;  %v2261_v15 = vsub.f32 1.0, %v1749_v6  ;;  %v1751_v16 = vmax.f32 %v3501_v9, 0.0  ;;  %3514 = vtanh.f32 %v734_v61  ;;  %v749_v8 = vmul.f32 0.5, %v237_v58  ;;  %v240_v9 = vld [vmem:[#allocation2 + $0x6b8] sm:$0xff] }
  0xcf   :  { %v3505_v19 = vpop.eup %3504  ;;  %2772 = vst [vmem:[#allocation5 + $0x5d8] sm:$0xff] %v2260_v10  ;;  %v2262_v20 = vsub.f32 1.0, %v1750_v11  ;;  %v1752_v21 = vmax.f32 %v3503_v14, 0.0  ;;  %3516 = vtanh.f32 %v735_v2  ;;  %v750_v13 = vmul.f32 0.5, %v238_v63  ;;  %v241_v14 = vld [vmem:[#allocation2 + $0x6c0] sm:$0xff] }
  0xd0   :  { %v3507_v24 = vpop.eup %3506  ;;  %2773 = vst [vmem:[#allocation5 + $0x5e0] sm:$0xff] %v2261_v15  ;;  %v2263_v25 = vsub.f32 1.0, %v1751_v16  ;;  %v1753_v26 = vmax.f32 %v3505_v19, 0.0  ;;  %3518 = vtanh.f32 %v736_v7  ;;  %v751_v18 = vmul.f32 0.5, %v239_v4  ;;  %v242_v19 = vld [vmem:[#allocation2 + $0x6c8] sm:$0xff] }
  0xd1   :  { %v3509_v29 = vpop.eup %3508  ;;  %2774 = vst [vmem:[#allocation5 + $0x5e8] sm:$0xff] %v2262_v20  ;;  %v2264_v30 = vsub.f32 1.0, %v1752_v21  ;;  %v1754_v31 = vmax.f32 %v3507_v24, 0.0  ;;  %3520 = vtanh.f32 %v737_v12  ;;  %v752_v23 = vmul.f32 0.5, %v240_v9  ;;  %v243_v24 = vld [vmem:[#allocation2 + $0x6d0] sm:$0xff] }
  0xd2   :  { %v3511_v34 = vpop.eup %3510  ;;  %2775 = vst [vmem:[#allocation5 + $0x5f0] sm:$0xff] %v2263_v25  ;;  %v2265_v35 = vsub.f32 1.0, %v1753_v26  ;;  %v1755_v36 = vmax.f32 %v3509_v29, 0.0  ;;  %3522 = vtanh.f32 %v738_v17  ;;  %v753_v28 = vmul.f32 0.5, %v241_v14  ;;  %v244_v29 = vld [vmem:[#allocation2 + $0x6d8] sm:$0xff] }
  0xd3   :  { %v3513_v39 = vpop.eup %3512  ;;  %2776 = vst [vmem:[#allocation5 + $0x5f8] sm:$0xff] %v2264_v30  ;;  %v2266_v40 = vsub.f32 1.0, %v1754_v31  ;;  %v1756_v41 = vmax.f32 %v3511_v34, 0.0  ;;  %3524 = vtanh.f32 %v739_v22  ;;  %v754_v33 = vmul.f32 0.5, %v242_v19  ;;  %v245_v34 = vld [vmem:[#allocation2 + $0x6e0] sm:$0xff] }
  0xd4   :  { %v3515_v44 = vpop.eup %3514  ;;  %2777 = vst [vmem:[#allocation5 + $0x600] sm:$0xff] %v2265_v35  ;;  %v2267_v45 = vsub.f32 1.0, %v1755_v36  ;;  %v1757_v46 = vmax.f32 %v3513_v39, 0.0  ;;  %3526 = vtanh.f32 %v740_v27  ;;  %v755_v38 = vmul.f32 0.5, %v243_v24  ;;  %v246_v39 = vld [vmem:[#allocation2 + $0x6e8] sm:$0xff] }
  0xd5   :  { %v3517_v49 = vpop.eup %3516  ;;  %2778 = vst [vmem:[#allocation5 + $0x608] sm:$0xff] %v2266_v40  ;;  %v2268_v50 = vsub.f32 1.0, %v1756_v41  ;;  %v1758_v51 = vmax.f32 %v3515_v44, 0.0  ;;  %3528 = vtanh.f32 %v741_v32  ;;  %v756_v43 = vmul.f32 0.5, %v244_v29  ;;  %v247_v44 = vld [vmem:[#allocation2 + $0x6f0] sm:$0xff] }
  0xd6   :  { %v3519_v54 = vpop.eup %3518  ;;  %2779 = vst [vmem:[#allocation5 + $0x610] sm:$0xff] %v2267_v45  ;;  %v2269_v55 = vsub.f32 1.0, %v1757_v46  ;;  %v1759_v56 = vmax.f32 %v3517_v49, 0.0  ;;  %3530 = vtanh.f32 %v742_v37  ;;  %v757_v48 = vmul.f32 0.5, %v245_v34  ;;  %v248_v49 = vld [vmem:[#allocation2 + $0x6f8] sm:$0xff] }
  0xd7   :  { %v3521_v59 = vpop.eup %3520  ;;  %2780 = vst [vmem:[#allocation5 + $0x618] sm:$0xff] %v2268_v50  ;;  %v2270_v60 = vsub.f32 1.0, %v1758_v51  ;;  %v1760_v61 = vmax.f32 %v3519_v54, 0.0  ;;  %3532 = vtanh.f32 %v743_v42  ;;  %v758_v53 = vmul.f32 0.5, %v246_v39  ;;  %v249_v54 = vld [vmem:[#allocation2 + $0x700] sm:$0xff] }
  0xd8   :  { %v3523_v0 = vpop.eup %3522  ;;  %2781 = vst [vmem:[#allocation5 + $0x620] sm:$0xff] %v2269_v55  ;;  %v2271_v1 = vsub.f32 1.0, %v1759_v56  ;;  %v1761_v2 = vmax.f32 %v3521_v59, 0.0  ;;  %3534 = vtanh.f32 %v744_v47  ;;  %v759_v58 = vmul.f32 0.5, %v247_v44  ;;  %v250_v59 = vld [vmem:[#allocation2 + $0x708] sm:$0xff] }
  0xd9   :  { %v3525_v5 = vpop.eup %3524  ;;  %2782 = vst [vmem:[#allocation5 + $0x628] sm:$0xff] %v2270_v60  ;;  %v2272_v6 = vsub.f32 1.0, %v1760_v61  ;;  %v1762_v7 = vmax.f32 %v3523_v0, 0.0  ;;  %3536 = vtanh.f32 %v745_v52  ;;  %v760_v63 = vmul.f32 0.5, %v248_v49  ;;  %v251_v0 = vld [vmem:[#allocation2 + $0x710] sm:$0xff] }
  0xda   :  { %v3527_v10 = vpop.eup %3526  ;;  %2783 = vst [vmem:[#allocation5 + $0x630] sm:$0xff] %v2271_v1  ;;  %v2273_v11 = vsub.f32 1.0, %v1761_v2  ;;  %v1763_v12 = vmax.f32 %v3525_v5, 0.0  ;;  %3538 = vtanh.f32 %v746_v57  ;;  %v761_v4 = vmul.f32 0.5, %v249_v54  ;;  %v252_v5 = vld [vmem:[#allocation2 + $0x718] sm:$0xff] }
  0xdb   :  { %v3529_v15 = vpop.eup %3528  ;;  %2784 = vst [vmem:[#allocation5 + $0x638] sm:$0xff] %v2272_v6  ;;  %v2274_v16 = vsub.f32 1.0, %v1762_v7  ;;  %v1764_v17 = vmax.f32 %v3527_v10, 0.0  ;;  %3540 = vtanh.f32 %v747_v62  ;;  %v762_v9 = vmul.f32 0.5, %v250_v59  ;;  %v253_v10 = vld [vmem:[#allocation2 + $0x720] sm:$0xff] }
  0xdc   :  { %v3531_v20 = vpop.eup %3530  ;;  %2785 = vst [vmem:[#allocation5 + $0x640] sm:$0xff] %v2273_v11  ;;  %v2275_v21 = vsub.f32 1.0, %v1763_v12  ;;  %v1765_v22 = vmax.f32 %v3529_v15, 0.0  ;;  %3542 = vtanh.f32 %v748_v3  ;;  %v763_v14 = vmul.f32 0.5, %v251_v0  ;;  %v254_v15 = vld [vmem:[#allocation2 + $0x728] sm:$0xff] }
  0xdd   :  { %v3533_v25 = vpop.eup %3532  ;;  %2786 = vst [vmem:[#allocation5 + $0x648] sm:$0xff] %v2274_v16  ;;  %v2276_v26 = vsub.f32 1.0, %v1764_v17  ;;  %v1766_v27 = vmax.f32 %v3531_v20, 0.0  ;;  %3544 = vtanh.f32 %v749_v8  ;;  %v764_v19 = vmul.f32 0.5, %v252_v5  ;;  %v255_v20 = vld [vmem:[#allocation2 + $0x730] sm:$0xff] }
  0xde   :  { %v3535_v30 = vpop.eup %3534  ;;  %2787 = vst [vmem:[#allocation5 + $0x650] sm:$0xff] %v2275_v21  ;;  %v2277_v31 = vsub.f32 1.0, %v1765_v22  ;;  %v1767_v32 = vmax.f32 %v3533_v25, 0.0  ;;  %3546 = vtanh.f32 %v750_v13  ;;  %v765_v24 = vmul.f32 0.5, %v253_v10  ;;  %v256_v25 = vld [vmem:[#allocation2 + $0x738] sm:$0xff] }
  0xdf   :  { %v3537_v35 = vpop.eup %3536  ;;  %2788 = vst [vmem:[#allocation5 + $0x658] sm:$0xff] %v2276_v26  ;;  %v2278_v36 = vsub.f32 1.0, %v1766_v27  ;;  %v1768_v37 = vmax.f32 %v3535_v30, 0.0  ;;  %3548 = vtanh.f32 %v751_v18  ;;  %v766_v29 = vmul.f32 0.5, %v254_v15  ;;  %v257_v30 = vld [vmem:[#allocation2 + $0x740] sm:$0xff] }
  0xe0   :  { %v3539_v40 = vpop.eup %3538  ;;  %2789 = vst [vmem:[#allocation5 + $0x660] sm:$0xff] %v2277_v31  ;;  %v2279_v41 = vsub.f32 1.0, %v1767_v32  ;;  %v1769_v42 = vmax.f32 %v3537_v35, 0.0  ;;  %3550 = vtanh.f32 %v752_v23  ;;  %v767_v34 = vmul.f32 0.5, %v255_v20  ;;  %v258_v35 = vld [vmem:[#allocation2 + $0x748] sm:$0xff] }
  0xe1   :  { %v3541_v45 = vpop.eup %3540  ;;  %2790 = vst [vmem:[#allocation5 + $0x668] sm:$0xff] %v2278_v36  ;;  %v2280_v46 = vsub.f32 1.0, %v1768_v37  ;;  %v1770_v47 = vmax.f32 %v3539_v40, 0.0  ;;  %3552 = vtanh.f32 %v753_v28  ;;  %v768_v39 = vmul.f32 0.5, %v256_v25  ;;  %v259_v40 = vld [vmem:[#allocation2 + $0x750] sm:$0xff] }
  0xe2   :  { %v3543_v50 = vpop.eup %3542  ;;  %2791 = vst [vmem:[#allocation5 + $0x670] sm:$0xff] %v2279_v41  ;;  %v2281_v51 = vsub.f32 1.0, %v1769_v42  ;;  %v1771_v52 = vmax.f32 %v3541_v45, 0.0  ;;  %3554 = vtanh.f32 %v754_v33  ;;  %v769_v44 = vmul.f32 0.5, %v257_v30  ;;  %v260_v45 = vld [vmem:[#allocation2 + $0x758] sm:$0xff] }
  0xe3   :  { %v3545_v55 = vpop.eup %3544  ;;  %2792 = vst [vmem:[#allocation5 + $0x678] sm:$0xff] %v2280_v46  ;;  %v2282_v56 = vsub.f32 1.0, %v1770_v47  ;;  %v1772_v57 = vmax.f32 %v3543_v50, 0.0  ;;  %3556 = vtanh.f32 %v755_v38  ;;  %v770_v49 = vmul.f32 0.5, %v258_v35  ;;  %v261_v50 = vld [vmem:[#allocation2 + $0x760] sm:$0xff] }
  0xe4   :  { %v3547_v60 = vpop.eup %3546  ;;  %2793 = vst [vmem:[#allocation5 + $0x680] sm:$0xff] %v2281_v51  ;;  %v2283_v61 = vsub.f32 1.0, %v1771_v52  ;;  %v1773_v62 = vmax.f32 %v3545_v55, 0.0  ;;  %3558 = vtanh.f32 %v756_v43  ;;  %v771_v54 = vmul.f32 0.5, %v259_v40  ;;  %v262_v55 = vld [vmem:[#allocation2 + $0x768] sm:$0xff] }
  0xe5   :  { %v3549_v1 = vpop.eup %3548  ;;  %2794 = vst [vmem:[#allocation5 + $0x688] sm:$0xff] %v2282_v56  ;;  %v2284_v2 = vsub.f32 1.0, %v1772_v57  ;;  %v1774_v3 = vmax.f32 %v3547_v60, 0.0  ;;  %3560 = vtanh.f32 %v757_v48  ;;  %v772_v59 = vmul.f32 0.5, %v260_v45  ;;  %v263_v60 = vld [vmem:[#allocation2 + $0x770] sm:$0xff] }
  0xe6   :  { %v3551_v6 = vpop.eup %3550  ;;  %2795 = vst [vmem:[#allocation5 + $0x690] sm:$0xff] %v2283_v61  ;;  %v2285_v7 = vsub.f32 1.0, %v1773_v62  ;;  %v1775_v8 = vmax.f32 %v3549_v1, 0.0  ;;  %3562 = vtanh.f32 %v758_v53  ;;  %v773_v0 = vmul.f32 0.5, %v261_v50  ;;  %v264_v1 = vld [vmem:[#allocation2 + $0x778] sm:$0xff] }
  0xe7   :  { %v3553_v11 = vpop.eup %3552  ;;  %2796 = vst [vmem:[#allocation5 + $0x698] sm:$0xff] %v2284_v2  ;;  %v2286_v12 = vsub.f32 1.0, %v1774_v3  ;;  %v1776_v13 = vmax.f32 %v3551_v6, 0.0  ;;  %3564 = vtanh.f32 %v759_v58  ;;  %v774_v5 = vmul.f32 0.5, %v262_v55  ;;  %v265_v6 = vld [vmem:[#allocation2 + $0x780] sm:$0xff] }
  0xe8   :  { %v3555_v16 = vpop.eup %3554  ;;  %2797 = vst [vmem:[#allocation5 + $0x6a0] sm:$0xff] %v2285_v7  ;;  %v2287_v17 = vsub.f32 1.0, %v1775_v8  ;;  %v1777_v18 = vmax.f32 %v3553_v11, 0.0  ;;  %3566 = vtanh.f32 %v760_v63  ;;  %v775_v10 = vmul.f32 0.5, %v263_v60  ;;  %v266_v11 = vld [vmem:[#allocation2 + $0x788] sm:$0xff] }
  0xe9   :  { %v3557_v21 = vpop.eup %3556  ;;  %2798 = vst [vmem:[#allocation5 + $0x6a8] sm:$0xff] %v2286_v12  ;;  %v2288_v22 = vsub.f32 1.0, %v1776_v13  ;;  %v1778_v23 = vmax.f32 %v3555_v16, 0.0  ;;  %3568 = vtanh.f32 %v761_v4  ;;  %v776_v15 = vmul.f32 0.5, %v264_v1  ;;  %v267_v16 = vld [vmem:[#allocation2 + $0x790] sm:$0xff] }
  0xea   :  { %v3559_v26 = vpop.eup %3558  ;;  %2799 = vst [vmem:[#allocation5 + $0x6b0] sm:$0xff] %v2287_v17  ;;  %v2289_v27 = vsub.f32 1.0, %v1777_v18  ;;  %v1779_v28 = vmax.f32 %v3557_v21, 0.0  ;;  %3570 = vtanh.f32 %v762_v9  ;;  %v777_v20 = vmul.f32 0.5, %v265_v6  ;;  %v268_v21 = vld [vmem:[#allocation2 + $0x798] sm:$0xff] }
  0xeb   :  { %v3561_v31 = vpop.eup %3560  ;;  %2800 = vst [vmem:[#allocation5 + $0x6b8] sm:$0xff] %v2288_v22  ;;  %v2290_v32 = vsub.f32 1.0, %v1778_v23  ;;  %v1780_v33 = vmax.f32 %v3559_v26, 0.0  ;;  %3572 = vtanh.f32 %v763_v14  ;;  %v778_v25 = vmul.f32 0.5, %v266_v11  ;;  %v269_v26 = vld [vmem:[#allocation2 + $0x7a0] sm:$0xff] }
  0xec   :  { %v3563_v36 = vpop.eup %3562  ;;  %2801 = vst [vmem:[#allocation5 + $0x6c0] sm:$0xff] %v2289_v27  ;;  %v2291_v37 = vsub.f32 1.0, %v1779_v28  ;;  %v1781_v38 = vmax.f32 %v3561_v31, 0.0  ;;  %3574 = vtanh.f32 %v764_v19  ;;  %v779_v30 = vmul.f32 0.5, %v267_v16  ;;  %v270_v31 = vld [vmem:[#allocation2 + $0x7a8] sm:$0xff] }
  0xed   :  { %v3565_v41 = vpop.eup %3564  ;;  %2802 = vst [vmem:[#allocation5 + $0x6c8] sm:$0xff] %v2290_v32  ;;  %v2292_v42 = vsub.f32 1.0, %v1780_v33  ;;  %v1782_v43 = vmax.f32 %v3563_v36, 0.0  ;;  %3576 = vtanh.f32 %v765_v24  ;;  %v780_v35 = vmul.f32 0.5, %v268_v21  ;;  %v271_v36 = vld [vmem:[#allocation2 + $0x7b0] sm:$0xff] }
  0xee   :  { %v3567_v46 = vpop.eup %3566  ;;  %2803 = vst [vmem:[#allocation5 + $0x6d0] sm:$0xff] %v2291_v37  ;;  %v2293_v47 = vsub.f32 1.0, %v1781_v38  ;;  %v1783_v48 = vmax.f32 %v3565_v41, 0.0  ;;  %3578 = vtanh.f32 %v766_v29  ;;  %v781_v40 = vmul.f32 0.5, %v269_v26  ;;  %v272_v41 = vld [vmem:[#allocation2 + $0x7b8] sm:$0xff] }
  0xef   :  { %v3569_v51 = vpop.eup %3568  ;;  %2804 = vst [vmem:[#allocation5 + $0x6d8] sm:$0xff] %v2292_v42  ;;  %v2294_v52 = vsub.f32 1.0, %v1782_v43  ;;  %v1784_v53 = vmax.f32 %v3567_v46, 0.0  ;;  %3580 = vtanh.f32 %v767_v34  ;;  %v782_v45 = vmul.f32 0.5, %v270_v31  ;;  %v273_v46 = vld [vmem:[#allocation2 + $0x7c0] sm:$0xff] }
  0xf0   :  { %v3571_v56 = vpop.eup %3570  ;;  %2805 = vst [vmem:[#allocation5 + $0x6e0] sm:$0xff] %v2293_v47  ;;  %v2295_v57 = vsub.f32 1.0, %v1783_v48  ;;  %v1785_v58 = vmax.f32 %v3569_v51, 0.0  ;;  %3582 = vtanh.f32 %v768_v39  ;;  %v783_v50 = vmul.f32 0.5, %v271_v36  ;;  %v274_v51 = vld [vmem:[#allocation2 + $0x7c8] sm:$0xff] }
  0xf1   :  { %v3573_v61 = vpop.eup %3572  ;;  %2806 = vst [vmem:[#allocation5 + $0x6e8] sm:$0xff] %v2294_v52  ;;  %v2296_v62 = vsub.f32 1.0, %v1784_v53  ;;  %v1786_v63 = vmax.f32 %v3571_v56, 0.0  ;;  %3584 = vtanh.f32 %v769_v44  ;;  %v784_v55 = vmul.f32 0.5, %v272_v41  ;;  %v275_v56 = vld [vmem:[#allocation2 + $0x7d0] sm:$0xff] }
  0xf2   :  { %v3575_v2 = vpop.eup %3574  ;;  %2807 = vst [vmem:[#allocation5 + $0x6f0] sm:$0xff] %v2295_v57  ;;  %v2297_v3 = vsub.f32 1.0, %v1785_v58  ;;  %v1787_v4 = vmax.f32 %v3573_v61, 0.0  ;;  %3586 = vtanh.f32 %v770_v49  ;;  %v785_v60 = vmul.f32 0.5, %v273_v46  ;;  %v276_v61 = vld [vmem:[#allocation2 + $0x7d8] sm:$0xff] }
  0xf3   :  { %v3577_v7 = vpop.eup %3576  ;;  %2808 = vst [vmem:[#allocation5 + $0x6f8] sm:$0xff] %v2296_v62  ;;  %v2298_v8 = vsub.f32 1.0, %v1786_v63  ;;  %v1788_v9 = vmax.f32 %v3575_v2, 0.0  ;;  %3588 = vtanh.f32 %v771_v54  ;;  %v786_v1 = vmul.f32 0.5, %v274_v51  ;;  %v277_v2 = vld [vmem:[#allocation2 + $0x7e0] sm:$0xff] }
  0xf4   :  { %v3579_v12 = vpop.eup %3578  ;;  %2809 = vst [vmem:[#allocation5 + $0x700] sm:$0xff] %v2297_v3  ;;  %v2299_v13 = vsub.f32 1.0, %v1787_v4  ;;  %v1789_v14 = vmax.f32 %v3577_v7, 0.0  ;;  %3590 = vtanh.f32 %v772_v59  ;;  %v787_v6 = vmul.f32 0.5, %v275_v56  ;;  %v278_v7 = vld [vmem:[#allocation2 + $0x7e8] sm:$0xff] }
  0xf5   :  { %v3581_v17 = vpop.eup %3580  ;;  %2810 = vst [vmem:[#allocation5 + $0x708] sm:$0xff] %v2298_v8  ;;  %v2300_v18 = vsub.f32 1.0, %v1788_v9  ;;  %v1790_v19 = vmax.f32 %v3579_v12, 0.0  ;;  %3592 = vtanh.f32 %v773_v0  ;;  %v788_v11 = vmul.f32 0.5, %v276_v61  ;;  %v279_v12 = vld [vmem:[#allocation2 + $0x7f0] sm:$0xff] }
  0xf6   :  { %v3583_v22 = vpop.eup %3582  ;;  %2811 = vst [vmem:[#allocation5 + $0x710] sm:$0xff] %v2299_v13  ;;  %v2301_v23 = vsub.f32 1.0, %v1789_v14  ;;  %v1791_v24 = vmax.f32 %v3581_v17, 0.0  ;;  %3594 = vtanh.f32 %v774_v5  ;;  %v789_v16 = vmul.f32 0.5, %v277_v2  ;;  %v280_v17 = vld [vmem:[#allocation2 + $0x7f8] sm:$0xff] }
  0xf7   :  { %v3585_v27 = vpop.eup %3584  ;;  %2812 = vst [vmem:[#allocation5 + $0x718] sm:$0xff] %v2300_v18  ;;  %v2302_v28 = vsub.f32 1.0, %v1790_v19  ;;  %v1792_v29 = vmax.f32 %v3583_v22, 0.0  ;;  %3596 = vtanh.f32 %v775_v10  ;;  %v790_v21 = vmul.f32 0.5, %v278_v7  ;;  %v281_v22 = vld [vmem:[#allocation2 + $0x800] sm:$0xff] }
  0xf8   :  { %v3587_v32 = vpop.eup %3586  ;;  %2813 = vst [vmem:[#allocation5 + $0x720] sm:$0xff] %v2301_v23  ;;  %v2303_v33 = vsub.f32 1.0, %v1791_v24  ;;  %v1793_v34 = vmax.f32 %v3585_v27, 0.0  ;;  %3598 = vtanh.f32 %v776_v15  ;;  %v791_v26 = vmul.f32 0.5, %v279_v12  ;;  %v282_v27 = vld [vmem:[#allocation2 + $0x808] sm:$0xff] }
  0xf9   :  { %v3589_v37 = vpop.eup %3588  ;;  %2814 = vst [vmem:[#allocation5 + $0x728] sm:$0xff] %v2302_v28  ;;  %v2304_v38 = vsub.f32 1.0, %v1792_v29  ;;  %v1794_v39 = vmax.f32 %v3587_v32, 0.0  ;;  %3600 = vtanh.f32 %v777_v20  ;;  %v792_v31 = vmul.f32 0.5, %v280_v17  ;;  %v283_v32 = vld [vmem:[#allocation2 + $0x810] sm:$0xff] }
  0xfa   :  { %v3591_v42 = vpop.eup %3590  ;;  %2815 = vst [vmem:[#allocation5 + $0x730] sm:$0xff] %v2303_v33  ;;  %v2305_v43 = vsub.f32 1.0, %v1793_v34  ;;  %v1795_v44 = vmax.f32 %v3589_v37, 0.0  ;;  %3602 = vtanh.f32 %v778_v25  ;;  %v793_v36 = vmul.f32 0.5, %v281_v22  ;;  %v284_v37 = vld [vmem:[#allocation2 + $0x818] sm:$0xff] }
  0xfb   :  { %v3593_v47 = vpop.eup %3592  ;;  %2816 = vst [vmem:[#allocation5 + $0x738] sm:$0xff] %v2304_v38  ;;  %v2306_v48 = vsub.f32 1.0, %v1794_v39  ;;  %v1796_v49 = vmax.f32 %v3591_v42, 0.0  ;;  %3604 = vtanh.f32 %v779_v30  ;;  %v794_v41 = vmul.f32 0.5, %v282_v27  ;;  %v285_v42 = vld [vmem:[#allocation2 + $0x820] sm:$0xff] }
  0xfc   :  { %v3595_v52 = vpop.eup %3594  ;;  %2817 = vst [vmem:[#allocation5 + $0x740] sm:$0xff] %v2305_v43  ;;  %v2307_v53 = vsub.f32 1.0, %v1795_v44  ;;  %v1797_v54 = vmax.f32 %v3593_v47, 0.0  ;;  %3606 = vtanh.f32 %v780_v35  ;;  %v795_v46 = vmul.f32 0.5, %v283_v32  ;;  %v286_v47 = vld [vmem:[#allocation2 + $0x828] sm:$0xff] }
  0xfd   :  { %v3597_v57 = vpop.eup %3596  ;;  %2818 = vst [vmem:[#allocation5 + $0x748] sm:$0xff] %v2306_v48  ;;  %v2308_v58 = vsub.f32 1.0, %v1796_v49  ;;  %v1798_v59 = vmax.f32 %v3595_v52, 0.0  ;;  %3608 = vtanh.f32 %v781_v40  ;;  %v796_v51 = vmul.f32 0.5, %v284_v37  ;;  %v287_v52 = vld [vmem:[#allocation2 + $0x830] sm:$0xff] }
  0xfe   :  { %v3599_v62 = vpop.eup %3598  ;;  %2819 = vst [vmem:[#allocation5 + $0x750] sm:$0xff] %v2307_v53  ;;  %v2309_v63 = vsub.f32 1.0, %v1797_v54  ;;  %v1799_v0 = vmax.f32 %v3597_v57, 0.0  ;;  %3610 = vtanh.f32 %v782_v45  ;;  %v797_v56 = vmul.f32 0.5, %v285_v42  ;;  %v288_v57 = vld [vmem:[#allocation2 + $0x838] sm:$0xff] }
  0xff   :  { %v3601_v3 = vpop.eup %3600  ;;  %2820 = vst [vmem:[#allocation5 + $0x758] sm:$0xff] %v2308_v58  ;;  %v2310_v4 = vsub.f32 1.0, %v1798_v59  ;;  %v1800_v5 = vmax.f32 %v3599_v62, 0.0  ;;  %3612 = vtanh.f32 %v783_v50  ;;  %v798_v61 = vmul.f32 0.5, %v286_v47  ;;  %v289_v62 = vld [vmem:[#allocation2 + $0x840] sm:$0xff] }
 0x100   :  { %v3603_v8 = vpop.eup %3602  ;;  %2821 = vst [vmem:[#allocation5 + $0x760] sm:$0xff] %v2309_v63  ;;  %v2311_v9 = vsub.f32 1.0, %v1799_v0  ;;  %v1801_v10 = vmax.f32 %v3601_v3, 0.0  ;;  %3614 = vtanh.f32 %v784_v55  ;;  %v799_v2 = vmul.f32 0.5, %v287_v52  ;;  %v290_v3 = vld [vmem:[#allocation2 + $0x848] sm:$0xff] }
 0x101   :  { %v3605_v13 = vpop.eup %3604  ;;  %2822 = vst [vmem:[#allocation5 + $0x768] sm:$0xff] %v2310_v4  ;;  %v2312_v14 = vsub.f32 1.0, %v1800_v5  ;;  %v1802_v15 = vmax.f32 %v3603_v8, 0.0  ;;  %3616 = vtanh.f32 %v785_v60  ;;  %v800_v7 = vmul.f32 0.5, %v288_v57  ;;  %v291_v8 = vld [vmem:[#allocation2 + $0x850] sm:$0xff] }
 0x102   :  { %v3607_v18 = vpop.eup %3606  ;;  %2823 = vst [vmem:[#allocation5 + $0x770] sm:$0xff] %v2311_v9  ;;  %v2313_v19 = vsub.f32 1.0, %v1801_v10  ;;  %v1803_v20 = vmax.f32 %v3605_v13, 0.0  ;;  %3618 = vtanh.f32 %v786_v1  ;;  %v801_v12 = vmul.f32 0.5, %v289_v62  ;;  %v292_v13 = vld [vmem:[#allocation2 + $0x858] sm:$0xff] }
 0x103   :  { %v3609_v23 = vpop.eup %3608  ;;  %2824 = vst [vmem:[#allocation5 + $0x778] sm:$0xff] %v2312_v14  ;;  %v2314_v24 = vsub.f32 1.0, %v1802_v15  ;;  %v1804_v25 = vmax.f32 %v3607_v18, 0.0  ;;  %3620 = vtanh.f32 %v787_v6  ;;  %v802_v17 = vmul.f32 0.5, %v290_v3  ;;  %v293_v18 = vld [vmem:[#allocation2 + $0x860] sm:$0xff] }
 0x104   :  { %v3611_v28 = vpop.eup %3610  ;;  %2825 = vst [vmem:[#allocation5 + $0x780] sm:$0xff] %v2313_v19  ;;  %v2315_v29 = vsub.f32 1.0, %v1803_v20  ;;  %v1805_v30 = vmax.f32 %v3609_v23, 0.0  ;;  %3622 = vtanh.f32 %v788_v11  ;;  %v803_v22 = vmul.f32 0.5, %v291_v8  ;;  %v294_v23 = vld [vmem:[#allocation2 + $0x868] sm:$0xff] }
 0x105   :  { %v3613_v33 = vpop.eup %3612  ;;  %2826 = vst [vmem:[#allocation5 + $0x788] sm:$0xff] %v2314_v24  ;;  %v2316_v34 = vsub.f32 1.0, %v1804_v25  ;;  %v1806_v35 = vmax.f32 %v3611_v28, 0.0  ;;  %3624 = vtanh.f32 %v789_v16  ;;  %v804_v27 = vmul.f32 0.5, %v292_v13  ;;  %v295_v28 = vld [vmem:[#allocation2 + $0x870] sm:$0xff] }
 0x106   :  { %v3615_v38 = vpop.eup %3614  ;;  %2827 = vst [vmem:[#allocation5 + $0x790] sm:$0xff] %v2315_v29  ;;  %v2317_v39 = vsub.f32 1.0, %v1805_v30  ;;  %v1807_v40 = vmax.f32 %v3613_v33, 0.0  ;;  %3626 = vtanh.f32 %v790_v21  ;;  %v805_v32 = vmul.f32 0.5, %v293_v18  ;;  %v296_v33 = vld [vmem:[#allocation2 + $0x878] sm:$0xff] }
 0x107   :  { %v3617_v43 = vpop.eup %3616  ;;  %2828 = vst [vmem:[#allocation5 + $0x798] sm:$0xff] %v2316_v34  ;;  %v2318_v44 = vsub.f32 1.0, %v1806_v35  ;;  %v1808_v45 = vmax.f32 %v3615_v38, 0.0  ;;  %3628 = vtanh.f32 %v791_v26  ;;  %v806_v37 = vmul.f32 0.5, %v294_v23  ;;  %v297_v38 = vld [vmem:[#allocation2 + $0x880] sm:$0xff] }
 0x108   :  { %v3619_v48 = vpop.eup %3618  ;;  %2829 = vst [vmem:[#allocation5 + $0x7a0] sm:$0xff] %v2317_v39  ;;  %v2319_v49 = vsub.f32 1.0, %v1807_v40  ;;  %v1809_v50 = vmax.f32 %v3617_v43, 0.0  ;;  %3630 = vtanh.f32 %v792_v31  ;;  %v807_v42 = vmul.f32 0.5, %v295_v28  ;;  %v298_v43 = vld [vmem:[#allocation2 + $0x888] sm:$0xff] }
 0x109   :  { %v3621_v53 = vpop.eup %3620  ;;  %2830 = vst [vmem:[#allocation5 + $0x7a8] sm:$0xff] %v2318_v44  ;;  %v2320_v54 = vsub.f32 1.0, %v1808_v45  ;;  %v1810_v55 = vmax.f32 %v3619_v48, 0.0  ;;  %3632 = vtanh.f32 %v793_v36  ;;  %v808_v47 = vmul.f32 0.5, %v296_v33  ;;  %v299_v48 = vld [vmem:[#allocation2 + $0x890] sm:$0xff] }
 0x10a   :  { %v3623_v58 = vpop.eup %3622  ;;  %2831 = vst [vmem:[#allocation5 + $0x7b0] sm:$0xff] %v2319_v49  ;;  %v2321_v59 = vsub.f32 1.0, %v1809_v50  ;;  %v1811_v60 = vmax.f32 %v3621_v53, 0.0  ;;  %3634 = vtanh.f32 %v794_v41  ;;  %v809_v52 = vmul.f32 0.5, %v297_v38  ;;  %v300_v53 = vld [vmem:[#allocation2 + $0x898] sm:$0xff] }
 0x10b   :  { %v3625_v63 = vpop.eup %3624  ;;  %2832 = vst [vmem:[#allocation5 + $0x7b8] sm:$0xff] %v2320_v54  ;;  %v2322_v0 = vsub.f32 1.0, %v1810_v55  ;;  %v1812_v1 = vmax.f32 %v3623_v58, 0.0  ;;  %3636 = vtanh.f32 %v795_v46  ;;  %v810_v57 = vmul.f32 0.5, %v298_v43  ;;  %v301_v58 = vld [vmem:[#allocation2 + $0x8a0] sm:$0xff] }
 0x10c   :  { %v3627_v4 = vpop.eup %3626  ;;  %2833 = vst [vmem:[#allocation5 + $0x7c0] sm:$0xff] %v2321_v59  ;;  %v2323_v5 = vsub.f32 1.0, %v1811_v60  ;;  %v1813_v6 = vmax.f32 %v3625_v63, 0.0  ;;  %3638 = vtanh.f32 %v796_v51  ;;  %v811_v62 = vmul.f32 0.5, %v299_v48  ;;  %v302_v63 = vld [vmem:[#allocation2 + $0x8a8] sm:$0xff] }
 0x10d   :  { %v3629_v9 = vpop.eup %3628  ;;  %2834 = vst [vmem:[#allocation5 + $0x7c8] sm:$0xff] %v2322_v0  ;;  %v2324_v10 = vsub.f32 1.0, %v1812_v1  ;;  %v1814_v11 = vmax.f32 %v3627_v4, 0.0  ;;  %3640 = vtanh.f32 %v797_v56  ;;  %v812_v3 = vmul.f32 0.5, %v300_v53  ;;  %v303_v4 = vld [vmem:[#allocation2 + $0x8b0] sm:$0xff] }
 0x10e   :  { %v3631_v14 = vpop.eup %3630  ;;  %2835 = vst [vmem:[#allocation5 + $0x7d0] sm:$0xff] %v2323_v5  ;;  %v2325_v15 = vsub.f32 1.0, %v1813_v6  ;;  %v1815_v16 = vmax.f32 %v3629_v9, 0.0  ;;  %3642 = vtanh.f32 %v798_v61  ;;  %v813_v8 = vmul.f32 0.5, %v301_v58  ;;  %v304_v9 = vld [vmem:[#allocation2 + $0x8b8] sm:$0xff] }
 0x10f   :  { %v3633_v19 = vpop.eup %3632  ;;  %2836 = vst [vmem:[#allocation5 + $0x7d8] sm:$0xff] %v2324_v10  ;;  %v2326_v20 = vsub.f32 1.0, %v1814_v11  ;;  %v1816_v21 = vmax.f32 %v3631_v14, 0.0  ;;  %3644 = vtanh.f32 %v799_v2  ;;  %v814_v13 = vmul.f32 0.5, %v302_v63  ;;  %v305_v14 = vld [vmem:[#allocation2 + $0x8c0] sm:$0xff] }
 0x110   :  { %v3635_v24 = vpop.eup %3634  ;;  %2837 = vst [vmem:[#allocation5 + $0x7e0] sm:$0xff] %v2325_v15  ;;  %v2327_v25 = vsub.f32 1.0, %v1815_v16  ;;  %v1817_v26 = vmax.f32 %v3633_v19, 0.0  ;;  %3646 = vtanh.f32 %v800_v7  ;;  %v815_v18 = vmul.f32 0.5, %v303_v4  ;;  %v306_v19 = vld [vmem:[#allocation2 + $0x8c8] sm:$0xff] }
 0x111   :  { %v3637_v29 = vpop.eup %3636  ;;  %2838 = vst [vmem:[#allocation5 + $0x7e8] sm:$0xff] %v2326_v20  ;;  %v2328_v30 = vsub.f32 1.0, %v1816_v21  ;;  %v1818_v31 = vmax.f32 %v3635_v24, 0.0  ;;  %3648 = vtanh.f32 %v801_v12  ;;  %v816_v23 = vmul.f32 0.5, %v304_v9  ;;  %v307_v24 = vld [vmem:[#allocation2 + $0x8d0] sm:$0xff] }
 0x112   :  { %v3639_v34 = vpop.eup %3638  ;;  %2839 = vst [vmem:[#allocation5 + $0x7f0] sm:$0xff] %v2327_v25  ;;  %v2329_v35 = vsub.f32 1.0, %v1817_v26  ;;  %v1819_v36 = vmax.f32 %v3637_v29, 0.0  ;;  %3650 = vtanh.f32 %v802_v17  ;;  %v817_v28 = vmul.f32 0.5, %v305_v14  ;;  %v308_v29 = vld [vmem:[#allocation2 + $0x8d8] sm:$0xff] }
 0x113   :  { %v3641_v39 = vpop.eup %3640  ;;  %2840 = vst [vmem:[#allocation5 + $0x7f8] sm:$0xff] %v2328_v30  ;;  %v2330_v40 = vsub.f32 1.0, %v1818_v31  ;;  %v1820_v41 = vmax.f32 %v3639_v34, 0.0  ;;  %3652 = vtanh.f32 %v803_v22  ;;  %v818_v33 = vmul.f32 0.5, %v306_v19  ;;  %v309_v34 = vld [vmem:[#allocation2 + $0x8e0] sm:$0xff] }
 0x114   :  { %v3643_v44 = vpop.eup %3642  ;;  %2841 = vst [vmem:[#allocation5 + $0x800] sm:$0xff] %v2329_v35  ;;  %v2331_v45 = vsub.f32 1.0, %v1819_v36  ;;  %v1821_v46 = vmax.f32 %v3641_v39, 0.0  ;;  %3654 = vtanh.f32 %v804_v27  ;;  %v819_v38 = vmul.f32 0.5, %v307_v24  ;;  %v310_v39 = vld [vmem:[#allocation2 + $0x8e8] sm:$0xff] }
 0x115   :  { %v3645_v49 = vpop.eup %3644  ;;  %2842 = vst [vmem:[#allocation5 + $0x808] sm:$0xff] %v2330_v40  ;;  %v2332_v50 = vsub.f32 1.0, %v1820_v41  ;;  %v1822_v51 = vmax.f32 %v3643_v44, 0.0  ;;  %3656 = vtanh.f32 %v805_v32  ;;  %v820_v43 = vmul.f32 0.5, %v308_v29  ;;  %v311_v44 = vld [vmem:[#allocation2 + $0x8f0] sm:$0xff] }
 0x116   :  { %v3647_v54 = vpop.eup %3646  ;;  %2843 = vst [vmem:[#allocation5 + $0x810] sm:$0xff] %v2331_v45  ;;  %v2333_v55 = vsub.f32 1.0, %v1821_v46  ;;  %v1823_v56 = vmax.f32 %v3645_v49, 0.0  ;;  %3658 = vtanh.f32 %v806_v37  ;;  %v821_v48 = vmul.f32 0.5, %v309_v34  ;;  %v312_v49 = vld [vmem:[#allocation2 + $0x8f8] sm:$0xff] }
 0x117   :  { %v3649_v59 = vpop.eup %3648  ;;  %2844 = vst [vmem:[#allocation5 + $0x818] sm:$0xff] %v2332_v50  ;;  %v2334_v60 = vsub.f32 1.0, %v1822_v51  ;;  %v1824_v61 = vmax.f32 %v3647_v54, 0.0  ;;  %3660 = vtanh.f32 %v807_v42  ;;  %v822_v53 = vmul.f32 0.5, %v310_v39  ;;  %v313_v54 = vld [vmem:[#allocation2 + $0x900] sm:$0xff] }
 0x118   :  { %v3651_v0 = vpop.eup %3650  ;;  %2845 = vst [vmem:[#allocation5 + $0x820] sm:$0xff] %v2333_v55  ;;  %v2335_v1 = vsub.f32 1.0, %v1823_v56  ;;  %v1825_v2 = vmax.f32 %v3649_v59, 0.0  ;;  %3662 = vtanh.f32 %v808_v47  ;;  %v823_v58 = vmul.f32 0.5, %v311_v44  ;;  %v314_v59 = vld [vmem:[#allocation2 + $0x908] sm:$0xff] }
 0x119   :  { %v3653_v5 = vpop.eup %3652  ;;  %2846 = vst [vmem:[#allocation5 + $0x828] sm:$0xff] %v2334_v60  ;;  %v2336_v6 = vsub.f32 1.0, %v1824_v61  ;;  %v1826_v7 = vmax.f32 %v3651_v0, 0.0  ;;  %3664 = vtanh.f32 %v809_v52  ;;  %v824_v63 = vmul.f32 0.5, %v312_v49  ;;  %v315_v0 = vld [vmem:[#allocation2 + $0x910] sm:$0xff] }
 0x11a   :  { %v3655_v10 = vpop.eup %3654  ;;  %2847 = vst [vmem:[#allocation5 + $0x830] sm:$0xff] %v2335_v1  ;;  %v2337_v11 = vsub.f32 1.0, %v1825_v2  ;;  %v1827_v12 = vmax.f32 %v3653_v5, 0.0  ;;  %3666 = vtanh.f32 %v810_v57  ;;  %v825_v4 = vmul.f32 0.5, %v313_v54  ;;  %v316_v5 = vld [vmem:[#allocation2 + $0x918] sm:$0xff] }
 0x11b   :  { %v3657_v15 = vpop.eup %3656  ;;  %2848 = vst [vmem:[#allocation5 + $0x838] sm:$0xff] %v2336_v6  ;;  %v2338_v16 = vsub.f32 1.0, %v1826_v7  ;;  %v1828_v17 = vmax.f32 %v3655_v10, 0.0  ;;  %3668 = vtanh.f32 %v811_v62  ;;  %v826_v9 = vmul.f32 0.5, %v314_v59  ;;  %v317_v10 = vld [vmem:[#allocation2 + $0x920] sm:$0xff] }
 0x11c   :  { %v3659_v20 = vpop.eup %3658  ;;  %2849 = vst [vmem:[#allocation5 + $0x840] sm:$0xff] %v2337_v11  ;;  %v2339_v21 = vsub.f32 1.0, %v1827_v12  ;;  %v1829_v22 = vmax.f32 %v3657_v15, 0.0  ;;  %3670 = vtanh.f32 %v812_v3  ;;  %v827_v14 = vmul.f32 0.5, %v315_v0  ;;  %v318_v15 = vld [vmem:[#allocation2 + $0x928] sm:$0xff] }
 0x11d   :  { %v3661_v25 = vpop.eup %3660  ;;  %2850 = vst [vmem:[#allocation5 + $0x848] sm:$0xff] %v2338_v16  ;;  %v2340_v26 = vsub.f32 1.0, %v1828_v17  ;;  %v1830_v27 = vmax.f32 %v3659_v20, 0.0  ;;  %3672 = vtanh.f32 %v813_v8  ;;  %v828_v19 = vmul.f32 0.5, %v316_v5  ;;  %v319_v20 = vld [vmem:[#allocation2 + $0x930] sm:$0xff] }
 0x11e   :  { %v3663_v30 = vpop.eup %3662  ;;  %2851 = vst [vmem:[#allocation5 + $0x850] sm:$0xff] %v2339_v21  ;;  %v2341_v31 = vsub.f32 1.0, %v1829_v22  ;;  %v1831_v32 = vmax.f32 %v3661_v25, 0.0  ;;  %3674 = vtanh.f32 %v814_v13  ;;  %v829_v24 = vmul.f32 0.5, %v317_v10  ;;  %v320_v25 = vld [vmem:[#allocation2 + $0x938] sm:$0xff] }
 0x11f   :  { %v3665_v35 = vpop.eup %3664  ;;  %2852 = vst [vmem:[#allocation5 + $0x858] sm:$0xff] %v2340_v26  ;;  %v2342_v36 = vsub.f32 1.0, %v1830_v27  ;;  %v1832_v37 = vmax.f32 %v3663_v30, 0.0  ;;  %3676 = vtanh.f32 %v815_v18  ;;  %v830_v29 = vmul.f32 0.5, %v318_v15  ;;  %v321_v30 = vld [vmem:[#allocation2 + $0x940] sm:$0xff] }
 0x120   :  { %v3667_v40 = vpop.eup %3666  ;;  %2853 = vst [vmem:[#allocation5 + $0x860] sm:$0xff] %v2341_v31  ;;  %v2343_v41 = vsub.f32 1.0, %v1831_v32  ;;  %v1833_v42 = vmax.f32 %v3665_v35, 0.0  ;;  %3678 = vtanh.f32 %v816_v23  ;;  %v831_v34 = vmul.f32 0.5, %v319_v20  ;;  %v322_v35 = vld [vmem:[#allocation2 + $0x948] sm:$0xff] }
 0x121   :  { %v3669_v45 = vpop.eup %3668  ;;  %2854 = vst [vmem:[#allocation5 + $0x868] sm:$0xff] %v2342_v36  ;;  %v2344_v46 = vsub.f32 1.0, %v1832_v37  ;;  %v1834_v47 = vmax.f32 %v3667_v40, 0.0  ;;  %3680 = vtanh.f32 %v817_v28  ;;  %v832_v39 = vmul.f32 0.5, %v320_v25  ;;  %v323_v40 = vld [vmem:[#allocation2 + $0x950] sm:$0xff] }
 0x122   :  { %v3671_v50 = vpop.eup %3670  ;;  %2855 = vst [vmem:[#allocation5 + $0x870] sm:$0xff] %v2343_v41  ;;  %v2345_v51 = vsub.f32 1.0, %v1833_v42  ;;  %v1835_v52 = vmax.f32 %v3669_v45, 0.0  ;;  %3682 = vtanh.f32 %v818_v33  ;;  %v833_v44 = vmul.f32 0.5, %v321_v30  ;;  %v324_v45 = vld [vmem:[#allocation2 + $0x958] sm:$0xff] }
 0x123   :  { %v3673_v55 = vpop.eup %3672  ;;  %2856 = vst [vmem:[#allocation5 + $0x878] sm:$0xff] %v2344_v46  ;;  %v2346_v56 = vsub.f32 1.0, %v1834_v47  ;;  %v1836_v57 = vmax.f32 %v3671_v50, 0.0  ;;  %3684 = vtanh.f32 %v819_v38  ;;  %v834_v49 = vmul.f32 0.5, %v322_v35  ;;  %v325_v50 = vld [vmem:[#allocation2 + $0x960] sm:$0xff] }
 0x124   :  { %v3675_v60 = vpop.eup %3674  ;;  %2857 = vst [vmem:[#allocation5 + $0x880] sm:$0xff] %v2345_v51  ;;  %v2347_v61 = vsub.f32 1.0, %v1835_v52  ;;  %v1837_v62 = vmax.f32 %v3673_v55, 0.0  ;;  %3686 = vtanh.f32 %v820_v43  ;;  %v835_v54 = vmul.f32 0.5, %v323_v40  ;;  %v326_v55 = vld [vmem:[#allocation2 + $0x968] sm:$0xff] }
 0x125   :  { %v3677_v1 = vpop.eup %3676  ;;  %2858 = vst [vmem:[#allocation5 + $0x888] sm:$0xff] %v2346_v56  ;;  %v2348_v2 = vsub.f32 1.0, %v1836_v57  ;;  %v1838_v3 = vmax.f32 %v3675_v60, 0.0  ;;  %3688 = vtanh.f32 %v821_v48  ;;  %v836_v59 = vmul.f32 0.5, %v324_v45  ;;  %v327_v60 = vld [vmem:[#allocation2 + $0x970] sm:$0xff] }
 0x126   :  { %v3679_v6 = vpop.eup %3678  ;;  %2859 = vst [vmem:[#allocation5 + $0x890] sm:$0xff] %v2347_v61  ;;  %v2349_v7 = vsub.f32 1.0, %v1837_v62  ;;  %v1839_v8 = vmax.f32 %v3677_v1, 0.0  ;;  %3690 = vtanh.f32 %v822_v53  ;;  %v837_v0 = vmul.f32 0.5, %v325_v50  ;;  %v328_v1 = vld [vmem:[#allocation2 + $0x978] sm:$0xff] }
 0x127   :  { %v3681_v11 = vpop.eup %3680  ;;  %2860 = vst [vmem:[#allocation5 + $0x898] sm:$0xff] %v2348_v2  ;;  %v2350_v12 = vsub.f32 1.0, %v1838_v3  ;;  %v1840_v13 = vmax.f32 %v3679_v6, 0.0  ;;  %3692 = vtanh.f32 %v823_v58  ;;  %v838_v5 = vmul.f32 0.5, %v326_v55  ;;  %v329_v6 = vld [vmem:[#allocation2 + $0x980] sm:$0xff] }
 0x128   :  { %v3683_v16 = vpop.eup %3682  ;;  %2861 = vst [vmem:[#allocation5 + $0x8a0] sm:$0xff] %v2349_v7  ;;  %v2351_v17 = vsub.f32 1.0, %v1839_v8  ;;  %v1841_v18 = vmax.f32 %v3681_v11, 0.0  ;;  %3694 = vtanh.f32 %v824_v63  ;;  %v839_v10 = vmul.f32 0.5, %v327_v60  ;;  %v330_v11 = vld [vmem:[#allocation2 + $0x988] sm:$0xff] }
 0x129   :  { %v3685_v21 = vpop.eup %3684  ;;  %2862 = vst [vmem:[#allocation5 + $0x8a8] sm:$0xff] %v2350_v12  ;;  %v2352_v22 = vsub.f32 1.0, %v1840_v13  ;;  %v1842_v23 = vmax.f32 %v3683_v16, 0.0  ;;  %3696 = vtanh.f32 %v825_v4  ;;  %v840_v15 = vmul.f32 0.5, %v328_v1  ;;  %v331_v16 = vld [vmem:[#allocation2 + $0x990] sm:$0xff] }
 0x12a   :  { %v3687_v26 = vpop.eup %3686  ;;  %2863 = vst [vmem:[#allocation5 + $0x8b0] sm:$0xff] %v2351_v17  ;;  %v2353_v27 = vsub.f32 1.0, %v1841_v18  ;;  %v1843_v28 = vmax.f32 %v3685_v21, 0.0  ;;  %3698 = vtanh.f32 %v826_v9  ;;  %v841_v20 = vmul.f32 0.5, %v329_v6  ;;  %v332_v21 = vld [vmem:[#allocation2 + $0x998] sm:$0xff] }
 0x12b   :  { %v3689_v31 = vpop.eup %3688  ;;  %2864 = vst [vmem:[#allocation5 + $0x8b8] sm:$0xff] %v2352_v22  ;;  %v2354_v32 = vsub.f32 1.0, %v1842_v23  ;;  %v1844_v33 = vmax.f32 %v3687_v26, 0.0  ;;  %3700 = vtanh.f32 %v827_v14  ;;  %v842_v25 = vmul.f32 0.5, %v330_v11  ;;  %v333_v26 = vld [vmem:[#allocation2 + $0x9a0] sm:$0xff] }
 0x12c   :  { %v3691_v36 = vpop.eup %3690  ;;  %2865 = vst [vmem:[#allocation5 + $0x8c0] sm:$0xff] %v2353_v27  ;;  %v2355_v37 = vsub.f32 1.0, %v1843_v28  ;;  %v1845_v38 = vmax.f32 %v3689_v31, 0.0  ;;  %3702 = vtanh.f32 %v828_v19  ;;  %v843_v30 = vmul.f32 0.5, %v331_v16  ;;  %v334_v31 = vld [vmem:[#allocation2 + $0x9a8] sm:$0xff] }
 0x12d   :  { %v3693_v41 = vpop.eup %3692  ;;  %2866 = vst [vmem:[#allocation5 + $0x8c8] sm:$0xff] %v2354_v32  ;;  %v2356_v42 = vsub.f32 1.0, %v1844_v33  ;;  %v1846_v43 = vmax.f32 %v3691_v36, 0.0  ;;  %3704 = vtanh.f32 %v829_v24  ;;  %v844_v35 = vmul.f32 0.5, %v332_v21  ;;  %v335_v36 = vld [vmem:[#allocation2 + $0x9b0] sm:$0xff] }
 0x12e   :  { %v3695_v46 = vpop.eup %3694  ;;  %2867 = vst [vmem:[#allocation5 + $0x8d0] sm:$0xff] %v2355_v37  ;;  %v2357_v47 = vsub.f32 1.0, %v1845_v38  ;;  %v1847_v48 = vmax.f32 %v3693_v41, 0.0  ;;  %3706 = vtanh.f32 %v830_v29  ;;  %v845_v40 = vmul.f32 0.5, %v333_v26  ;;  %v336_v41 = vld [vmem:[#allocation2 + $0x9b8] sm:$0xff] }
 0x12f   :  { %v3697_v51 = vpop.eup %3696  ;;  %2868 = vst [vmem:[#allocation5 + $0x8d8] sm:$0xff] %v2356_v42  ;;  %v2358_v52 = vsub.f32 1.0, %v1846_v43  ;;  %v1848_v53 = vmax.f32 %v3695_v46, 0.0  ;;  %3708 = vtanh.f32 %v831_v34  ;;  %v846_v45 = vmul.f32 0.5, %v334_v31  ;;  %v337_v46 = vld [vmem:[#allocation2 + $0x9c0] sm:$0xff] }
 0x130   :  { %v3699_v56 = vpop.eup %3698  ;;  %2869 = vst [vmem:[#allocation5 + $0x8e0] sm:$0xff] %v2357_v47  ;;  %v2359_v57 = vsub.f32 1.0, %v1847_v48  ;;  %v1849_v58 = vmax.f32 %v3697_v51, 0.0  ;;  %3710 = vtanh.f32 %v832_v39  ;;  %v847_v50 = vmul.f32 0.5, %v335_v36  ;;  %v338_v51 = vld [vmem:[#allocation2 + $0x9c8] sm:$0xff] }
 0x131   :  { %v3701_v61 = vpop.eup %3700  ;;  %2870 = vst [vmem:[#allocation5 + $0x8e8] sm:$0xff] %v2358_v52  ;;  %v2360_v62 = vsub.f32 1.0, %v1848_v53  ;;  %v1850_v63 = vmax.f32 %v3699_v56, 0.0  ;;  %3712 = vtanh.f32 %v833_v44  ;;  %v848_v55 = vmul.f32 0.5, %v336_v41  ;;  %v339_v56 = vld [vmem:[#allocation2 + $0x9d0] sm:$0xff] }
 0x132   :  { %v3703_v2 = vpop.eup %3702  ;;  %2871 = vst [vmem:[#allocation5 + $0x8f0] sm:$0xff] %v2359_v57  ;;  %v2361_v3 = vsub.f32 1.0, %v1849_v58  ;;  %v1851_v4 = vmax.f32 %v3701_v61, 0.0  ;;  %3714 = vtanh.f32 %v834_v49  ;;  %v849_v60 = vmul.f32 0.5, %v337_v46  ;;  %v340_v61 = vld [vmem:[#allocation2 + $0x9d8] sm:$0xff] }
 0x133   :  { %v3705_v7 = vpop.eup %3704  ;;  %2872 = vst [vmem:[#allocation5 + $0x8f8] sm:$0xff] %v2360_v62  ;;  %v2362_v8 = vsub.f32 1.0, %v1850_v63  ;;  %v1852_v9 = vmax.f32 %v3703_v2, 0.0  ;;  %3716 = vtanh.f32 %v835_v54  ;;  %v850_v1 = vmul.f32 0.5, %v338_v51  ;;  %v341_v2 = vld [vmem:[#allocation2 + $0x9e0] sm:$0xff] }
 0x134   :  { %v3707_v12 = vpop.eup %3706  ;;  %2873 = vst [vmem:[#allocation5 + $0x900] sm:$0xff] %v2361_v3  ;;  %v2363_v13 = vsub.f32 1.0, %v1851_v4  ;;  %v1853_v14 = vmax.f32 %v3705_v7, 0.0  ;;  %3718 = vtanh.f32 %v836_v59  ;;  %v851_v6 = vmul.f32 0.5, %v339_v56  ;;  %v342_v7 = vld [vmem:[#allocation2 + $0x9e8] sm:$0xff] }
 0x135   :  { %v3709_v17 = vpop.eup %3708  ;;  %2874 = vst [vmem:[#allocation5 + $0x908] sm:$0xff] %v2362_v8  ;;  %v2364_v18 = vsub.f32 1.0, %v1852_v9  ;;  %v1854_v19 = vmax.f32 %v3707_v12, 0.0  ;;  %3720 = vtanh.f32 %v837_v0  ;;  %v852_v11 = vmul.f32 0.5, %v340_v61  ;;  %v343_v12 = vld [vmem:[#allocation2 + $0x9f0] sm:$0xff] }
 0x136   :  { %v3711_v22 = vpop.eup %3710  ;;  %2875 = vst [vmem:[#allocation5 + $0x910] sm:$0xff] %v2363_v13  ;;  %v2365_v23 = vsub.f32 1.0, %v1853_v14  ;;  %v1855_v24 = vmax.f32 %v3709_v17, 0.0  ;;  %3722 = vtanh.f32 %v838_v5  ;;  %v853_v16 = vmul.f32 0.5, %v341_v2  ;;  %v344_v17 = vld [vmem:[#allocation2 + $0x9f8] sm:$0xff] }
 0x137   :  { %v3713_v27 = vpop.eup %3712  ;;  %2876 = vst [vmem:[#allocation5 + $0x918] sm:$0xff] %v2364_v18  ;;  %v2366_v28 = vsub.f32 1.0, %v1854_v19  ;;  %v1856_v29 = vmax.f32 %v3711_v22, 0.0  ;;  %3724 = vtanh.f32 %v839_v10  ;;  %v854_v21 = vmul.f32 0.5, %v342_v7  ;;  %v345_v22 = vld [vmem:[#allocation2 + $0xa00] sm:$0xff] }
 0x138   :  { %v3715_v32 = vpop.eup %3714  ;;  %2877 = vst [vmem:[#allocation5 + $0x920] sm:$0xff] %v2365_v23  ;;  %v2367_v33 = vsub.f32 1.0, %v1855_v24  ;;  %v1857_v34 = vmax.f32 %v3713_v27, 0.0  ;;  %3726 = vtanh.f32 %v840_v15  ;;  %v855_v26 = vmul.f32 0.5, %v343_v12  ;;  %v346_v27 = vld [vmem:[#allocation2 + $0xa08] sm:$0xff] }
 0x139   :  { %v3717_v37 = vpop.eup %3716  ;;  %2878 = vst [vmem:[#allocation5 + $0x928] sm:$0xff] %v2366_v28  ;;  %v2368_v38 = vsub.f32 1.0, %v1856_v29  ;;  %v1858_v39 = vmax.f32 %v3715_v32, 0.0  ;;  %3728 = vtanh.f32 %v841_v20  ;;  %v856_v31 = vmul.f32 0.5, %v344_v17  ;;  %v347_v32 = vld [vmem:[#allocation2 + $0xa10] sm:$0xff] }
 0x13a   :  { %v3719_v42 = vpop.eup %3718  ;;  %2879 = vst [vmem:[#allocation5 + $0x930] sm:$0xff] %v2367_v33  ;;  %v2369_v43 = vsub.f32 1.0, %v1857_v34  ;;  %v1859_v44 = vmax.f32 %v3717_v37, 0.0  ;;  %3730 = vtanh.f32 %v842_v25  ;;  %v857_v36 = vmul.f32 0.5, %v345_v22  ;;  %v348_v37 = vld [vmem:[#allocation2 + $0xa18] sm:$0xff] }
 0x13b   :  { %v3721_v47 = vpop.eup %3720  ;;  %2880 = vst [vmem:[#allocation5 + $0x938] sm:$0xff] %v2368_v38  ;;  %v2370_v48 = vsub.f32 1.0, %v1858_v39  ;;  %v1860_v49 = vmax.f32 %v3719_v42, 0.0  ;;  %3732 = vtanh.f32 %v843_v30  ;;  %v858_v41 = vmul.f32 0.5, %v346_v27  ;;  %v349_v42 = vld [vmem:[#allocation2 + $0xa20] sm:$0xff] }
 0x13c   :  { %v3723_v52 = vpop.eup %3722  ;;  %2881 = vst [vmem:[#allocation5 + $0x940] sm:$0xff] %v2369_v43  ;;  %v2371_v53 = vsub.f32 1.0, %v1859_v44  ;;  %v1861_v54 = vmax.f32 %v3721_v47, 0.0  ;;  %3734 = vtanh.f32 %v844_v35  ;;  %v859_v46 = vmul.f32 0.5, %v347_v32  ;;  %v350_v47 = vld [vmem:[#allocation2 + $0xa28] sm:$0xff] }
 0x13d   :  { %v3725_v57 = vpop.eup %3724  ;;  %2882 = vst [vmem:[#allocation5 + $0x948] sm:$0xff] %v2370_v48  ;;  %v2372_v58 = vsub.f32 1.0, %v1860_v49  ;;  %v1862_v59 = vmax.f32 %v3723_v52, 0.0  ;;  %3736 = vtanh.f32 %v845_v40  ;;  %v860_v51 = vmul.f32 0.5, %v348_v37  ;;  %v351_v52 = vld [vmem:[#allocation2 + $0xa30] sm:$0xff] }
 0x13e   :  { %v3727_v62 = vpop.eup %3726  ;;  %2883 = vst [vmem:[#allocation5 + $0x950] sm:$0xff] %v2371_v53  ;;  %v2373_v63 = vsub.f32 1.0, %v1861_v54  ;;  %v1863_v0 = vmax.f32 %v3725_v57, 0.0  ;;  %3738 = vtanh.f32 %v846_v45  ;;  %v861_v56 = vmul.f32 0.5, %v349_v42  ;;  %v352_v57 = vld [vmem:[#allocation2 + $0xa38] sm:$0xff] }
 0x13f   :  { %v3729_v3 = vpop.eup %3728  ;;  %2884 = vst [vmem:[#allocation5 + $0x958] sm:$0xff] %v2372_v58  ;;  %v2374_v4 = vsub.f32 1.0, %v1862_v59  ;;  %v1864_v5 = vmax.f32 %v3727_v62, 0.0  ;;  %3740 = vtanh.f32 %v847_v50  ;;  %v862_v61 = vmul.f32 0.5, %v350_v47  ;;  %v353_v62 = vld [vmem:[#allocation2 + $0xa40] sm:$0xff] }
 0x140   :  { %v3731_v8 = vpop.eup %3730  ;;  %2885 = vst [vmem:[#allocation5 + $0x960] sm:$0xff] %v2373_v63  ;;  %v2375_v9 = vsub.f32 1.0, %v1863_v0  ;;  %v1865_v10 = vmax.f32 %v3729_v3, 0.0  ;;  %3742 = vtanh.f32 %v848_v55  ;;  %v863_v2 = vmul.f32 0.5, %v351_v52  ;;  %v354_v3 = vld [vmem:[#allocation2 + $0xa48] sm:$0xff] }
 0x141   :  { %v3733_v13 = vpop.eup %3732  ;;  %2886 = vst [vmem:[#allocation5 + $0x968] sm:$0xff] %v2374_v4  ;;  %v2376_v14 = vsub.f32 1.0, %v1864_v5  ;;  %v1866_v15 = vmax.f32 %v3731_v8, 0.0  ;;  %3744 = vtanh.f32 %v849_v60  ;;  %v864_v7 = vmul.f32 0.5, %v352_v57  ;;  %v355_v8 = vld [vmem:[#allocation2 + $0xa50] sm:$0xff] }
 0x142   :  { %v3735_v18 = vpop.eup %3734  ;;  %2887 = vst [vmem:[#allocation5 + $0x970] sm:$0xff] %v2375_v9  ;;  %v2377_v19 = vsub.f32 1.0, %v1865_v10  ;;  %v1867_v20 = vmax.f32 %v3733_v13, 0.0  ;;  %3746 = vtanh.f32 %v850_v1  ;;  %v865_v12 = vmul.f32 0.5, %v353_v62  ;;  %v356_v13 = vld [vmem:[#allocation2 + $0xa58] sm:$0xff] }
 0x143   :  { %v3737_v23 = vpop.eup %3736  ;;  %2888 = vst [vmem:[#allocation5 + $0x978] sm:$0xff] %v2376_v14  ;;  %v2378_v24 = vsub.f32 1.0, %v1866_v15  ;;  %v1868_v25 = vmax.f32 %v3735_v18, 0.0  ;;  %3748 = vtanh.f32 %v851_v6  ;;  %v866_v17 = vmul.f32 0.5, %v354_v3  ;;  %v357_v18 = vld [vmem:[#allocation2 + $0xa60] sm:$0xff] }
 0x144   :  { %v3739_v28 = vpop.eup %3738  ;;  %2889 = vst [vmem:[#allocation5 + $0x980] sm:$0xff] %v2377_v19  ;;  %v2379_v29 = vsub.f32 1.0, %v1867_v20  ;;  %v1869_v30 = vmax.f32 %v3737_v23, 0.0  ;;  %3750 = vtanh.f32 %v852_v11  ;;  %v867_v22 = vmul.f32 0.5, %v355_v8  ;;  %v358_v23 = vld [vmem:[#allocation2 + $0xa68] sm:$0xff] }
 0x145   :  { %v3741_v33 = vpop.eup %3740  ;;  %2890 = vst [vmem:[#allocation5 + $0x988] sm:$0xff] %v2378_v24  ;;  %v2380_v34 = vsub.f32 1.0, %v1868_v25  ;;  %v1870_v35 = vmax.f32 %v3739_v28, 0.0  ;;  %3752 = vtanh.f32 %v853_v16  ;;  %v868_v27 = vmul.f32 0.5, %v356_v13  ;;  %v359_v28 = vld [vmem:[#allocation2 + $0xa70] sm:$0xff] }
 0x146   :  { %v3743_v38 = vpop.eup %3742  ;;  %2891 = vst [vmem:[#allocation5 + $0x990] sm:$0xff] %v2379_v29  ;;  %v2381_v39 = vsub.f32 1.0, %v1869_v30  ;;  %v1871_v40 = vmax.f32 %v3741_v33, 0.0  ;;  %3754 = vtanh.f32 %v854_v21  ;;  %v869_v32 = vmul.f32 0.5, %v357_v18  ;;  %v360_v33 = vld [vmem:[#allocation2 + $0xa78] sm:$0xff] }
 0x147   :  { %v3745_v43 = vpop.eup %3744  ;;  %2892 = vst [vmem:[#allocation5 + $0x998] sm:$0xff] %v2380_v34  ;;  %v2382_v44 = vsub.f32 1.0, %v1870_v35  ;;  %v1872_v45 = vmax.f32 %v3743_v38, 0.0  ;;  %3756 = vtanh.f32 %v855_v26  ;;  %v870_v37 = vmul.f32 0.5, %v358_v23  ;;  %v361_v38 = vld [vmem:[#allocation2 + $0xa80] sm:$0xff] }
 0x148   :  { %v3747_v48 = vpop.eup %3746  ;;  %2893 = vst [vmem:[#allocation5 + $0x9a0] sm:$0xff] %v2381_v39  ;;  %v2383_v49 = vsub.f32 1.0, %v1871_v40  ;;  %v1873_v50 = vmax.f32 %v3745_v43, 0.0  ;;  %3758 = vtanh.f32 %v856_v31  ;;  %v871_v42 = vmul.f32 0.5, %v359_v28  ;;  %v362_v43 = vld [vmem:[#allocation2 + $0xa88] sm:$0xff] }
 0x149   :  { %v3749_v53 = vpop.eup %3748  ;;  %2894 = vst [vmem:[#allocation5 + $0x9a8] sm:$0xff] %v2382_v44  ;;  %v2384_v54 = vsub.f32 1.0, %v1872_v45  ;;  %v1874_v55 = vmax.f32 %v3747_v48, 0.0  ;;  %3760 = vtanh.f32 %v857_v36  ;;  %v872_v47 = vmul.f32 0.5, %v360_v33  ;;  %v363_v48 = vld [vmem:[#allocation2 + $0xa90] sm:$0xff] }
 0x14a   :  { %v3751_v58 = vpop.eup %3750  ;;  %2895 = vst [vmem:[#allocation5 + $0x9b0] sm:$0xff] %v2383_v49  ;;  %v2385_v59 = vsub.f32 1.0, %v1873_v50  ;;  %v1875_v60 = vmax.f32 %v3749_v53, 0.0  ;;  %3762 = vtanh.f32 %v858_v41  ;;  %v873_v52 = vmul.f32 0.5, %v361_v38  ;;  %v364_v53 = vld [vmem:[#allocation2 + $0xa98] sm:$0xff] }
 0x14b   :  { %v3753_v63 = vpop.eup %3752  ;;  %2896 = vst [vmem:[#allocation5 + $0x9b8] sm:$0xff] %v2384_v54  ;;  %v2386_v0 = vsub.f32 1.0, %v1874_v55  ;;  %v1876_v1 = vmax.f32 %v3751_v58, 0.0  ;;  %3764 = vtanh.f32 %v859_v46  ;;  %v874_v57 = vmul.f32 0.5, %v362_v43  ;;  %v365_v58 = vld [vmem:[#allocation2 + $0xaa0] sm:$0xff] }
 0x14c   :  { %v3755_v4 = vpop.eup %3754  ;;  %2897 = vst [vmem:[#allocation5 + $0x9c0] sm:$0xff] %v2385_v59  ;;  %v2387_v5 = vsub.f32 1.0, %v1875_v60  ;;  %v1877_v6 = vmax.f32 %v3753_v63, 0.0  ;;  %3766 = vtanh.f32 %v860_v51  ;;  %v875_v62 = vmul.f32 0.5, %v363_v48  ;;  %v366_v63 = vld [vmem:[#allocation2 + $0xaa8] sm:$0xff] }
 0x14d   :  { %v3757_v9 = vpop.eup %3756  ;;  %2898 = vst [vmem:[#allocation5 + $0x9c8] sm:$0xff] %v2386_v0  ;;  %v2388_v10 = vsub.f32 1.0, %v1876_v1  ;;  %v1878_v11 = vmax.f32 %v3755_v4, 0.0  ;;  %3768 = vtanh.f32 %v861_v56  ;;  %v876_v3 = vmul.f32 0.5, %v364_v53  ;;  %v367_v4 = vld [vmem:[#allocation2 + $0xab0] sm:$0xff] }
 0x14e   :  { %v3759_v14 = vpop.eup %3758  ;;  %2899 = vst [vmem:[#allocation5 + $0x9d0] sm:$0xff] %v2387_v5  ;;  %v2389_v15 = vsub.f32 1.0, %v1877_v6  ;;  %v1879_v16 = vmax.f32 %v3757_v9, 0.0  ;;  %3770 = vtanh.f32 %v862_v61  ;;  %v877_v8 = vmul.f32 0.5, %v365_v58  ;;  %v368_v9 = vld [vmem:[#allocation2 + $0xab8] sm:$0xff] }
 0x14f   :  { %v3761_v19 = vpop.eup %3760  ;;  %2900 = vst [vmem:[#allocation5 + $0x9d8] sm:$0xff] %v2388_v10  ;;  %v2390_v20 = vsub.f32 1.0, %v1878_v11  ;;  %v1880_v21 = vmax.f32 %v3759_v14, 0.0  ;;  %3772 = vtanh.f32 %v863_v2  ;;  %v878_v13 = vmul.f32 0.5, %v366_v63  ;;  %v369_v14 = vld [vmem:[#allocation2 + $0xac0] sm:$0xff] }
 0x150   :  { %v3763_v24 = vpop.eup %3762  ;;  %2901 = vst [vmem:[#allocation5 + $0x9e0] sm:$0xff] %v2389_v15  ;;  %v2391_v25 = vsub.f32 1.0, %v1879_v16  ;;  %v1881_v26 = vmax.f32 %v3761_v19, 0.0  ;;  %3774 = vtanh.f32 %v864_v7  ;;  %v879_v18 = vmul.f32 0.5, %v367_v4  ;;  %v370_v19 = vld [vmem:[#allocation2 + $0xac8] sm:$0xff] }
 0x151   :  { %v3765_v29 = vpop.eup %3764  ;;  %2902 = vst [vmem:[#allocation5 + $0x9e8] sm:$0xff] %v2390_v20  ;;  %v2392_v30 = vsub.f32 1.0, %v1880_v21  ;;  %v1882_v31 = vmax.f32 %v3763_v24, 0.0  ;;  %3776 = vtanh.f32 %v865_v12  ;;  %v880_v23 = vmul.f32 0.5, %v368_v9  ;;  %v371_v24 = vld [vmem:[#allocation2 + $0xad0] sm:$0xff] }
 0x152   :  { %v3767_v34 = vpop.eup %3766  ;;  %2903 = vst [vmem:[#allocation5 + $0x9f0] sm:$0xff] %v2391_v25  ;;  %v2393_v35 = vsub.f32 1.0, %v1881_v26  ;;  %v1883_v36 = vmax.f32 %v3765_v29, 0.0  ;;  %3778 = vtanh.f32 %v866_v17  ;;  %v881_v28 = vmul.f32 0.5, %v369_v14  ;;  %v372_v29 = vld [vmem:[#allocation2 + $0xad8] sm:$0xff] }
 0x153   :  { %v3769_v39 = vpop.eup %3768  ;;  %2904 = vst [vmem:[#allocation5 + $0x9f8] sm:$0xff] %v2392_v30  ;;  %v2394_v40 = vsub.f32 1.0, %v1882_v31  ;;  %v1884_v41 = vmax.f32 %v3767_v34, 0.0  ;;  %3780 = vtanh.f32 %v867_v22  ;;  %v882_v33 = vmul.f32 0.5, %v370_v19  ;;  %v373_v34 = vld [vmem:[#allocation2 + $0xae0] sm:$0xff] }
 0x154   :  { %v3771_v44 = vpop.eup %3770  ;;  %2905 = vst [vmem:[#allocation5 + $0xa00] sm:$0xff] %v2393_v35  ;;  %v2395_v45 = vsub.f32 1.0, %v1883_v36  ;;  %v1885_v46 = vmax.f32 %v3769_v39, 0.0  ;;  %3782 = vtanh.f32 %v868_v27  ;;  %v883_v38 = vmul.f32 0.5, %v371_v24  ;;  %v374_v39 = vld [vmem:[#allocation2 + $0xae8] sm:$0xff] }
 0x155   :  { %v3773_v49 = vpop.eup %3772  ;;  %2906 = vst [vmem:[#allocation5 + $0xa08] sm:$0xff] %v2394_v40  ;;  %v2396_v50 = vsub.f32 1.0, %v1884_v41  ;;  %v1886_v51 = vmax.f32 %v3771_v44, 0.0  ;;  %3784 = vtanh.f32 %v869_v32  ;;  %v884_v43 = vmul.f32 0.5, %v372_v29  ;;  %v375_v44 = vld [vmem:[#allocation2 + $0xaf0] sm:$0xff] }
 0x156   :  { %v3775_v54 = vpop.eup %3774  ;;  %2907 = vst [vmem:[#allocation5 + $0xa10] sm:$0xff] %v2395_v45  ;;  %v2397_v55 = vsub.f32 1.0, %v1885_v46  ;;  %v1887_v56 = vmax.f32 %v3773_v49, 0.0  ;;  %3786 = vtanh.f32 %v870_v37  ;;  %v885_v48 = vmul.f32 0.5, %v373_v34  ;;  %v376_v49 = vld [vmem:[#allocation2 + $0xaf8] sm:$0xff] }
 0x157   :  { %v3777_v59 = vpop.eup %3776  ;;  %2908 = vst [vmem:[#allocation5 + $0xa18] sm:$0xff] %v2396_v50  ;;  %v2398_v60 = vsub.f32 1.0, %v1886_v51  ;;  %v1888_v61 = vmax.f32 %v3775_v54, 0.0  ;;  %3788 = vtanh.f32 %v871_v42  ;;  %v886_v53 = vmul.f32 0.5, %v374_v39  ;;  %v377_v54 = vld [vmem:[#allocation2 + $0xb00] sm:$0xff] }
 0x158   :  { %v3779_v0 = vpop.eup %3778  ;;  %2909 = vst [vmem:[#allocation5 + $0xa20] sm:$0xff] %v2397_v55  ;;  %v2399_v1 = vsub.f32 1.0, %v1887_v56  ;;  %v1889_v2 = vmax.f32 %v3777_v59, 0.0  ;;  %3790 = vtanh.f32 %v872_v47  ;;  %v887_v58 = vmul.f32 0.5, %v375_v44  ;;  %v378_v59 = vld [vmem:[#allocation2 + $0xb08] sm:$0xff] }
 0x159   :  { %v3781_v5 = vpop.eup %3780  ;;  %2910 = vst [vmem:[#allocation5 + $0xa28] sm:$0xff] %v2398_v60  ;;  %v2400_v6 = vsub.f32 1.0, %v1888_v61  ;;  %v1890_v7 = vmax.f32 %v3779_v0, 0.0  ;;  %3792 = vtanh.f32 %v873_v52  ;;  %v888_v63 = vmul.f32 0.5, %v376_v49  ;;  %v379_v0 = vld [vmem:[#allocation2 + $0xb10] sm:$0xff] }
 0x15a   :  { %v3783_v10 = vpop.eup %3782  ;;  %2911 = vst [vmem:[#allocation5 + $0xa30] sm:$0xff] %v2399_v1  ;;  %v2401_v11 = vsub.f32 1.0, %v1889_v2  ;;  %v1891_v12 = vmax.f32 %v3781_v5, 0.0  ;;  %3794 = vtanh.f32 %v874_v57  ;;  %v889_v4 = vmul.f32 0.5, %v377_v54  ;;  %v380_v5 = vld [vmem:[#allocation2 + $0xb18] sm:$0xff] }
 0x15b   :  { %v3785_v15 = vpop.eup %3784  ;;  %2912 = vst [vmem:[#allocation5 + $0xa38] sm:$0xff] %v2400_v6  ;;  %v2402_v16 = vsub.f32 1.0, %v1890_v7  ;;  %v1892_v17 = vmax.f32 %v3783_v10, 0.0  ;;  %3796 = vtanh.f32 %v875_v62  ;;  %v890_v9 = vmul.f32 0.5, %v378_v59  ;;  %v381_v10 = vld [vmem:[#allocation2 + $0xb20] sm:$0xff] }
 0x15c   :  { %v3787_v20 = vpop.eup %3786  ;;  %2913 = vst [vmem:[#allocation5 + $0xa40] sm:$0xff] %v2401_v11  ;;  %v2403_v21 = vsub.f32 1.0, %v1891_v12  ;;  %v1893_v22 = vmax.f32 %v3785_v15, 0.0  ;;  %3798 = vtanh.f32 %v876_v3  ;;  %v891_v14 = vmul.f32 0.5, %v379_v0  ;;  %v382_v15 = vld [vmem:[#allocation2 + $0xb28] sm:$0xff] }
 0x15d   :  { %v3789_v25 = vpop.eup %3788  ;;  %2914 = vst [vmem:[#allocation5 + $0xa48] sm:$0xff] %v2402_v16  ;;  %v2404_v26 = vsub.f32 1.0, %v1892_v17  ;;  %v1894_v27 = vmax.f32 %v3787_v20, 0.0  ;;  %3800 = vtanh.f32 %v877_v8  ;;  %v892_v19 = vmul.f32 0.5, %v380_v5  ;;  %v383_v20 = vld [vmem:[#allocation2 + $0xb30] sm:$0xff] }
 0x15e   :  { %v3791_v30 = vpop.eup %3790  ;;  %2915 = vst [vmem:[#allocation5 + $0xa50] sm:$0xff] %v2403_v21  ;;  %v2405_v31 = vsub.f32 1.0, %v1893_v22  ;;  %v1895_v32 = vmax.f32 %v3789_v25, 0.0  ;;  %3802 = vtanh.f32 %v878_v13  ;;  %v893_v24 = vmul.f32 0.5, %v381_v10  ;;  %v384_v25 = vld [vmem:[#allocation2 + $0xb38] sm:$0xff] }
 0x15f   :  { %v3793_v35 = vpop.eup %3792  ;;  %2916 = vst [vmem:[#allocation5 + $0xa58] sm:$0xff] %v2404_v26  ;;  %v2406_v36 = vsub.f32 1.0, %v1894_v27  ;;  %v1896_v37 = vmax.f32 %v3791_v30, 0.0  ;;  %3804 = vtanh.f32 %v879_v18  ;;  %v894_v29 = vmul.f32 0.5, %v382_v15  ;;  %v385_v30 = vld [vmem:[#allocation2 + $0xb40] sm:$0xff] }
 0x160   :  { %v3795_v40 = vpop.eup %3794  ;;  %2917 = vst [vmem:[#allocation5 + $0xa60] sm:$0xff] %v2405_v31  ;;  %v2407_v41 = vsub.f32 1.0, %v1895_v32  ;;  %v1897_v42 = vmax.f32 %v3793_v35, 0.0  ;;  %3806 = vtanh.f32 %v880_v23  ;;  %v895_v34 = vmul.f32 0.5, %v383_v20  ;;  %v386_v35 = vld [vmem:[#allocation2 + $0xb48] sm:$0xff] }
 0x161   :  { %v3797_v45 = vpop.eup %3796  ;;  %2918 = vst [vmem:[#allocation5 + $0xa68] sm:$0xff] %v2406_v36  ;;  %v2408_v46 = vsub.f32 1.0, %v1896_v37  ;;  %v1898_v47 = vmax.f32 %v3795_v40, 0.0  ;;  %3808 = vtanh.f32 %v881_v28  ;;  %v896_v39 = vmul.f32 0.5, %v384_v25  ;;  %v387_v40 = vld [vmem:[#allocation2 + $0xb50] sm:$0xff] }
 0x162   :  { %v3799_v50 = vpop.eup %3798  ;;  %2919 = vst [vmem:[#allocation5 + $0xa70] sm:$0xff] %v2407_v41  ;;  %v2409_v51 = vsub.f32 1.0, %v1897_v42  ;;  %v1899_v52 = vmax.f32 %v3797_v45, 0.0  ;;  %3810 = vtanh.f32 %v882_v33  ;;  %v897_v44 = vmul.f32 0.5, %v385_v30  ;;  %v388_v45 = vld [vmem:[#allocation2 + $0xb58] sm:$0xff] }
 0x163   :  { %v3801_v55 = vpop.eup %3800  ;;  %2920 = vst [vmem:[#allocation5 + $0xa78] sm:$0xff] %v2408_v46  ;;  %v2410_v56 = vsub.f32 1.0, %v1898_v47  ;;  %v1900_v57 = vmax.f32 %v3799_v50, 0.0  ;;  %3812 = vtanh.f32 %v883_v38  ;;  %v898_v49 = vmul.f32 0.5, %v386_v35  ;;  %v389_v50 = vld [vmem:[#allocation2 + $0xb60] sm:$0xff] }
 0x164   :  { %v3803_v60 = vpop.eup %3802  ;;  %2921 = vst [vmem:[#allocation5 + $0xa80] sm:$0xff] %v2409_v51  ;;  %v2411_v61 = vsub.f32 1.0, %v1899_v52  ;;  %v1901_v62 = vmax.f32 %v3801_v55, 0.0  ;;  %3814 = vtanh.f32 %v884_v43  ;;  %v899_v54 = vmul.f32 0.5, %v387_v40  ;;  %v390_v55 = vld [vmem:[#allocation2 + $0xb68] sm:$0xff] }
 0x165   :  { %v3805_v1 = vpop.eup %3804  ;;  %2922 = vst [vmem:[#allocation5 + $0xa88] sm:$0xff] %v2410_v56  ;;  %v2412_v2 = vsub.f32 1.0, %v1900_v57  ;;  %v1902_v3 = vmax.f32 %v3803_v60, 0.0  ;;  %3816 = vtanh.f32 %v885_v48  ;;  %v900_v59 = vmul.f32 0.5, %v388_v45  ;;  %v391_v60 = vld [vmem:[#allocation2 + $0xb70] sm:$0xff] }
 0x166   :  { %v3807_v6 = vpop.eup %3806  ;;  %2923 = vst [vmem:[#allocation5 + $0xa90] sm:$0xff] %v2411_v61  ;;  %v2413_v7 = vsub.f32 1.0, %v1901_v62  ;;  %v1903_v8 = vmax.f32 %v3805_v1, 0.0  ;;  %3818 = vtanh.f32 %v886_v53  ;;  %v901_v0 = vmul.f32 0.5, %v389_v50  ;;  %v392_v1 = vld [vmem:[#allocation2 + $0xb78] sm:$0xff] }
 0x167   :  { %v3809_v11 = vpop.eup %3808  ;;  %2924 = vst [vmem:[#allocation5 + $0xa98] sm:$0xff] %v2412_v2  ;;  %v2414_v12 = vsub.f32 1.0, %v1902_v3  ;;  %v1904_v13 = vmax.f32 %v3807_v6, 0.0  ;;  %3820 = vtanh.f32 %v887_v58  ;;  %v902_v5 = vmul.f32 0.5, %v390_v55  ;;  %v393_v6 = vld [vmem:[#allocation2 + $0xb80] sm:$0xff] }
 0x168   :  { %v3811_v16 = vpop.eup %3810  ;;  %2925 = vst [vmem:[#allocation5 + $0xaa0] sm:$0xff] %v2413_v7  ;;  %v2415_v17 = vsub.f32 1.0, %v1903_v8  ;;  %v1905_v18 = vmax.f32 %v3809_v11, 0.0  ;;  %3822 = vtanh.f32 %v888_v63  ;;  %v903_v10 = vmul.f32 0.5, %v391_v60  ;;  %v394_v11 = vld [vmem:[#allocation2 + $0xb88] sm:$0xff] }
 0x169   :  { %v3813_v21 = vpop.eup %3812  ;;  %2926 = vst [vmem:[#allocation5 + $0xaa8] sm:$0xff] %v2414_v12  ;;  %v2416_v22 = vsub.f32 1.0, %v1904_v13  ;;  %v1906_v23 = vmax.f32 %v3811_v16, 0.0  ;;  %3824 = vtanh.f32 %v889_v4  ;;  %v904_v15 = vmul.f32 0.5, %v392_v1  ;;  %v395_v16 = vld [vmem:[#allocation2 + $0xb90] sm:$0xff] }
 0x16a   :  { %v3815_v26 = vpop.eup %3814  ;;  %2927 = vst [vmem:[#allocation5 + $0xab0] sm:$0xff] %v2415_v17  ;;  %v2417_v27 = vsub.f32 1.0, %v1905_v18  ;;  %v1907_v28 = vmax.f32 %v3813_v21, 0.0  ;;  %3826 = vtanh.f32 %v890_v9  ;;  %v905_v20 = vmul.f32 0.5, %v393_v6  ;;  %v396_v21 = vld [vmem:[#allocation2 + $0xb98] sm:$0xff] }
 0x16b   :  { %v3817_v31 = vpop.eup %3816  ;;  %2928 = vst [vmem:[#allocation5 + $0xab8] sm:$0xff] %v2416_v22  ;;  %v2418_v32 = vsub.f32 1.0, %v1906_v23  ;;  %v1908_v33 = vmax.f32 %v3815_v26, 0.0  ;;  %3828 = vtanh.f32 %v891_v14  ;;  %v906_v25 = vmul.f32 0.5, %v394_v11  ;;  %v397_v26 = vld [vmem:[#allocation2 + $0xba0] sm:$0xff] }
 0x16c   :  { %v3819_v36 = vpop.eup %3818  ;;  %2929 = vst [vmem:[#allocation5 + $0xac0] sm:$0xff] %v2417_v27  ;;  %v2419_v37 = vsub.f32 1.0, %v1907_v28  ;;  %v1909_v38 = vmax.f32 %v3817_v31, 0.0  ;;  %3830 = vtanh.f32 %v892_v19  ;;  %v907_v30 = vmul.f32 0.5, %v395_v16  ;;  %v398_v31 = vld [vmem:[#allocation2 + $0xba8] sm:$0xff] }
 0x16d   :  { %v3821_v41 = vpop.eup %3820  ;;  %2930 = vst [vmem:[#allocation5 + $0xac8] sm:$0xff] %v2418_v32  ;;  %v2420_v42 = vsub.f32 1.0, %v1908_v33  ;;  %v1910_v43 = vmax.f32 %v3819_v36, 0.0  ;;  %3832 = vtanh.f32 %v893_v24  ;;  %v908_v35 = vmul.f32 0.5, %v396_v21  ;;  %v399_v36 = vld [vmem:[#allocation2 + $0xbb0] sm:$0xff] }
 0x16e   :  { %v3823_v46 = vpop.eup %3822  ;;  %2931 = vst [vmem:[#allocation5 + $0xad0] sm:$0xff] %v2419_v37  ;;  %v2421_v47 = vsub.f32 1.0, %v1909_v38  ;;  %v1911_v48 = vmax.f32 %v3821_v41, 0.0  ;;  %3834 = vtanh.f32 %v894_v29  ;;  %v909_v40 = vmul.f32 0.5, %v397_v26  ;;  %v400_v41 = vld [vmem:[#allocation2 + $0xbb8] sm:$0xff] }
 0x16f   :  { %v3825_v51 = vpop.eup %3824  ;;  %2932 = vst [vmem:[#allocation5 + $0xad8] sm:$0xff] %v2420_v42  ;;  %v2422_v52 = vsub.f32 1.0, %v1910_v43  ;;  %v1912_v53 = vmax.f32 %v3823_v46, 0.0  ;;  %3836 = vtanh.f32 %v895_v34  ;;  %v910_v45 = vmul.f32 0.5, %v398_v31  ;;  %v401_v46 = vld [vmem:[#allocation2 + $0xbc0] sm:$0xff] }
 0x170   :  { %v3827_v56 = vpop.eup %3826  ;;  %2933 = vst [vmem:[#allocation5 + $0xae0] sm:$0xff] %v2421_v47  ;;  %v2423_v57 = vsub.f32 1.0, %v1911_v48  ;;  %v1913_v58 = vmax.f32 %v3825_v51, 0.0  ;;  %3838 = vtanh.f32 %v896_v39  ;;  %v911_v50 = vmul.f32 0.5, %v399_v36  ;;  %v402_v51 = vld [vmem:[#allocation2 + $0xbc8] sm:$0xff] }
 0x171   :  { %v3829_v61 = vpop.eup %3828  ;;  %2934 = vst [vmem:[#allocation5 + $0xae8] sm:$0xff] %v2422_v52  ;;  %v2424_v62 = vsub.f32 1.0, %v1912_v53  ;;  %v1914_v63 = vmax.f32 %v3827_v56, 0.0  ;;  %3840 = vtanh.f32 %v897_v44  ;;  %v912_v55 = vmul.f32 0.5, %v400_v41  ;;  %v403_v56 = vld [vmem:[#allocation2 + $0xbd0] sm:$0xff] }
 0x172   :  { %v3831_v2 = vpop.eup %3830  ;;  %2935 = vst [vmem:[#allocation5 + $0xaf0] sm:$0xff] %v2423_v57  ;;  %v2425_v3 = vsub.f32 1.0, %v1913_v58  ;;  %v1915_v4 = vmax.f32 %v3829_v61, 0.0  ;;  %3842 = vtanh.f32 %v898_v49  ;;  %v913_v60 = vmul.f32 0.5, %v401_v46  ;;  %v404_v61 = vld [vmem:[#allocation2 + $0xbd8] sm:$0xff] }
 0x173   :  { %v3833_v7 = vpop.eup %3832  ;;  %2936 = vst [vmem:[#allocation5 + $0xaf8] sm:$0xff] %v2424_v62  ;;  %v2426_v8 = vsub.f32 1.0, %v1914_v63  ;;  %v1916_v9 = vmax.f32 %v3831_v2, 0.0  ;;  %3844 = vtanh.f32 %v899_v54  ;;  %v914_v1 = vmul.f32 0.5, %v402_v51  ;;  %v405_v2 = vld [vmem:[#allocation2 + $0xbe0] sm:$0xff] }
 0x174   :  { %v3835_v12 = vpop.eup %3834  ;;  %2937 = vst [vmem:[#allocation5 + $0xb00] sm:$0xff] %v2425_v3  ;;  %v2427_v13 = vsub.f32 1.0, %v1915_v4  ;;  %v1917_v14 = vmax.f32 %v3833_v7, 0.0  ;;  %3846 = vtanh.f32 %v900_v59  ;;  %v915_v6 = vmul.f32 0.5, %v403_v56  ;;  %v406_v7 = vld [vmem:[#allocation2 + $0xbe8] sm:$0xff] }
 0x175   :  { %v3837_v17 = vpop.eup %3836  ;;  %2938 = vst [vmem:[#allocation5 + $0xb08] sm:$0xff] %v2426_v8  ;;  %v2428_v18 = vsub.f32 1.0, %v1916_v9  ;;  %v1918_v19 = vmax.f32 %v3835_v12, 0.0  ;;  %3848 = vtanh.f32 %v901_v0  ;;  %v916_v11 = vmul.f32 0.5, %v404_v61  ;;  %v407_v12 = vld [vmem:[#allocation2 + $0xbf0] sm:$0xff] }
 0x176   :  { %v3839_v22 = vpop.eup %3838  ;;  %2939 = vst [vmem:[#allocation5 + $0xb10] sm:$0xff] %v2427_v13  ;;  %v2429_v23 = vsub.f32 1.0, %v1917_v14  ;;  %v1919_v24 = vmax.f32 %v3837_v17, 0.0  ;;  %3850 = vtanh.f32 %v902_v5  ;;  %v917_v16 = vmul.f32 0.5, %v405_v2  ;;  %v408_v17 = vld [vmem:[#allocation2 + $0xbf8] sm:$0xff] }
 0x177   :  { %v3841_v27 = vpop.eup %3840  ;;  %2940 = vst [vmem:[#allocation5 + $0xb18] sm:$0xff] %v2428_v18  ;;  %v2430_v28 = vsub.f32 1.0, %v1918_v19  ;;  %v1920_v29 = vmax.f32 %v3839_v22, 0.0  ;;  %3852 = vtanh.f32 %v903_v10  ;;  %v918_v21 = vmul.f32 0.5, %v406_v7  ;;  %v409_v22 = vld [vmem:[#allocation2 + $0xc00] sm:$0xff] }
 0x178   :  { %v3843_v32 = vpop.eup %3842  ;;  %2941 = vst [vmem:[#allocation5 + $0xb20] sm:$0xff] %v2429_v23  ;;  %v2431_v33 = vsub.f32 1.0, %v1919_v24  ;;  %v1921_v34 = vmax.f32 %v3841_v27, 0.0  ;;  %3854 = vtanh.f32 %v904_v15  ;;  %v919_v26 = vmul.f32 0.5, %v407_v12  ;;  %v410_v27 = vld [vmem:[#allocation2 + $0xc08] sm:$0xff] }
 0x179   :  { %v3845_v37 = vpop.eup %3844  ;;  %2942 = vst [vmem:[#allocation5 + $0xb28] sm:$0xff] %v2430_v28  ;;  %v2432_v38 = vsub.f32 1.0, %v1920_v29  ;;  %v1922_v39 = vmax.f32 %v3843_v32, 0.0  ;;  %3856 = vtanh.f32 %v905_v20  ;;  %v920_v31 = vmul.f32 0.5, %v408_v17  ;;  %v411_v32 = vld [vmem:[#allocation2 + $0xc10] sm:$0xff] }
 0x17a   :  { %v3847_v42 = vpop.eup %3846  ;;  %2943 = vst [vmem:[#allocation5 + $0xb30] sm:$0xff] %v2431_v33  ;;  %v2433_v43 = vsub.f32 1.0, %v1921_v34  ;;  %v1923_v44 = vmax.f32 %v3845_v37, 0.0  ;;  %3858 = vtanh.f32 %v906_v25  ;;  %v921_v36 = vmul.f32 0.5, %v409_v22  ;;  %v412_v37 = vld [vmem:[#allocation2 + $0xc18] sm:$0xff] }
 0x17b   :  { %v3849_v47 = vpop.eup %3848  ;;  %2944 = vst [vmem:[#allocation5 + $0xb38] sm:$0xff] %v2432_v38  ;;  %v2434_v48 = vsub.f32 1.0, %v1922_v39  ;;  %v1924_v49 = vmax.f32 %v3847_v42, 0.0  ;;  %3860 = vtanh.f32 %v907_v30  ;;  %v922_v41 = vmul.f32 0.5, %v410_v27  ;;  %v413_v42 = vld [vmem:[#allocation2 + $0xc20] sm:$0xff] }
 0x17c   :  { %v3851_v52 = vpop.eup %3850  ;;  %2945 = vst [vmem:[#allocation5 + $0xb40] sm:$0xff] %v2433_v43  ;;  %v2435_v53 = vsub.f32 1.0, %v1923_v44  ;;  %v1925_v54 = vmax.f32 %v3849_v47, 0.0  ;;  %3862 = vtanh.f32 %v908_v35  ;;  %v923_v46 = vmul.f32 0.5, %v411_v32  ;;  %v414_v47 = vld [vmem:[#allocation2 + $0xc28] sm:$0xff] }
 0x17d   :  { %v3853_v57 = vpop.eup %3852  ;;  %2946 = vst [vmem:[#allocation5 + $0xb48] sm:$0xff] %v2434_v48  ;;  %v2436_v58 = vsub.f32 1.0, %v1924_v49  ;;  %v1926_v59 = vmax.f32 %v3851_v52, 0.0  ;;  %3864 = vtanh.f32 %v909_v40  ;;  %v924_v51 = vmul.f32 0.5, %v412_v37  ;;  %v415_v52 = vld [vmem:[#allocation2 + $0xc30] sm:$0xff] }
 0x17e   :  { %v3855_v62 = vpop.eup %3854  ;;  %2947 = vst [vmem:[#allocation5 + $0xb50] sm:$0xff] %v2435_v53  ;;  %v2437_v63 = vsub.f32 1.0, %v1925_v54  ;;  %v1927_v0 = vmax.f32 %v3853_v57, 0.0  ;;  %3866 = vtanh.f32 %v910_v45  ;;  %v925_v56 = vmul.f32 0.5, %v413_v42  ;;  %v416_v57 = vld [vmem:[#allocation2 + $0xc38] sm:$0xff] }
 0x17f   :  { %v3857_v3 = vpop.eup %3856  ;;  %2948 = vst [vmem:[#allocation5 + $0xb58] sm:$0xff] %v2436_v58  ;;  %v2438_v4 = vsub.f32 1.0, %v1926_v59  ;;  %v1928_v5 = vmax.f32 %v3855_v62, 0.0  ;;  %3868 = vtanh.f32 %v911_v50  ;;  %v926_v61 = vmul.f32 0.5, %v414_v47  ;;  %v417_v62 = vld [vmem:[#allocation2 + $0xc40] sm:$0xff] }
 0x180   :  { %v3859_v8 = vpop.eup %3858  ;;  %2949 = vst [vmem:[#allocation5 + $0xb60] sm:$0xff] %v2437_v63  ;;  %v2439_v9 = vsub.f32 1.0, %v1927_v0  ;;  %v1929_v10 = vmax.f32 %v3857_v3, 0.0  ;;  %3870 = vtanh.f32 %v912_v55  ;;  %v927_v2 = vmul.f32 0.5, %v415_v52  ;;  %v418_v3 = vld [vmem:[#allocation2 + $0xc48] sm:$0xff] }
 0x181   :  { %v3861_v13 = vpop.eup %3860  ;;  %2950 = vst [vmem:[#allocation5 + $0xb68] sm:$0xff] %v2438_v4  ;;  %v2440_v14 = vsub.f32 1.0, %v1928_v5  ;;  %v1930_v15 = vmax.f32 %v3859_v8, 0.0  ;;  %3872 = vtanh.f32 %v913_v60  ;;  %v928_v7 = vmul.f32 0.5, %v416_v57  ;;  %v419_v8 = vld [vmem:[#allocation2 + $0xc50] sm:$0xff] }
 0x182   :  { %v3863_v18 = vpop.eup %3862  ;;  %2951 = vst [vmem:[#allocation5 + $0xb70] sm:$0xff] %v2439_v9  ;;  %v2441_v19 = vsub.f32 1.0, %v1929_v10  ;;  %v1931_v20 = vmax.f32 %v3861_v13, 0.0  ;;  %3874 = vtanh.f32 %v914_v1  ;;  %v929_v12 = vmul.f32 0.5, %v417_v62  ;;  %v420_v13 = vld [vmem:[#allocation2 + $0xc58] sm:$0xff] }
 0x183   :  { %v3865_v23 = vpop.eup %3864  ;;  %2952 = vst [vmem:[#allocation5 + $0xb78] sm:$0xff] %v2440_v14  ;;  %v2442_v24 = vsub.f32 1.0, %v1930_v15  ;;  %v1932_v25 = vmax.f32 %v3863_v18, 0.0  ;;  %3876 = vtanh.f32 %v915_v6  ;;  %v930_v17 = vmul.f32 0.5, %v418_v3  ;;  %v421_v18 = vld [vmem:[#allocation2 + $0xc60] sm:$0xff] }
 0x184   :  { %v3867_v28 = vpop.eup %3866  ;;  %2953 = vst [vmem:[#allocation5 + $0xb80] sm:$0xff] %v2441_v19  ;;  %v2443_v29 = vsub.f32 1.0, %v1931_v20  ;;  %v1933_v30 = vmax.f32 %v3865_v23, 0.0  ;;  %3878 = vtanh.f32 %v916_v11  ;;  %v931_v22 = vmul.f32 0.5, %v419_v8  ;;  %v422_v23 = vld [vmem:[#allocation2 + $0xc68] sm:$0xff] }
 0x185   :  { %v3869_v33 = vpop.eup %3868  ;;  %2954 = vst [vmem:[#allocation5 + $0xb88] sm:$0xff] %v2442_v24  ;;  %v2444_v34 = vsub.f32 1.0, %v1932_v25  ;;  %v1934_v35 = vmax.f32 %v3867_v28, 0.0  ;;  %3880 = vtanh.f32 %v917_v16  ;;  %v932_v27 = vmul.f32 0.5, %v420_v13  ;;  %v423_v28 = vld [vmem:[#allocation2 + $0xc70] sm:$0xff] }
 0x186   :  { %v3871_v38 = vpop.eup %3870  ;;  %2955 = vst [vmem:[#allocation5 + $0xb90] sm:$0xff] %v2443_v29  ;;  %v2445_v39 = vsub.f32 1.0, %v1933_v30  ;;  %v1935_v40 = vmax.f32 %v3869_v33, 0.0  ;;  %3882 = vtanh.f32 %v918_v21  ;;  %v933_v32 = vmul.f32 0.5, %v421_v18  ;;  %v424_v33 = vld [vmem:[#allocation2 + $0xc78] sm:$0xff] }
 0x187   :  { %v3873_v43 = vpop.eup %3872  ;;  %2956 = vst [vmem:[#allocation5 + $0xb98] sm:$0xff] %v2444_v34  ;;  %v2446_v44 = vsub.f32 1.0, %v1934_v35  ;;  %v1936_v45 = vmax.f32 %v3871_v38, 0.0  ;;  %3884 = vtanh.f32 %v919_v26  ;;  %v934_v37 = vmul.f32 0.5, %v422_v23  ;;  %v425_v38 = vld [vmem:[#allocation2 + $0xc80] sm:$0xff] }
 0x188   :  { %v3875_v48 = vpop.eup %3874  ;;  %2957 = vst [vmem:[#allocation5 + $0xba0] sm:$0xff] %v2445_v39  ;;  %v2447_v49 = vsub.f32 1.0, %v1935_v40  ;;  %v1937_v50 = vmax.f32 %v3873_v43, 0.0  ;;  %3886 = vtanh.f32 %v920_v31  ;;  %v935_v42 = vmul.f32 0.5, %v423_v28  ;;  %v426_v43 = vld [vmem:[#allocation2 + $0xc88] sm:$0xff] }
 0x189   :  { %v3877_v53 = vpop.eup %3876  ;;  %2958 = vst [vmem:[#allocation5 + $0xba8] sm:$0xff] %v2446_v44  ;;  %v2448_v54 = vsub.f32 1.0, %v1936_v45  ;;  %v1938_v55 = vmax.f32 %v3875_v48, 0.0  ;;  %3888 = vtanh.f32 %v921_v36  ;;  %v936_v47 = vmul.f32 0.5, %v424_v33  ;;  %v427_v48 = vld [vmem:[#allocation2 + $0xc90] sm:$0xff] }
 0x18a   :  { %v3879_v58 = vpop.eup %3878  ;;  %2959 = vst [vmem:[#allocation5 + $0xbb0] sm:$0xff] %v2447_v49  ;;  %v2449_v59 = vsub.f32 1.0, %v1937_v50  ;;  %v1939_v60 = vmax.f32 %v3877_v53, 0.0  ;;  %3890 = vtanh.f32 %v922_v41  ;;  %v937_v52 = vmul.f32 0.5, %v425_v38  ;;  %v428_v53 = vld [vmem:[#allocation2 + $0xc98] sm:$0xff] }
 0x18b   :  { %v3881_v63 = vpop.eup %3880  ;;  %2960 = vst [vmem:[#allocation5 + $0xbb8] sm:$0xff] %v2448_v54  ;;  %v2450_v0 = vsub.f32 1.0, %v1938_v55  ;;  %v1940_v1 = vmax.f32 %v3879_v58, 0.0  ;;  %3892 = vtanh.f32 %v923_v46  ;;  %v938_v57 = vmul.f32 0.5, %v426_v43  ;;  %v429_v58 = vld [vmem:[#allocation2 + $0xca0] sm:$0xff] }
 0x18c   :  { %v3883_v4 = vpop.eup %3882  ;;  %2961 = vst [vmem:[#allocation5 + $0xbc0] sm:$0xff] %v2449_v59  ;;  %v2451_v5 = vsub.f32 1.0, %v1939_v60  ;;  %v1941_v6 = vmax.f32 %v3881_v63, 0.0  ;;  %3894 = vtanh.f32 %v924_v51  ;;  %v939_v62 = vmul.f32 0.5, %v427_v48  ;;  %v430_v63 = vld [vmem:[#allocation2 + $0xca8] sm:$0xff] }
 0x18d   :  { %v3885_v9 = vpop.eup %3884  ;;  %2962 = vst [vmem:[#allocation5 + $0xbc8] sm:$0xff] %v2450_v0  ;;  %v2452_v10 = vsub.f32 1.0, %v1940_v1  ;;  %v1942_v11 = vmax.f32 %v3883_v4, 0.0  ;;  %3896 = vtanh.f32 %v925_v56  ;;  %v940_v3 = vmul.f32 0.5, %v428_v53  ;;  %v431_v4 = vld [vmem:[#allocation2 + $0xcb0] sm:$0xff] }
 0x18e   :  { %v3887_v14 = vpop.eup %3886  ;;  %2963 = vst [vmem:[#allocation5 + $0xbd0] sm:$0xff] %v2451_v5  ;;  %v2453_v15 = vsub.f32 1.0, %v1941_v6  ;;  %v1943_v16 = vmax.f32 %v3885_v9, 0.0  ;;  %3898 = vtanh.f32 %v926_v61  ;;  %v941_v8 = vmul.f32 0.5, %v429_v58  ;;  %v432_v9 = vld [vmem:[#allocation2 + $0xcb8] sm:$0xff] }
 0x18f   :  { %v3889_v19 = vpop.eup %3888  ;;  %2964 = vst [vmem:[#allocation5 + $0xbd8] sm:$0xff] %v2452_v10  ;;  %v2454_v20 = vsub.f32 1.0, %v1942_v11  ;;  %v1944_v21 = vmax.f32 %v3887_v14, 0.0  ;;  %3900 = vtanh.f32 %v927_v2  ;;  %v942_v13 = vmul.f32 0.5, %v430_v63  ;;  %v433_v14 = vld [vmem:[#allocation2 + $0xcc0] sm:$0xff] }
 0x190   :  { %v3891_v24 = vpop.eup %3890  ;;  %2965 = vst [vmem:[#allocation5 + $0xbe0] sm:$0xff] %v2453_v15  ;;  %v2455_v25 = vsub.f32 1.0, %v1943_v16  ;;  %v1945_v26 = vmax.f32 %v3889_v19, 0.0  ;;  %3902 = vtanh.f32 %v928_v7  ;;  %v943_v18 = vmul.f32 0.5, %v431_v4  ;;  %v434_v19 = vld [vmem:[#allocation2 + $0xcc8] sm:$0xff] }
 0x191   :  { %v3893_v29 = vpop.eup %3892  ;;  %2966 = vst [vmem:[#allocation5 + $0xbe8] sm:$0xff] %v2454_v20  ;;  %v2456_v30 = vsub.f32 1.0, %v1944_v21  ;;  %v1946_v31 = vmax.f32 %v3891_v24, 0.0  ;;  %3904 = vtanh.f32 %v929_v12  ;;  %v944_v23 = vmul.f32 0.5, %v432_v9  ;;  %v435_v24 = vld [vmem:[#allocation2 + $0xcd0] sm:$0xff] }
 0x192   :  { %v3895_v34 = vpop.eup %3894  ;;  %2967 = vst [vmem:[#allocation5 + $0xbf0] sm:$0xff] %v2455_v25  ;;  %v2457_v35 = vsub.f32 1.0, %v1945_v26  ;;  %v1947_v36 = vmax.f32 %v3893_v29, 0.0  ;;  %3906 = vtanh.f32 %v930_v17  ;;  %v945_v28 = vmul.f32 0.5, %v433_v14  ;;  %v436_v29 = vld [vmem:[#allocation2 + $0xcd8] sm:$0xff] }
 0x193   :  { %v3897_v39 = vpop.eup %3896  ;;  %2968 = vst [vmem:[#allocation5 + $0xbf8] sm:$0xff] %v2456_v30  ;;  %v2458_v40 = vsub.f32 1.0, %v1946_v31  ;;  %v1948_v41 = vmax.f32 %v3895_v34, 0.0  ;;  %3908 = vtanh.f32 %v931_v22  ;;  %v946_v33 = vmul.f32 0.5, %v434_v19  ;;  %v437_v34 = vld [vmem:[#allocation2 + $0xce0] sm:$0xff] }
 0x194   :  { %v3899_v44 = vpop.eup %3898  ;;  %2969 = vst [vmem:[#allocation5 + $0xc00] sm:$0xff] %v2457_v35  ;;  %v2459_v45 = vsub.f32 1.0, %v1947_v36  ;;  %v1949_v46 = vmax.f32 %v3897_v39, 0.0  ;;  %3910 = vtanh.f32 %v932_v27  ;;  %v947_v38 = vmul.f32 0.5, %v435_v24  ;;  %v438_v39 = vld [vmem:[#allocation2 + $0xce8] sm:$0xff] }
 0x195   :  { %v3901_v49 = vpop.eup %3900  ;;  %2970 = vst [vmem:[#allocation5 + $0xc08] sm:$0xff] %v2458_v40  ;;  %v2460_v50 = vsub.f32 1.0, %v1948_v41  ;;  %v1950_v51 = vmax.f32 %v3899_v44, 0.0  ;;  %3912 = vtanh.f32 %v933_v32  ;;  %v948_v43 = vmul.f32 0.5, %v436_v29  ;;  %v439_v44 = vld [vmem:[#allocation2 + $0xcf0] sm:$0xff] }
 0x196   :  { %v3903_v54 = vpop.eup %3902  ;;  %2971 = vst [vmem:[#allocation5 + $0xc10] sm:$0xff] %v2459_v45  ;;  %v2461_v55 = vsub.f32 1.0, %v1949_v46  ;;  %v1951_v56 = vmax.f32 %v3901_v49, 0.0  ;;  %3914 = vtanh.f32 %v934_v37  ;;  %v949_v48 = vmul.f32 0.5, %v437_v34  ;;  %v440_v49 = vld [vmem:[#allocation2 + $0xcf8] sm:$0xff] }
 0x197   :  { %v3905_v59 = vpop.eup %3904  ;;  %2972 = vst [vmem:[#allocation5 + $0xc18] sm:$0xff] %v2460_v50  ;;  %v2462_v60 = vsub.f32 1.0, %v1950_v51  ;;  %v1952_v61 = vmax.f32 %v3903_v54, 0.0  ;;  %3916 = vtanh.f32 %v935_v42  ;;  %v950_v53 = vmul.f32 0.5, %v438_v39  ;;  %v441_v54 = vld [vmem:[#allocation2 + $0xd00] sm:$0xff] }
 0x198   :  { %v3907_v0 = vpop.eup %3906  ;;  %2973 = vst [vmem:[#allocation5 + $0xc20] sm:$0xff] %v2461_v55  ;;  %v2463_v1 = vsub.f32 1.0, %v1951_v56  ;;  %v1953_v2 = vmax.f32 %v3905_v59, 0.0  ;;  %3918 = vtanh.f32 %v936_v47  ;;  %v951_v58 = vmul.f32 0.5, %v439_v44  ;;  %v442_v59 = vld [vmem:[#allocation2 + $0xd08] sm:$0xff] }
 0x199   :  { %v3909_v5 = vpop.eup %3908  ;;  %2974 = vst [vmem:[#allocation5 + $0xc28] sm:$0xff] %v2462_v60  ;;  %v2464_v6 = vsub.f32 1.0, %v1952_v61  ;;  %v1954_v7 = vmax.f32 %v3907_v0, 0.0  ;;  %3920 = vtanh.f32 %v937_v52  ;;  %v952_v63 = vmul.f32 0.5, %v440_v49  ;;  %v443_v0 = vld [vmem:[#allocation2 + $0xd10] sm:$0xff] }
 0x19a   :  { %v3911_v10 = vpop.eup %3910  ;;  %2975 = vst [vmem:[#allocation5 + $0xc30] sm:$0xff] %v2463_v1  ;;  %v2465_v11 = vsub.f32 1.0, %v1953_v2  ;;  %v1955_v12 = vmax.f32 %v3909_v5, 0.0  ;;  %3922 = vtanh.f32 %v938_v57  ;;  %v953_v4 = vmul.f32 0.5, %v441_v54  ;;  %v444_v5 = vld [vmem:[#allocation2 + $0xd18] sm:$0xff] }
 0x19b   :  { %v3913_v15 = vpop.eup %3912  ;;  %2976 = vst [vmem:[#allocation5 + $0xc38] sm:$0xff] %v2464_v6  ;;  %v2466_v16 = vsub.f32 1.0, %v1954_v7  ;;  %v1956_v17 = vmax.f32 %v3911_v10, 0.0  ;;  %3924 = vtanh.f32 %v939_v62  ;;  %v954_v9 = vmul.f32 0.5, %v442_v59  ;;  %v445_v10 = vld [vmem:[#allocation2 + $0xd20] sm:$0xff] }
 0x19c   :  { %v3915_v20 = vpop.eup %3914  ;;  %2977 = vst [vmem:[#allocation5 + $0xc40] sm:$0xff] %v2465_v11  ;;  %v2467_v21 = vsub.f32 1.0, %v1955_v12  ;;  %v1957_v22 = vmax.f32 %v3913_v15, 0.0  ;;  %3926 = vtanh.f32 %v940_v3  ;;  %v955_v14 = vmul.f32 0.5, %v443_v0  ;;  %v446_v15 = vld [vmem:[#allocation2 + $0xd28] sm:$0xff] }
 0x19d   :  { %v3917_v25 = vpop.eup %3916  ;;  %2978 = vst [vmem:[#allocation5 + $0xc48] sm:$0xff] %v2466_v16  ;;  %v2468_v26 = vsub.f32 1.0, %v1956_v17  ;;  %v1958_v27 = vmax.f32 %v3915_v20, 0.0  ;;  %3928 = vtanh.f32 %v941_v8  ;;  %v956_v19 = vmul.f32 0.5, %v444_v5  ;;  %v447_v20 = vld [vmem:[#allocation2 + $0xd30] sm:$0xff] }
 0x19e   :  { %v3919_v30 = vpop.eup %3918  ;;  %2979 = vst [vmem:[#allocation5 + $0xc50] sm:$0xff] %v2467_v21  ;;  %v2469_v31 = vsub.f32 1.0, %v1957_v22  ;;  %v1959_v32 = vmax.f32 %v3917_v25, 0.0  ;;  %3930 = vtanh.f32 %v942_v13  ;;  %v957_v24 = vmul.f32 0.5, %v445_v10  ;;  %v448_v25 = vld [vmem:[#allocation2 + $0xd38] sm:$0xff] }
 0x19f   :  { %v3921_v35 = vpop.eup %3920  ;;  %2980 = vst [vmem:[#allocation5 + $0xc58] sm:$0xff] %v2468_v26  ;;  %v2470_v36 = vsub.f32 1.0, %v1958_v27  ;;  %v1960_v37 = vmax.f32 %v3919_v30, 0.0  ;;  %3932 = vtanh.f32 %v943_v18  ;;  %v958_v29 = vmul.f32 0.5, %v446_v15  ;;  %v449_v30 = vld [vmem:[#allocation2 + $0xd40] sm:$0xff] }
 0x1a0   :  { %v3923_v40 = vpop.eup %3922  ;;  %2981 = vst [vmem:[#allocation5 + $0xc60] sm:$0xff] %v2469_v31  ;;  %v2471_v41 = vsub.f32 1.0, %v1959_v32  ;;  %v1961_v42 = vmax.f32 %v3921_v35, 0.0  ;;  %3934 = vtanh.f32 %v944_v23  ;;  %v959_v34 = vmul.f32 0.5, %v447_v20  ;;  %v450_v35 = vld [vmem:[#allocation2 + $0xd48] sm:$0xff] }
 0x1a1   :  { %v3925_v45 = vpop.eup %3924  ;;  %2982 = vst [vmem:[#allocation5 + $0xc68] sm:$0xff] %v2470_v36  ;;  %v2472_v46 = vsub.f32 1.0, %v1960_v37  ;;  %v1962_v47 = vmax.f32 %v3923_v40, 0.0  ;;  %3936 = vtanh.f32 %v945_v28  ;;  %v960_v39 = vmul.f32 0.5, %v448_v25  ;;  %v451_v40 = vld [vmem:[#allocation2 + $0xd50] sm:$0xff] }
 0x1a2   :  { %v3927_v50 = vpop.eup %3926  ;;  %2983 = vst [vmem:[#allocation5 + $0xc70] sm:$0xff] %v2471_v41  ;;  %v2473_v51 = vsub.f32 1.0, %v1961_v42  ;;  %v1963_v52 = vmax.f32 %v3925_v45, 0.0  ;;  %3938 = vtanh.f32 %v946_v33  ;;  %v961_v44 = vmul.f32 0.5, %v449_v30  ;;  %v452_v45 = vld [vmem:[#allocation2 + $0xd58] sm:$0xff] }
 0x1a3   :  { %v3929_v55 = vpop.eup %3928  ;;  %2984 = vst [vmem:[#allocation5 + $0xc78] sm:$0xff] %v2472_v46  ;;  %v2474_v56 = vsub.f32 1.0, %v1962_v47  ;;  %v1964_v57 = vmax.f32 %v3927_v50, 0.0  ;;  %3940 = vtanh.f32 %v947_v38  ;;  %v962_v49 = vmul.f32 0.5, %v450_v35  ;;  %v453_v50 = vld [vmem:[#allocation2 + $0xd60] sm:$0xff] }
 0x1a4   :  { %v3931_v60 = vpop.eup %3930  ;;  %2985 = vst [vmem:[#allocation5 + $0xc80] sm:$0xff] %v2473_v51  ;;  %v2475_v61 = vsub.f32 1.0, %v1963_v52  ;;  %v1965_v62 = vmax.f32 %v3929_v55, 0.0  ;;  %3942 = vtanh.f32 %v948_v43  ;;  %v963_v54 = vmul.f32 0.5, %v451_v40  ;;  %v454_v55 = vld [vmem:[#allocation2 + $0xd68] sm:$0xff] }
 0x1a5   :  { %v3933_v1 = vpop.eup %3932  ;;  %2986 = vst [vmem:[#allocation5 + $0xc88] sm:$0xff] %v2474_v56  ;;  %v2476_v2 = vsub.f32 1.0, %v1964_v57  ;;  %v1966_v3 = vmax.f32 %v3931_v60, 0.0  ;;  %3944 = vtanh.f32 %v949_v48  ;;  %v964_v59 = vmul.f32 0.5, %v452_v45  ;;  %v455_v60 = vld [vmem:[#allocation2 + $0xd70] sm:$0xff] }
 0x1a6   :  { %v3935_v6 = vpop.eup %3934  ;;  %2987 = vst [vmem:[#allocation5 + $0xc90] sm:$0xff] %v2475_v61  ;;  %v2477_v7 = vsub.f32 1.0, %v1965_v62  ;;  %v1967_v8 = vmax.f32 %v3933_v1, 0.0  ;;  %3946 = vtanh.f32 %v950_v53  ;;  %v965_v0 = vmul.f32 0.5, %v453_v50  ;;  %v456_v1 = vld [vmem:[#allocation2 + $0xd78] sm:$0xff] }
 0x1a7   :  { %v3937_v11 = vpop.eup %3936  ;;  %2988 = vst [vmem:[#allocation5 + $0xc98] sm:$0xff] %v2476_v2  ;;  %v2478_v12 = vsub.f32 1.0, %v1966_v3  ;;  %v1968_v13 = vmax.f32 %v3935_v6, 0.0  ;;  %3948 = vtanh.f32 %v951_v58  ;;  %v966_v5 = vmul.f32 0.5, %v454_v55  ;;  %v457_v6 = vld [vmem:[#allocation2 + $0xd80] sm:$0xff] }
 0x1a8   :  { %v3939_v16 = vpop.eup %3938  ;;  %2989 = vst [vmem:[#allocation5 + $0xca0] sm:$0xff] %v2477_v7  ;;  %v2479_v17 = vsub.f32 1.0, %v1967_v8  ;;  %v1969_v18 = vmax.f32 %v3937_v11, 0.0  ;;  %3950 = vtanh.f32 %v952_v63  ;;  %v967_v10 = vmul.f32 0.5, %v455_v60  ;;  %v458_v11 = vld [vmem:[#allocation2 + $0xd88] sm:$0xff] }
 0x1a9   :  { %v3941_v21 = vpop.eup %3940  ;;  %2990 = vst [vmem:[#allocation5 + $0xca8] sm:$0xff] %v2478_v12  ;;  %v2480_v22 = vsub.f32 1.0, %v1968_v13  ;;  %v1970_v23 = vmax.f32 %v3939_v16, 0.0  ;;  %3952 = vtanh.f32 %v953_v4  ;;  %v968_v15 = vmul.f32 0.5, %v456_v1  ;;  %v459_v16 = vld [vmem:[#allocation2 + $0xd90] sm:$0xff] }
 0x1aa   :  { %v3943_v26 = vpop.eup %3942  ;;  %2991 = vst [vmem:[#allocation5 + $0xcb0] sm:$0xff] %v2479_v17  ;;  %v2481_v27 = vsub.f32 1.0, %v1969_v18  ;;  %v1971_v28 = vmax.f32 %v3941_v21, 0.0  ;;  %3954 = vtanh.f32 %v954_v9  ;;  %v969_v20 = vmul.f32 0.5, %v457_v6  ;;  %v460_v21 = vld [vmem:[#allocation2 + $0xd98] sm:$0xff] }
 0x1ab   :  { %v3945_v31 = vpop.eup %3944  ;;  %2992 = vst [vmem:[#allocation5 + $0xcb8] sm:$0xff] %v2480_v22  ;;  %v2482_v32 = vsub.f32 1.0, %v1970_v23  ;;  %v1972_v33 = vmax.f32 %v3943_v26, 0.0  ;;  %3956 = vtanh.f32 %v955_v14  ;;  %v970_v25 = vmul.f32 0.5, %v458_v11  ;;  %v461_v26 = vld [vmem:[#allocation2 + $0xda0] sm:$0xff] }
 0x1ac   :  { %v3947_v36 = vpop.eup %3946  ;;  %2993 = vst [vmem:[#allocation5 + $0xcc0] sm:$0xff] %v2481_v27  ;;  %v2483_v37 = vsub.f32 1.0, %v1971_v28  ;;  %v1973_v38 = vmax.f32 %v3945_v31, 0.0  ;;  %3958 = vtanh.f32 %v956_v19  ;;  %v971_v30 = vmul.f32 0.5, %v459_v16  ;;  %v462_v31 = vld [vmem:[#allocation2 + $0xda8] sm:$0xff] }
 0x1ad   :  { %v3949_v41 = vpop.eup %3948  ;;  %2994 = vst [vmem:[#allocation5 + $0xcc8] sm:$0xff] %v2482_v32  ;;  %v2484_v42 = vsub.f32 1.0, %v1972_v33  ;;  %v1974_v43 = vmax.f32 %v3947_v36, 0.0  ;;  %3960 = vtanh.f32 %v957_v24  ;;  %v972_v35 = vmul.f32 0.5, %v460_v21  ;;  %v463_v36 = vld [vmem:[#allocation2 + $0xdb0] sm:$0xff] }
 0x1ae   :  { %v3951_v46 = vpop.eup %3950  ;;  %2995 = vst [vmem:[#allocation5 + $0xcd0] sm:$0xff] %v2483_v37  ;;  %v2485_v47 = vsub.f32 1.0, %v1973_v38  ;;  %v1975_v48 = vmax.f32 %v3949_v41, 0.0  ;;  %3962 = vtanh.f32 %v958_v29  ;;  %v973_v40 = vmul.f32 0.5, %v461_v26  ;;  %v464_v41 = vld [vmem:[#allocation2 + $0xdb8] sm:$0xff] }
 0x1af   :  { %v3953_v51 = vpop.eup %3952  ;;  %2996 = vst [vmem:[#allocation5 + $0xcd8] sm:$0xff] %v2484_v42  ;;  %v2486_v52 = vsub.f32 1.0, %v1974_v43  ;;  %v1976_v53 = vmax.f32 %v3951_v46, 0.0  ;;  %3964 = vtanh.f32 %v959_v34  ;;  %v974_v45 = vmul.f32 0.5, %v462_v31  ;;  %v465_v46 = vld [vmem:[#allocation2 + $0xdc0] sm:$0xff] }
 0x1b0   :  { %v3955_v56 = vpop.eup %3954  ;;  %2997 = vst [vmem:[#allocation5 + $0xce0] sm:$0xff] %v2485_v47  ;;  %v2487_v57 = vsub.f32 1.0, %v1975_v48  ;;  %v1977_v58 = vmax.f32 %v3953_v51, 0.0  ;;  %3966 = vtanh.f32 %v960_v39  ;;  %v975_v50 = vmul.f32 0.5, %v463_v36  ;;  %v466_v51 = vld [vmem:[#allocation2 + $0xdc8] sm:$0xff] }
 0x1b1   :  { %v3957_v61 = vpop.eup %3956  ;;  %2998 = vst [vmem:[#allocation5 + $0xce8] sm:$0xff] %v2486_v52  ;;  %v2488_v62 = vsub.f32 1.0, %v1976_v53  ;;  %v1978_v63 = vmax.f32 %v3955_v56, 0.0  ;;  %3968 = vtanh.f32 %v961_v44  ;;  %v976_v55 = vmul.f32 0.5, %v464_v41  ;;  %v467_v56 = vld [vmem:[#allocation2 + $0xdd0] sm:$0xff] }
 0x1b2   :  { %v3959_v2 = vpop.eup %3958  ;;  %2999 = vst [vmem:[#allocation5 + $0xcf0] sm:$0xff] %v2487_v57  ;;  %v2489_v3 = vsub.f32 1.0, %v1977_v58  ;;  %v1979_v4 = vmax.f32 %v3957_v61, 0.0  ;;  %3970 = vtanh.f32 %v962_v49  ;;  %v977_v60 = vmul.f32 0.5, %v465_v46  ;;  %v468_v61 = vld [vmem:[#allocation2 + $0xdd8] sm:$0xff] }
 0x1b3   :  { %v3961_v7 = vpop.eup %3960  ;;  %3000 = vst [vmem:[#allocation5 + $0xcf8] sm:$0xff] %v2488_v62  ;;  %v2490_v8 = vsub.f32 1.0, %v1978_v63  ;;  %v1980_v9 = vmax.f32 %v3959_v2, 0.0  ;;  %3972 = vtanh.f32 %v963_v54  ;;  %v978_v1 = vmul.f32 0.5, %v466_v51  ;;  %v469_v2 = vld [vmem:[#allocation2 + $0xde0] sm:$0xff] }
 0x1b4   :  { %v3963_v12 = vpop.eup %3962  ;;  %3001 = vst [vmem:[#allocation5 + $0xd00] sm:$0xff] %v2489_v3  ;;  %v2491_v13 = vsub.f32 1.0, %v1979_v4  ;;  %v1981_v14 = vmax.f32 %v3961_v7, 0.0  ;;  %3974 = vtanh.f32 %v964_v59  ;;  %v979_v6 = vmul.f32 0.5, %v467_v56  ;;  %v470_v7 = vld [vmem:[#allocation2 + $0xde8] sm:$0xff] }
 0x1b5   :  { %v3965_v17 = vpop.eup %3964  ;;  %3002 = vst [vmem:[#allocation5 + $0xd08] sm:$0xff] %v2490_v8  ;;  %v2492_v18 = vsub.f32 1.0, %v1980_v9  ;;  %v1982_v19 = vmax.f32 %v3963_v12, 0.0  ;;  %3976 = vtanh.f32 %v965_v0  ;;  %v980_v11 = vmul.f32 0.5, %v468_v61  ;;  %v471_v12 = vld [vmem:[#allocation2 + $0xdf0] sm:$0xff] }
 0x1b6   :  { %v3967_v22 = vpop.eup %3966  ;;  %3003 = vst [vmem:[#allocation5 + $0xd10] sm:$0xff] %v2491_v13  ;;  %v2493_v23 = vsub.f32 1.0, %v1981_v14  ;;  %v1983_v24 = vmax.f32 %v3965_v17, 0.0  ;;  %3978 = vtanh.f32 %v966_v5  ;;  %v981_v16 = vmul.f32 0.5, %v469_v2  ;;  %v472_v17 = vld [vmem:[#allocation2 + $0xdf8] sm:$0xff] }
 0x1b7   :  { %v3969_v27 = vpop.eup %3968  ;;  %3004 = vst [vmem:[#allocation5 + $0xd18] sm:$0xff] %v2492_v18  ;;  %v2494_v28 = vsub.f32 1.0, %v1982_v19  ;;  %v1984_v29 = vmax.f32 %v3967_v22, 0.0  ;;  %3980 = vtanh.f32 %v967_v10  ;;  %v982_v21 = vmul.f32 0.5, %v470_v7  ;;  %v473_v22 = vld [vmem:[#allocation2 + $0xe00] sm:$0xff] }
 0x1b8   :  { %v3971_v32 = vpop.eup %3970  ;;  %3005 = vst [vmem:[#allocation5 + $0xd20] sm:$0xff] %v2493_v23  ;;  %v2495_v33 = vsub.f32 1.0, %v1983_v24  ;;  %v1985_v34 = vmax.f32 %v3969_v27, 0.0  ;;  %3982 = vtanh.f32 %v968_v15  ;;  %v983_v26 = vmul.f32 0.5, %v471_v12  ;;  %v474_v27 = vld [vmem:[#allocation2 + $0xe08] sm:$0xff] }
 0x1b9   :  { %v3973_v37 = vpop.eup %3972  ;;  %3006 = vst [vmem:[#allocation5 + $0xd28] sm:$0xff] %v2494_v28  ;;  %v2496_v38 = vsub.f32 1.0, %v1984_v29  ;;  %v1986_v39 = vmax.f32 %v3971_v32, 0.0  ;;  %3984 = vtanh.f32 %v969_v20  ;;  %v984_v31 = vmul.f32 0.5, %v472_v17  ;;  %v475_v32 = vld [vmem:[#allocation2 + $0xe10] sm:$0xff] }
 0x1ba   :  { %v3975_v42 = vpop.eup %3974  ;;  %3007 = vst [vmem:[#allocation5 + $0xd30] sm:$0xff] %v2495_v33  ;;  %v2497_v43 = vsub.f32 1.0, %v1985_v34  ;;  %v1987_v44 = vmax.f32 %v3973_v37, 0.0  ;;  %3986 = vtanh.f32 %v970_v25  ;;  %v985_v36 = vmul.f32 0.5, %v473_v22  ;;  %v476_v37 = vld [vmem:[#allocation2 + $0xe18] sm:$0xff] }
 0x1bb   :  { %v3977_v47 = vpop.eup %3976  ;;  %3008 = vst [vmem:[#allocation5 + $0xd38] sm:$0xff] %v2496_v38  ;;  %v2498_v48 = vsub.f32 1.0, %v1986_v39  ;;  %v1988_v49 = vmax.f32 %v3975_v42, 0.0  ;;  %3988 = vtanh.f32 %v971_v30  ;;  %v986_v41 = vmul.f32 0.5, %v474_v27  ;;  %v477_v42 = vld [vmem:[#allocation2 + $0xe20] sm:$0xff] }
 0x1bc   :  { %v3979_v52 = vpop.eup %3978  ;;  %3009 = vst [vmem:[#allocation5 + $0xd40] sm:$0xff] %v2497_v43  ;;  %v2499_v53 = vsub.f32 1.0, %v1987_v44  ;;  %v1989_v54 = vmax.f32 %v3977_v47, 0.0  ;;  %3990 = vtanh.f32 %v972_v35  ;;  %v987_v46 = vmul.f32 0.5, %v475_v32  ;;  %v478_v47 = vld [vmem:[#allocation2 + $0xe28] sm:$0xff] }
 0x1bd   :  { %v3981_v57 = vpop.eup %3980  ;;  %3010 = vst [vmem:[#allocation5 + $0xd48] sm:$0xff] %v2498_v48  ;;  %v2500_v58 = vsub.f32 1.0, %v1988_v49  ;;  %v1990_v59 = vmax.f32 %v3979_v52, 0.0  ;;  %3992 = vtanh.f32 %v973_v40  ;;  %v988_v51 = vmul.f32 0.5, %v476_v37  ;;  %v479_v52 = vld [vmem:[#allocation2 + $0xe30] sm:$0xff] }
 0x1be   :  { %v3983_v62 = vpop.eup %3982  ;;  %3011 = vst [vmem:[#allocation5 + $0xd50] sm:$0xff] %v2499_v53  ;;  %v2501_v63 = vsub.f32 1.0, %v1989_v54  ;;  %v1991_v0 = vmax.f32 %v3981_v57, 0.0  ;;  %3994 = vtanh.f32 %v974_v45  ;;  %v989_v56 = vmul.f32 0.5, %v477_v42  ;;  %v480_v57 = vld [vmem:[#allocation2 + $0xe38] sm:$0xff] }
 0x1bf   :  { %v3985_v3 = vpop.eup %3984  ;;  %3012 = vst [vmem:[#allocation5 + $0xd58] sm:$0xff] %v2500_v58  ;;  %v2502_v4 = vsub.f32 1.0, %v1990_v59  ;;  %v1992_v5 = vmax.f32 %v3983_v62, 0.0  ;;  %3996 = vtanh.f32 %v975_v50  ;;  %v990_v61 = vmul.f32 0.5, %v478_v47  ;;  %v481_v62 = vld [vmem:[#allocation2 + $0xe40] sm:$0xff] }
 0x1c0   :  { %v3987_v8 = vpop.eup %3986  ;;  %3013 = vst [vmem:[#allocation5 + $0xd60] sm:$0xff] %v2501_v63  ;;  %v2503_v9 = vsub.f32 1.0, %v1991_v0  ;;  %v1993_v10 = vmax.f32 %v3985_v3, 0.0  ;;  %3998 = vtanh.f32 %v976_v55  ;;  %v991_v2 = vmul.f32 0.5, %v479_v52  ;;  %v482_v3 = vld [vmem:[#allocation2 + $0xe48] sm:$0xff] }
 0x1c1   :  { %v3989_v13 = vpop.eup %3988  ;;  %3014 = vst [vmem:[#allocation5 + $0xd68] sm:$0xff] %v2502_v4  ;;  %v2504_v14 = vsub.f32 1.0, %v1992_v5  ;;  %v1994_v15 = vmax.f32 %v3987_v8, 0.0  ;;  %4000 = vtanh.f32 %v977_v60  ;;  %v992_v7 = vmul.f32 0.5, %v480_v57  ;;  %v483_v8 = vld [vmem:[#allocation2 + $0xe50] sm:$0xff] }
 0x1c2   :  { %v3991_v18 = vpop.eup %3990  ;;  %3015 = vst [vmem:[#allocation5 + $0xd70] sm:$0xff] %v2503_v9  ;;  %v2505_v19 = vsub.f32 1.0, %v1993_v10  ;;  %v1995_v20 = vmax.f32 %v3989_v13, 0.0  ;;  %4002 = vtanh.f32 %v978_v1  ;;  %v993_v12 = vmul.f32 0.5, %v481_v62  ;;  %v484_v13 = vld [vmem:[#allocation2 + $0xe58] sm:$0xff] }
 0x1c3   :  { %v3993_v23 = vpop.eup %3992  ;;  %3016 = vst [vmem:[#allocation5 + $0xd78] sm:$0xff] %v2504_v14  ;;  %v2506_v24 = vsub.f32 1.0, %v1994_v15  ;;  %v1996_v25 = vmax.f32 %v3991_v18, 0.0  ;;  %4004 = vtanh.f32 %v979_v6  ;;  %v994_v17 = vmul.f32 0.5, %v482_v3  ;;  %v485_v18 = vld [vmem:[#allocation2 + $0xe60] sm:$0xff] }
 0x1c4   :  { %v3995_v28 = vpop.eup %3994  ;;  %3017 = vst [vmem:[#allocation5 + $0xd80] sm:$0xff] %v2505_v19  ;;  %v2507_v29 = vsub.f32 1.0, %v1995_v20  ;;  %v1997_v30 = vmax.f32 %v3993_v23, 0.0  ;;  %4006 = vtanh.f32 %v980_v11  ;;  %v995_v22 = vmul.f32 0.5, %v483_v8  ;;  %v486_v23 = vld [vmem:[#allocation2 + $0xe68] sm:$0xff] }
 0x1c5   :  { %v3997_v33 = vpop.eup %3996  ;;  %3018 = vst [vmem:[#allocation5 + $0xd88] sm:$0xff] %v2506_v24  ;;  %v2508_v34 = vsub.f32 1.0, %v1996_v25  ;;  %v1998_v35 = vmax.f32 %v3995_v28, 0.0  ;;  %4008 = vtanh.f32 %v981_v16  ;;  %v996_v27 = vmul.f32 0.5, %v484_v13  ;;  %v487_v28 = vld [vmem:[#allocation2 + $0xe70] sm:$0xff] }
 0x1c6   :  { %v3999_v38 = vpop.eup %3998  ;;  %3019 = vst [vmem:[#allocation5 + $0xd90] sm:$0xff] %v2507_v29  ;;  %v2509_v39 = vsub.f32 1.0, %v1997_v30  ;;  %v1999_v40 = vmax.f32 %v3997_v33, 0.0  ;;  %4010 = vtanh.f32 %v982_v21  ;;  %v997_v32 = vmul.f32 0.5, %v485_v18  ;;  %v488_v33 = vld [vmem:[#allocation2 + $0xe78] sm:$0xff] }
 0x1c7   :  { %v4001_v43 = vpop.eup %4000  ;;  %3020 = vst [vmem:[#allocation5 + $0xd98] sm:$0xff] %v2508_v34  ;;  %v2510_v44 = vsub.f32 1.0, %v1998_v35  ;;  %v2000_v45 = vmax.f32 %v3999_v38, 0.0  ;;  %4012 = vtanh.f32 %v983_v26  ;;  %v998_v37 = vmul.f32 0.5, %v486_v23  ;;  %v489_v38 = vld [vmem:[#allocation2 + $0xe80] sm:$0xff] }
 0x1c8   :  { %v4003_v48 = vpop.eup %4002  ;;  %3021 = vst [vmem:[#allocation5 + $0xda0] sm:$0xff] %v2509_v39  ;;  %v2511_v49 = vsub.f32 1.0, %v1999_v40  ;;  %v2001_v50 = vmax.f32 %v4001_v43, 0.0  ;;  %4014 = vtanh.f32 %v984_v31  ;;  %v999_v42 = vmul.f32 0.5, %v487_v28  ;;  %v490_v43 = vld [vmem:[#allocation2 + $0xe88] sm:$0xff] }
 0x1c9   :  { %v4005_v53 = vpop.eup %4004  ;;  %3022 = vst [vmem:[#allocation5 + $0xda8] sm:$0xff] %v2510_v44  ;;  %v2512_v54 = vsub.f32 1.0, %v2000_v45  ;;  %v2002_v55 = vmax.f32 %v4003_v48, 0.0  ;;  %4016 = vtanh.f32 %v985_v36  ;;  %v1000_v47 = vmul.f32 0.5, %v488_v33  ;;  %v491_v48 = vld [vmem:[#allocation2 + $0xe90] sm:$0xff] }
 0x1ca   :  { %v4007_v58 = vpop.eup %4006  ;;  %3023 = vst [vmem:[#allocation5 + $0xdb0] sm:$0xff] %v2511_v49  ;;  %v2513_v59 = vsub.f32 1.0, %v2001_v50  ;;  %v2003_v60 = vmax.f32 %v4005_v53, 0.0  ;;  %4018 = vtanh.f32 %v986_v41  ;;  %v1001_v52 = vmul.f32 0.5, %v489_v38  ;;  %v492_v53 = vld [vmem:[#allocation2 + $0xe98] sm:$0xff] }
 0x1cb   :  { %v4009_v63 = vpop.eup %4008  ;;  %3024 = vst [vmem:[#allocation5 + $0xdb8] sm:$0xff] %v2512_v54  ;;  %v2514_v0 = vsub.f32 1.0, %v2002_v55  ;;  %v2004_v1 = vmax.f32 %v4007_v58, 0.0  ;;  %4020 = vtanh.f32 %v987_v46  ;;  %v1002_v57 = vmul.f32 0.5, %v490_v43  ;;  %v493_v58 = vld [vmem:[#allocation2 + $0xea0] sm:$0xff] }
 0x1cc   :  { %v4011_v4 = vpop.eup %4010  ;;  %3025 = vst [vmem:[#allocation5 + $0xdc0] sm:$0xff] %v2513_v59  ;;  %v2515_v5 = vsub.f32 1.0, %v2003_v60  ;;  %v2005_v6 = vmax.f32 %v4009_v63, 0.0  ;;  %4022 = vtanh.f32 %v988_v51  ;;  %v1003_v62 = vmul.f32 0.5, %v491_v48  ;;  %v494_v63 = vld [vmem:[#allocation2 + $0xea8] sm:$0xff] }
 0x1cd   :  { %v4013_v9 = vpop.eup %4012  ;;  %3026 = vst [vmem:[#allocation5 + $0xdc8] sm:$0xff] %v2514_v0  ;;  %v2516_v10 = vsub.f32 1.0, %v2004_v1  ;;  %v2006_v11 = vmax.f32 %v4011_v4, 0.0  ;;  %4024 = vtanh.f32 %v989_v56  ;;  %v1004_v3 = vmul.f32 0.5, %v492_v53  ;;  %v495_v4 = vld [vmem:[#allocation2 + $0xeb0] sm:$0xff] }
 0x1ce   :  { %v4015_v14 = vpop.eup %4014  ;;  %3027 = vst [vmem:[#allocation5 + $0xdd0] sm:$0xff] %v2515_v5  ;;  %v2517_v15 = vsub.f32 1.0, %v2005_v6  ;;  %v2007_v16 = vmax.f32 %v4013_v9, 0.0  ;;  %4026 = vtanh.f32 %v990_v61  ;;  %v1005_v8 = vmul.f32 0.5, %v493_v58  ;;  %v496_v9 = vld [vmem:[#allocation2 + $0xeb8] sm:$0xff] }
 0x1cf   :  { %v4017_v19 = vpop.eup %4016  ;;  %3028 = vst [vmem:[#allocation5 + $0xdd8] sm:$0xff] %v2516_v10  ;;  %v2518_v20 = vsub.f32 1.0, %v2006_v11  ;;  %v2008_v21 = vmax.f32 %v4015_v14, 0.0  ;;  %4028 = vtanh.f32 %v991_v2  ;;  %v1006_v13 = vmul.f32 0.5, %v494_v63  ;;  %v497_v14 = vld [vmem:[#allocation2 + $0xec0] sm:$0xff] }
 0x1d0   :  { %v4019_v24 = vpop.eup %4018  ;;  %3029 = vst [vmem:[#allocation5 + $0xde0] sm:$0xff] %v2517_v15  ;;  %v2519_v25 = vsub.f32 1.0, %v2007_v16  ;;  %v2009_v26 = vmax.f32 %v4017_v19, 0.0  ;;  %4030 = vtanh.f32 %v992_v7  ;;  %v1007_v18 = vmul.f32 0.5, %v495_v4  ;;  %v498_v19 = vld [vmem:[#allocation2 + $0xec8] sm:$0xff] }
 0x1d1   :  { %v4021_v29 = vpop.eup %4020  ;;  %3030 = vst [vmem:[#allocation5 + $0xde8] sm:$0xff] %v2518_v20  ;;  %v2520_v30 = vsub.f32 1.0, %v2008_v21  ;;  %v2010_v31 = vmax.f32 %v4019_v24, 0.0  ;;  %4032 = vtanh.f32 %v993_v12  ;;  %v1008_v23 = vmul.f32 0.5, %v496_v9  ;;  %v499_v24 = vld [vmem:[#allocation2 + $0xed0] sm:$0xff] }
 0x1d2   :  { %v4023_v34 = vpop.eup %4022  ;;  %3031 = vst [vmem:[#allocation5 + $0xdf0] sm:$0xff] %v2519_v25  ;;  %v2521_v35 = vsub.f32 1.0, %v2009_v26  ;;  %v2011_v36 = vmax.f32 %v4021_v29, 0.0  ;;  %4034 = vtanh.f32 %v994_v17  ;;  %v1009_v28 = vmul.f32 0.5, %v497_v14  ;;  %v500_v29 = vld [vmem:[#allocation2 + $0xed8] sm:$0xff] }
 0x1d3   :  { %v4025_v39 = vpop.eup %4024  ;;  %3032 = vst [vmem:[#allocation5 + $0xdf8] sm:$0xff] %v2520_v30  ;;  %v2522_v40 = vsub.f32 1.0, %v2010_v31  ;;  %v2012_v41 = vmax.f32 %v4023_v34, 0.0  ;;  %4036 = vtanh.f32 %v995_v22  ;;  %v1010_v33 = vmul.f32 0.5, %v498_v19  ;;  %v501_v34 = vld [vmem:[#allocation2 + $0xee0] sm:$0xff] }
 0x1d4   :  { %v4027_v44 = vpop.eup %4026  ;;  %3033 = vst [vmem:[#allocation5 + $0xe00] sm:$0xff] %v2521_v35  ;;  %v2523_v45 = vsub.f32 1.0, %v2011_v36  ;;  %v2013_v46 = vmax.f32 %v4025_v39, 0.0  ;;  %4038 = vtanh.f32 %v996_v27  ;;  %v1011_v38 = vmul.f32 0.5, %v499_v24  ;;  %v502_v39 = vld [vmem:[#allocation2 + $0xee8] sm:$0xff] }
 0x1d5   :  { %v4029_v49 = vpop.eup %4028  ;;  %3034 = vst [vmem:[#allocation5 + $0xe08] sm:$0xff] %v2522_v40  ;;  %v2524_v50 = vsub.f32 1.0, %v2012_v41  ;;  %v2014_v51 = vmax.f32 %v4027_v44, 0.0  ;;  %4040 = vtanh.f32 %v997_v32  ;;  %v1012_v43 = vmul.f32 0.5, %v500_v29  ;;  %v503_v44 = vld [vmem:[#allocation2 + $0xef0] sm:$0xff] }
 0x1d6   :  { %v4031_v54 = vpop.eup %4030  ;;  %3035 = vst [vmem:[#allocation5 + $0xe10] sm:$0xff] %v2523_v45  ;;  %v2525_v55 = vsub.f32 1.0, %v2013_v46  ;;  %v2015_v56 = vmax.f32 %v4029_v49, 0.0  ;;  %4042 = vtanh.f32 %v998_v37  ;;  %v1013_v48 = vmul.f32 0.5, %v501_v34  ;;  %v504_v49 = vld [vmem:[#allocation2 + $0xef8] sm:$0xff] }
 0x1d7   :  { %v4033_v59 = vpop.eup %4032  ;;  %3036 = vst [vmem:[#allocation5 + $0xe18] sm:$0xff] %v2524_v50  ;;  %v2526_v60 = vsub.f32 1.0, %v2014_v51  ;;  %v2016_v61 = vmax.f32 %v4031_v54, 0.0  ;;  %4044 = vtanh.f32 %v999_v42  ;;  %v1014_v53 = vmul.f32 0.5, %v502_v39  ;;  %v505_v54 = vld [vmem:[#allocation2 + $0xf00] sm:$0xff] }
 0x1d8   :  { %v4035_v0 = vpop.eup %4034  ;;  %3037 = vst [vmem:[#allocation5 + $0xe20] sm:$0xff] %v2525_v55  ;;  %v2527_v1 = vsub.f32 1.0, %v2015_v56  ;;  %v2017_v2 = vmax.f32 %v4033_v59, 0.0  ;;  %4046 = vtanh.f32 %v1000_v47  ;;  %v1015_v58 = vmul.f32 0.5, %v503_v44  ;;  %v506_v59 = vld [vmem:[#allocation2 + $0xf08] sm:$0xff] }
 0x1d9   :  { %v4037_v5 = vpop.eup %4036  ;;  %3038 = vst [vmem:[#allocation5 + $0xe28] sm:$0xff] %v2526_v60  ;;  %v2528_v6 = vsub.f32 1.0, %v2016_v61  ;;  %v2018_v7 = vmax.f32 %v4035_v0, 0.0  ;;  %4048 = vtanh.f32 %v1001_v52  ;;  %v1016_v63 = vmul.f32 0.5, %v504_v49  ;;  %v507_v0 = vld [vmem:[#allocation2 + $0xf10] sm:$0xff] }
 0x1da   :  { %v4039_v10 = vpop.eup %4038  ;;  %3039 = vst [vmem:[#allocation5 + $0xe30] sm:$0xff] %v2527_v1  ;;  %v2529_v11 = vsub.f32 1.0, %v2017_v2  ;;  %v2019_v12 = vmax.f32 %v4037_v5, 0.0  ;;  %4050 = vtanh.f32 %v1002_v57  ;;  %v1017_v4 = vmul.f32 0.5, %v505_v54  ;;  %v508_v5 = vld [vmem:[#allocation2 + $0xf18] sm:$0xff] }
 0x1db   :  { %v4041_v15 = vpop.eup %4040  ;;  %3040 = vst [vmem:[#allocation5 + $0xe38] sm:$0xff] %v2528_v6  ;;  %v2530_v16 = vsub.f32 1.0, %v2018_v7  ;;  %v2020_v17 = vmax.f32 %v4039_v10, 0.0  ;;  %4052 = vtanh.f32 %v1003_v62  ;;  %v1018_v9 = vmul.f32 0.5, %v506_v59  ;;  %v509_v10 = vld [vmem:[#allocation2 + $0xf20] sm:$0xff] }
 0x1dc   :  { %v4043_v20 = vpop.eup %4042  ;;  %3041 = vst [vmem:[#allocation5 + $0xe40] sm:$0xff] %v2529_v11  ;;  %v2531_v21 = vsub.f32 1.0, %v2019_v12  ;;  %v2021_v22 = vmax.f32 %v4041_v15, 0.0  ;;  %4054 = vtanh.f32 %v1004_v3  ;;  %v1019_v14 = vmul.f32 0.5, %v507_v0  ;;  %v510_v15 = vld [vmem:[#allocation2 + $0xf28] sm:$0xff] }
 0x1dd   :  { %v4045_v25 = vpop.eup %4044  ;;  %3042 = vst [vmem:[#allocation5 + $0xe48] sm:$0xff] %v2530_v16  ;;  %v2532_v26 = vsub.f32 1.0, %v2020_v17  ;;  %v2022_v27 = vmax.f32 %v4043_v20, 0.0  ;;  %4056 = vtanh.f32 %v1005_v8  ;;  %v1020_v19 = vmul.f32 0.5, %v508_v5  ;;  %v511_v20 = vld [vmem:[#allocation2 + $0xf30] sm:$0xff] }
 0x1de   :  { %v4047_v30 = vpop.eup %4046  ;;  %3043 = vst [vmem:[#allocation5 + $0xe50] sm:$0xff] %v2531_v21  ;;  %v2533_v31 = vsub.f32 1.0, %v2021_v22  ;;  %v2023_v32 = vmax.f32 %v4045_v25, 0.0  ;;  %4058 = vtanh.f32 %v1006_v13  ;;  %v1021_v24 = vmul.f32 0.5, %v509_v10  ;;  %v512_v25 = vld [vmem:[#allocation2 + $0xf38] sm:$0xff] }
 0x1df   :  { %v4049_v35 = vpop.eup %4048  ;;  %3044 = vst [vmem:[#allocation5 + $0xe58] sm:$0xff] %v2532_v26  ;;  %v2534_v36 = vsub.f32 1.0, %v2022_v27  ;;  %v2024_v37 = vmax.f32 %v4047_v30, 0.0  ;;  %4060 = vtanh.f32 %v1007_v18  ;;  %v1022_v29 = vmul.f32 0.5, %v510_v15  ;;  %v513_v30 = vld [vmem:[#allocation2 + $0xf40] sm:$0xff] }
 0x1e0   :  { %v4051_v40 = vpop.eup %4050  ;;  %3045 = vst [vmem:[#allocation5 + $0xe60] sm:$0xff] %v2533_v31  ;;  %v2535_v41 = vsub.f32 1.0, %v2023_v32  ;;  %v2025_v42 = vmax.f32 %v4049_v35, 0.0  ;;  %4062 = vtanh.f32 %v1008_v23  ;;  %v1023_v34 = vmul.f32 0.5, %v511_v20  ;;  %v514_v35 = vld [vmem:[#allocation2 + $0xf48] sm:$0xff] }
 0x1e1   :  { %v4053_v45 = vpop.eup %4052  ;;  %3046 = vst [vmem:[#allocation5 + $0xe68] sm:$0xff] %v2534_v36  ;;  %v2536_v46 = vsub.f32 1.0, %v2024_v37  ;;  %v2026_v47 = vmax.f32 %v4051_v40, 0.0  ;;  %4064 = vtanh.f32 %v1009_v28  ;;  %v1024_v39 = vmul.f32 0.5, %v512_v25  ;;  %v515_v40 = vld [vmem:[#allocation2 + $0xf50] sm:$0xff] }
 0x1e2   :  { %v4055_v50 = vpop.eup %4054  ;;  %3047 = vst [vmem:[#allocation5 + $0xe70] sm:$0xff] %v2535_v41  ;;  %v2537_v51 = vsub.f32 1.0, %v2025_v42  ;;  %v2027_v52 = vmax.f32 %v4053_v45, 0.0  ;;  %4066 = vtanh.f32 %v1010_v33  ;;  %v1025_v44 = vmul.f32 0.5, %v513_v30  ;;  %v516_v45 = vld [vmem:[#allocation2 + $0xf58] sm:$0xff] }
 0x1e3   :  { %v4057_v55 = vpop.eup %4056  ;;  %3048 = vst [vmem:[#allocation5 + $0xe78] sm:$0xff] %v2536_v46  ;;  %v2538_v56 = vsub.f32 1.0, %v2026_v47  ;;  %v2028_v57 = vmax.f32 %v4055_v50, 0.0  ;;  %4068 = vtanh.f32 %v1011_v38  ;;  %v1026_v49 = vmul.f32 0.5, %v514_v35  ;;  %v517_v50 = vld [vmem:[#allocation2 + $0xf60] sm:$0xff] }
 0x1e4   :  { %v4059_v60 = vpop.eup %4058  ;;  %3049 = vst [vmem:[#allocation5 + $0xe80] sm:$0xff] %v2537_v51  ;;  %v2539_v61 = vsub.f32 1.0, %v2027_v52  ;;  %v2029_v62 = vmax.f32 %v4057_v55, 0.0  ;;  %4070 = vtanh.f32 %v1012_v43  ;;  %v1027_v54 = vmul.f32 0.5, %v515_v40  ;;  %v518_v55 = vld [vmem:[#allocation2 + $0xf68] sm:$0xff] }
 0x1e5   :  { %v4061_v1 = vpop.eup %4060  ;;  %3050 = vst [vmem:[#allocation5 + $0xe88] sm:$0xff] %v2538_v56  ;;  %v2540_v2 = vsub.f32 1.0, %v2028_v57  ;;  %v2030_v3 = vmax.f32 %v4059_v60, 0.0  ;;  %4072 = vtanh.f32 %v1013_v48  ;;  %v1028_v59 = vmul.f32 0.5, %v516_v45  ;;  %v519_v60 = vld [vmem:[#allocation2 + $0xf70] sm:$0xff] }
 0x1e6   :  { %v4063_v6 = vpop.eup %4062  ;;  %3051 = vst [vmem:[#allocation5 + $0xe90] sm:$0xff] %v2539_v61  ;;  %v2541_v7 = vsub.f32 1.0, %v2029_v62  ;;  %v2031_v8 = vmax.f32 %v4061_v1, 0.0  ;;  %4074 = vtanh.f32 %v1014_v53  ;;  %v1029_v0 = vmul.f32 0.5, %v517_v50  ;;  %v520_v1 = vld [vmem:[#allocation2 + $0xf78] sm:$0xff] }
 0x1e7   :  { %v4065_v11 = vpop.eup %4064  ;;  %3052 = vst [vmem:[#allocation5 + $0xe98] sm:$0xff] %v2540_v2  ;;  %v2542_v12 = vsub.f32 1.0, %v2030_v3  ;;  %v2032_v13 = vmax.f32 %v4063_v6, 0.0  ;;  %4076 = vtanh.f32 %v1015_v58  ;;  %v1030_v5 = vmul.f32 0.5, %v518_v55  ;;  %v521_v6 = vld [vmem:[#allocation2 + $0xf80] sm:$0xff] }
 0x1e8   :  { %v4067_v16 = vpop.eup %4066  ;;  %3053 = vst [vmem:[#allocation5 + $0xea0] sm:$0xff] %v2541_v7  ;;  %v2543_v17 = vsub.f32 1.0, %v2031_v8  ;;  %v2033_v18 = vmax.f32 %v4065_v11, 0.0  ;;  %4078 = vtanh.f32 %v1016_v63  ;;  %v1031_v10 = vmul.f32 0.5, %v519_v60  ;;  %v522_v11 = vld [vmem:[#allocation2 + $0xf88] sm:$0xff] }
 0x1e9   :  { %v4069_v21 = vpop.eup %4068  ;;  %3054 = vst [vmem:[#allocation5 + $0xea8] sm:$0xff] %v2542_v12  ;;  %v2544_v22 = vsub.f32 1.0, %v2032_v13  ;;  %v2034_v23 = vmax.f32 %v4067_v16, 0.0  ;;  %4080 = vtanh.f32 %v1017_v4  ;;  %v1032_v15 = vmul.f32 0.5, %v520_v1  ;;  %v523_v16 = vld [vmem:[#allocation2 + $0xf90] sm:$0xff] }
 0x1ea   :  { %v4071_v26 = vpop.eup %4070  ;;  %3055 = vst [vmem:[#allocation5 + $0xeb0] sm:$0xff] %v2543_v17  ;;  %v2545_v27 = vsub.f32 1.0, %v2033_v18  ;;  %v2035_v28 = vmax.f32 %v4069_v21, 0.0  ;;  %4082 = vtanh.f32 %v1018_v9  ;;  %v1033_v20 = vmul.f32 0.5, %v521_v6  ;;  %v524_v21 = vld [vmem:[#allocation2 + $0xf98] sm:$0xff] }
 0x1eb   :  { %v4073_v31 = vpop.eup %4072  ;;  %3056 = vst [vmem:[#allocation5 + $0xeb8] sm:$0xff] %v2544_v22  ;;  %v2546_v32 = vsub.f32 1.0, %v2034_v23  ;;  %v2036_v33 = vmax.f32 %v4071_v26, 0.0  ;;  %4084 = vtanh.f32 %v1019_v14  ;;  %v1034_v25 = vmul.f32 0.5, %v522_v11  ;;  %v525_v26 = vld [vmem:[#allocation2 + $0xfa0] sm:$0xff] }
 0x1ec   :  { %v4075_v36 = vpop.eup %4074  ;;  %3057 = vst [vmem:[#allocation5 + $0xec0] sm:$0xff] %v2545_v27  ;;  %v2547_v37 = vsub.f32 1.0, %v2035_v28  ;;  %v2037_v38 = vmax.f32 %v4073_v31, 0.0  ;;  %4086 = vtanh.f32 %v1020_v19  ;;  %v1035_v30 = vmul.f32 0.5, %v523_v16  ;;  %v526_v31 = vld [vmem:[#allocation2 + $0xfa8] sm:$0xff] }
 0x1ed   :  { %v4077_v41 = vpop.eup %4076  ;;  %3058 = vst [vmem:[#allocation5 + $0xec8] sm:$0xff] %v2546_v32  ;;  %v2548_v42 = vsub.f32 1.0, %v2036_v33  ;;  %v2038_v43 = vmax.f32 %v4075_v36, 0.0  ;;  %4088 = vtanh.f32 %v1021_v24  ;;  %v1036_v35 = vmul.f32 0.5, %v524_v21  ;;  %v527_v36 = vld [vmem:[#allocation2 + $0xfb0] sm:$0xff] }
 0x1ee   :  { %v4079_v46 = vpop.eup %4078  ;;  %3059 = vst [vmem:[#allocation5 + $0xed0] sm:$0xff] %v2547_v37  ;;  %v2549_v47 = vsub.f32 1.0, %v2037_v38  ;;  %v2039_v48 = vmax.f32 %v4077_v41, 0.0  ;;  %4090 = vtanh.f32 %v1022_v29  ;;  %v1037_v40 = vmul.f32 0.5, %v525_v26  ;;  %v528_v41 = vld [vmem:[#allocation2 + $0xfb8] sm:$0xff] }
 0x1ef   :  { %v4081_v51 = vpop.eup %4080  ;;  %3060 = vst [vmem:[#allocation5 + $0xed8] sm:$0xff] %v2548_v42  ;;  %v2550_v52 = vsub.f32 1.0, %v2038_v43  ;;  %v2040_v53 = vmax.f32 %v4079_v46, 0.0  ;;  %4092 = vtanh.f32 %v1023_v34  ;;  %v1038_v45 = vmul.f32 0.5, %v526_v31  ;;  %v529_v46 = vld [vmem:[#allocation2 + $0xfc0] sm:$0xff] }
 0x1f0   :  { %v4083_v56 = vpop.eup %4082  ;;  %3061 = vst [vmem:[#allocation5 + $0xee0] sm:$0xff] %v2549_v47  ;;  %v2551_v57 = vsub.f32 1.0, %v2039_v48  ;;  %v2041_v58 = vmax.f32 %v4081_v51, 0.0  ;;  %4094 = vtanh.f32 %v1024_v39  ;;  %v1039_v50 = vmul.f32 0.5, %v527_v36  ;;  %v530_v51 = vld [vmem:[#allocation2 + $0xfc8] sm:$0xff] }
 0x1f1   :  { %v4085_v61 = vpop.eup %4084  ;;  %3062 = vst [vmem:[#allocation5 + $0xee8] sm:$0xff] %v2550_v52  ;;  %v2552_v62 = vsub.f32 1.0, %v2040_v53  ;;  %v2042_v63 = vmax.f32 %v4083_v56, 0.0  ;;  %4096 = vtanh.f32 %v1025_v44  ;;  %v1040_v55 = vmul.f32 0.5, %v528_v41  ;;  %v531_v56 = vld [vmem:[#allocation2 + $0xfd0] sm:$0xff] }
 0x1f2   :  { %v4087_v2 = vpop.eup %4086  ;;  %3063 = vst [vmem:[#allocation5 + $0xef0] sm:$0xff] %v2551_v57  ;;  %v2553_v3 = vsub.f32 1.0, %v2041_v58  ;;  %v2043_v4 = vmax.f32 %v4085_v61, 0.0  ;;  %4098 = vtanh.f32 %v1026_v49  ;;  %v1041_v60 = vmul.f32 0.5, %v529_v46  ;;  %v532_v61 = vld [vmem:[#allocation2 + $0xfd8] sm:$0xff] }
 0x1f3   :  { %v4089_v7 = vpop.eup %4088  ;;  %3064 = vst [vmem:[#allocation5 + $0xef8] sm:$0xff] %v2552_v62  ;;  %v2554_v8 = vsub.f32 1.0, %v2042_v63  ;;  %v2044_v9 = vmax.f32 %v4087_v2, 0.0  ;;  %4100 = vtanh.f32 %v1027_v54  ;;  %v1042_v1 = vmul.f32 0.5, %v530_v51  ;;  %v533_v2 = vld [vmem:[#allocation2 + $0xfe0] sm:$0xff] }
 0x1f4   :  { %v4091_v12 = vpop.eup %4090  ;;  %3065 = vst [vmem:[#allocation5 + $0xf00] sm:$0xff] %v2553_v3  ;;  %v2555_v13 = vsub.f32 1.0, %v2043_v4  ;;  %v2045_v14 = vmax.f32 %v4089_v7, 0.0  ;;  %4102 = vtanh.f32 %v1028_v59  ;;  %v1043_v6 = vmul.f32 0.5, %v531_v56  ;;  %v534_v7 = vld [vmem:[#allocation2 + $0xfe8] sm:$0xff] }
 0x1f5   :  { %v4093_v17 = vpop.eup %4092  ;;  %3066 = vst [vmem:[#allocation5 + $0xf08] sm:$0xff] %v2554_v8  ;;  %v2556_v18 = vsub.f32 1.0, %v2044_v9  ;;  %v2046_v19 = vmax.f32 %v4091_v12, 0.0  ;;  %4104 = vtanh.f32 %v1029_v0  ;;  %v1044_v11 = vmul.f32 0.5, %v532_v61  ;;  %v535_v12 = vld [vmem:[#allocation2 + $0xff0] sm:$0xff] }
 0x1f6   :  { %v4095_v22 = vpop.eup %4094  ;;  %3067 = vst [vmem:[#allocation5 + $0xf10] sm:$0xff] %v2555_v13  ;;  %v2557_v23 = vsub.f32 1.0, %v2045_v14  ;;  %v2047_v24 = vmax.f32 %v4093_v17, 0.0  ;;  %4106 = vtanh.f32 %v1030_v5  ;;  %v1045_v16 = vmul.f32 0.5, %v533_v2  ;;  %v536_v17 = vld [vmem:[#allocation2 + $0xff8] sm:$0xff] }
 0x1f7   :  { %v4097_v27 = vpop.eup %4096  ;;  %3068 = vst [vmem:[#allocation5 + $0xf18] sm:$0xff] %v2556_v18  ;;  %v2558_v28 = vsub.f32 1.0, %v2046_v19  ;;  %v2048_v29 = vmax.f32 %v4095_v22, 0.0  ;;  %4108 = vtanh.f32 %v1031_v10  ;;  %v1046_v21 = vmul.f32 0.5, %v534_v7 }
 0x1f8   :  { %v4099_v32 = vpop.eup %4098  ;;  %3069 = vst [vmem:[#allocation5 + $0xf20] sm:$0xff] %v2557_v23  ;;  %v2559_v33 = vsub.f32 1.0, %v2047_v24  ;;  %v2049_v34 = vmax.f32 %v4097_v27, 0.0  ;;  %4110 = vtanh.f32 %v1032_v15 }
 0x1f9   :  { %v4101_v37 = vpop.eup %4100  ;;  %3070 = vst [vmem:[#allocation5 + $0xf28] sm:$0xff] %v2558_v28  ;;  %v2560_v38 = vsub.f32 1.0, %v2048_v29  ;;  %v2050_v39 = vmax.f32 %v4099_v32, 0.0  ;;  %4112 = vtanh.f32 %v1033_v20  ;;  %v1048_v29 = vmul.f32 0.5, %v536_v17 }
 0x1fa   :  { %v4103_v42 = vpop.eup %4102  ;;  %3071 = vst [vmem:[#allocation5 + $0xf30] sm:$0xff] %v2559_v33  ;;  %v2561_v43 = vsub.f32 1.0, %v2049_v34  ;;  %v2051_v44 = vmax.f32 %v4101_v37, 0.0  ;;  %4114 = vtanh.f32 %v1034_v25  ;;  %v1047_v25 = vmul.f32 0.5, %v535_v12 }
 0x1fb   :  { %v4105_v47 = vpop.eup %4104  ;;  %3072 = vst [vmem:[#allocation5 + $0xf38] sm:$0xff] %v2560_v38  ;;  %v2562_v48 = vsub.f32 1.0, %v2050_v39  ;;  %v2052_v49 = vmax.f32 %v4103_v42, 0.0  ;;  %4116 = vtanh.f32 %v1035_v30 }
 0x1fc   :  { %v4107_v52 = vpop.eup %4106  ;;  %3073 = vst [vmem:[#allocation5 + $0xf40] sm:$0xff] %v2561_v43  ;;  %v2563_v53 = vsub.f32 1.0, %v2051_v44  ;;  %v2053_v54 = vmax.f32 %v4105_v47, 0.0  ;;  %4118 = vtanh.f32 %v1036_v35 }
 0x1fd   :  { %v4109_v57 = vpop.eup %4108  ;;  %3074 = vst [vmem:[#allocation5 + $0xf48] sm:$0xff] %v2562_v48  ;;  %v2564_v58 = vsub.f32 1.0, %v2052_v49  ;;  %v2054_v59 = vmax.f32 %v4107_v52, 0.0  ;;  %4120 = vtanh.f32 %v1037_v40 }
 0x1fe   :  { %v4111_v62 = vpop.eup %4110  ;;  %3075 = vst [vmem:[#allocation5 + $0xf50] sm:$0xff] %v2563_v53  ;;  %v2565_v63 = vsub.f32 1.0, %v2053_v54  ;;  %v2055_v0 = vmax.f32 %v4109_v57, 0.0  ;;  %4122 = vtanh.f32 %v1038_v45 }
 0x1ff   :  { %v4113_v3 = vpop.eup %4112  ;;  %3076 = vst [vmem:[#allocation5 + $0xf58] sm:$0xff] %v2564_v58  ;;  %v2566_v4 = vsub.f32 1.0, %v2054_v59  ;;  %v2056_v5 = vmax.f32 %v4111_v62, 0.0  ;;  %4124 = vtanh.f32 %v1039_v50 }
 0x200   :  { %v4115_v8 = vpop.eup %4114  ;;  %3077 = vst [vmem:[#allocation5 + $0xf60] sm:$0xff] %v2565_v63  ;;  %v2567_v9 = vsub.f32 1.0, %v2055_v0  ;;  %v2057_v10 = vmax.f32 %v4113_v3, 0.0  ;;  %4126 = vtanh.f32 %v1040_v55 }
 0x201   :  { %v4117_v13 = vpop.eup %4116  ;;  %3078 = vst [vmem:[#allocation5 + $0xf68] sm:$0xff] %v2566_v4  ;;  %v2568_v14 = vsub.f32 1.0, %v2056_v5  ;;  %v2058_v15 = vmax.f32 %v4115_v8, 0.0  ;;  %4128 = vtanh.f32 %v1041_v60 }
 0x202   :  { %v4119_v18 = vpop.eup %4118  ;;  %3079 = vst [vmem:[#allocation5 + $0xf70] sm:$0xff] %v2567_v9  ;;  %v2569_v19 = vsub.f32 1.0, %v2057_v10  ;;  %v2059_v20 = vmax.f32 %v4117_v13, 0.0  ;;  %4130 = vtanh.f32 %v1042_v1 }
 0x203   :  { %v4121_v22 = vpop.eup %4120  ;;  %3080 = vst [vmem:[#allocation5 + $0xf78] sm:$0xff] %v2568_v14  ;;  %v2570_v23 = vsub.f32 1.0, %v2058_v15  ;;  %v2060_v24 = vmax.f32 %v4119_v18, 0.0  ;;  %4132 = vtanh.f32 %v1043_v6 }
 0x204   :  { %v4123_v26 = vpop.eup %4122  ;;  %3081 = vst [vmem:[#allocation5 + $0xf80] sm:$0xff] %v2569_v19  ;;  %v2571_v27 = vsub.f32 1.0, %v2059_v20  ;;  %v2061_v28 = vmax.f32 %v4121_v22, 0.0  ;;  %4134 = vtanh.f32 %v1044_v11 }
 0x205   :  { %v4125_v30 = vpop.eup %4124  ;;  %3082 = vst [vmem:[#allocation5 + $0xf88] sm:$0xff] %v2570_v23  ;;  %v2572_v31 = vsub.f32 1.0, %v2060_v24  ;;  %v2062_v32 = vmax.f32 %v4123_v26, 0.0  ;;  %4136 = vtanh.f32 %v1045_v16 }
 0x206   :  { %v4127_v33 = vpop.eup %4126  ;;  %3083 = vst [vmem:[#allocation5 + $0xf90] sm:$0xff] %v2571_v27  ;;  %v2573_v34 = vsub.f32 1.0, %v2061_v28  ;;  %v2063_v35 = vmax.f32 %v4125_v30, 0.0  ;;  %4138 = vtanh.f32 %v1046_v21 }
 0x207   :  { %v4129_v36 = vpop.eup %4128  ;;  %3084 = vst [vmem:[#allocation5 + $0xf98] sm:$0xff] %v2572_v31  ;;  %v2574_v37 = vsub.f32 1.0, %v2062_v32  ;;  %v2064_v38 = vmax.f32 %v4127_v33, 0.0  ;;  %4140 = vtanh.f32 %v1047_v25 }
 0x208   :  { %v4131_v39 = vpop.eup %4130  ;;  %3085 = vst [vmem:[#allocation5 + $0xfa0] sm:$0xff] %v2573_v34  ;;  %v2575_v40 = vsub.f32 1.0, %v2063_v35  ;;  %v2065_v41 = vmax.f32 %v4129_v36, 0.0  ;;  %4142 = vtanh.f32 %v1048_v29 }
 0x209   :  { %v4133_v42 = vpop.eup %4132  ;;  %3086 = vst [vmem:[#allocation5 + $0xfa8] sm:$0xff] %v2574_v37  ;;  %v2576_v43 = vsub.f32 1.0, %v2064_v38  ;;  %v2066_v44 = vmax.f32 %v4131_v39, 0.0 }
 0x20a   :  { %v4135_v45 = vpop.eup %4134  ;;  %3087 = vst [vmem:[#allocation5 + $0xfb0] sm:$0xff] %v2575_v40  ;;  %v2577_v46 = vsub.f32 1.0, %v2065_v41  ;;  %v2067_v47 = vmax.f32 %v4133_v42, 0.0 }
 0x20b   :  { %v4137_v48 = vpop.eup %4136  ;;  %3088 = vst [vmem:[#allocation5 + $0xfb8] sm:$0xff] %v2576_v43  ;;  %v2578_v49 = vsub.f32 1.0, %v2066_v44  ;;  %v2068_v50 = vmax.f32 %v4135_v45, 0.0 }
 0x20c   :  { %v4139_v51 = vpop.eup %4138  ;;  %3089 = vst [vmem:[#allocation5 + $0xfc0] sm:$0xff] %v2577_v46  ;;  %v2579_v52 = vsub.f32 1.0, %v2067_v47  ;;  %v2069_v53 = vmax.f32 %v4137_v48, 0.0 }
 0x20d   :  { %v4141_v54 = vpop.eup %4140  ;;  %3090 = vst [vmem:[#allocation5 + $0xfc8] sm:$0xff] %v2578_v49  ;;  %v2580_v55 = vsub.f32 1.0, %v2068_v50  ;;  %v2070_v56 = vmax.f32 %v4139_v51, 0.0 }
 0x20e   :  { %v4143_v57 = vpop.eup %4142  ;;  %3091 = vst [vmem:[#allocation5 + $0xfd0] sm:$0xff] %v2579_v52  ;;  %v2581_v58 = vsub.f32 1.0, %v2069_v53  ;;  %v2071_v59 = vmax.f32 %v4141_v54, 0.0 }
 0x20f   :  { %3092 = vst [vmem:[#allocation5 + $0xfd8] sm:$0xff] %v2580_v55  ;;  %v2582_v60 = vsub.f32 1.0, %v2070_v56  ;;  %v2072_v61 = vmax.f32 %v4143_v57, 0.0 }
 0x210   :  { %3093 = vst [vmem:[#allocation5 + $0xfe0] sm:$0xff] %v2581_v58  ;;  %v2583_v62 = vsub.f32 1.0, %v2071_v59 }
 0x211   :  { %3094 = vst [vmem:[#allocation5 + $0xfe8] sm:$0xff] %v2582_v60  ;;  %v2584_v63 = vsub.f32 1.0, %v2072_v61 }
 0x212   :  { %3095 = vst [vmem:[#allocation5 + $0xff0] sm:$0xff] %v2583_v62 }
 0x213   :  { %3096 = vst [vmem:[#allocation5 + $0xff8] sm:$0xff] %v2584_v63 }
 0x214   :  { %3109 = dma.vmem_to_hbm [thread:$0]  %s3102_s13, 65536, %s3104_s16, [#allocation4], %s4197_s11, %s4197_s11, %s4198_s12  }
 0x215   :  { %4194 = dma.done.wait [#allocation4], 65536  }
 0x216   :  { %4195 = vsyncadd [#allocation4], 4294901760 }
 0x217   :  { %3114 = vsyncpa [#allocation3], 1 }
 0x218   :  { %3115 = vsyncpa [#allocation4], 1 }

</bundles_post_ra>
